<compile_context>
chip_gen: v7x
topology: tpu7x:2x2x1
jax: 0.10.0
libtpu: 0.0.40
codegen_flags: <defaults>
</compile_context>

<pallas_src>
import jax
import jax.numpy as jnp
from jax.experimental import pallas as pl
from jax.experimental.pallas import tpu as pltpu

B = 8          # batch
D = 16         # input_dim
H = 32         # hidden_dim
L = 10         # total coupling layers (3 ckbd + 3 simple + 4 ckbd)
DP = 128       # lane-aligned offset of the translate half in the fused W3 output
WOUT = 2 * DP  # fused (padded) scale|translate output width
BN_EPS = 1e-5
NORM_EPS = 1e-6


def flow_kernel(x_ref, w1_ref, w2_ref, w3_ref, b3_ref, hvec_ref, dvec_ref,
                y_ref, sldj_ref):
    x = x_ref[...].astype(jnp.float32)
    inv_b = 1.0 / B

    # ---- fused double column-normalization (one stats pass) ----
    # RealFlowNVP.forward normalizes, then _preprocess normalizes again.
    # After the first pass the column mean is analytically 0 and the variance
    # is var/(var+eps), so both passes collapse into one combined scale.
    s1 = jnp.sum(x, axis=0, keepdims=True)
    s2 = jnp.sum(x * x, axis=0, keepdims=True)
    mu = s1 * inv_b
    var = s2 * inv_b - mu * mu
    scale = (jax.lax.rsqrt(var + NORM_EPS)
             * jax.lax.rsqrt(var / (var + NORM_EPS) + NORM_EPS))
    x = (x - mu) * scale

    # softplus(x) + softplus(-x) == |x| + 2*log1p(exp(-|x|))  (one exp, one log1p)
    ax = jnp.abs(x)
    s_acc = ax + 2.0 * jnp.log1p(jnp.exp(-ax))   # running (B, D) log-det accumulator

    def _bn(h, gamma, beta):
        # single-pass batch statistics: two independent reductions, no mu->var chain
        hs1 = jnp.sum(h, axis=0, keepdims=True)
        hs2 = jnp.sum(h * h, axis=0, keepdims=True)
        m = hs1 * inv_b
        v = hs2 * inv_b - m * m
        return (h - m) * jax.lax.rsqrt(v + BN_EPS) * gamma + beta

    # Statically unrolled layer loop; all parameters are VMEM-resident.
    for l in range(L):
        w1 = w1_ref[l]            # (D, 2H)    bf16  = [W1_s | W1_t]
        w2 = w2_ref[l]            # (2H, 2H)   bf16  = blkdiag(W2_s, W2_t)
        w3 = w3_ref[l]            # (2H, WOUT) bf16  s -> lanes [0,D), t -> [DP,DP+D)
        b3 = b3_ref[l]            # (B, WOUT)  f32   pre-broadcast fused bias
        hv = hvec_ref[l]          # (6, B, 2H) f32   b1, g1, be1, b2, g2, be2
        dv = dvec_ref[l]          # (3, B, D)  f32   mask, 1-mask, rescale

        mask = dv[0]
        inv = dv[1]
        resc = dv[2]

        xm = (x * mask).astype(jnp.bfloat16)                         # apply_mask(x, mask)
        h = jnp.dot(xm, w1, preferred_element_type=jnp.float32) + hv[0]
        h = _bn(jnp.maximum(h, 0.0), hv[1], hv[2]).astype(jnp.bfloat16)
        h = jnp.dot(h, w2, preferred_element_type=jnp.float32) + hv[3]
        h = _bn(jnp.maximum(h, 0.0), hv[4], hv[5]).astype(jnp.bfloat16)
        st = jnp.dot(h, w3, preferred_element_type=jnp.float32) + b3  # (B, WOUT)

        s = resc * jnp.tanh(st[:, :D]) * inv          # rescale(tanh(s)) * (1 - mask)
        t = st[:, DP:DP + D] * inv                    # zero-offset vreg slice
        x = x * jnp.exp(s) + t                        # forward coupling
        s_acc = s_acc + s                             # deferred log-det reduction

    y_ref[...] = x
    sldj_ref[...] = jnp.sum(s_acc, axis=1, keepdims=True)   # single lane reduction


def realflow_nvp(x, params):
    w1, w2, w3, b3, hvec, dvec = params
    vspec = pl.BlockSpec(memory_space=pltpu.MemorySpace.VMEM)
    flops = 2 * B * L * (D * 2 * H + (2 * H) * (2 * H) + (2 * H) * WOUT)
    bytes_accessed = int(
        sum(int(a.size) * a.dtype.itemsize for a in (x, w1, w2, w3, b3, hvec, dvec))
        + B * D * 4 + B * 4)
    ce = pl.CostEstimate(
        flops=flops,
        transcendentals=B * D * (2 * L + 2),
        bytes_accessed=bytes_accessed)
    y, sldj = pl.pallas_call(
        flow_kernel,
        out_shape=(jax.ShapeDtypeStruct((B, D), jnp.float32),
                   jax.ShapeDtypeStruct((B, 1), jnp.float32)),
        in_specs=[vspec] * 7,
        out_specs=(vspec, vspec),
        cost_estimate=ce,
    )(x, w1, w2, w3, b3, hvec, dvec)
    return y, sldj[:, 0]


def init_params(key):
    def xavier(k, fi, fo):
        a = (6.0 / (fi + fo)) ** 0.5
        return jax.random.uniform(k, (fi, fo), jnp.float32, -a, a)

    kiter = iter(jax.random.split(key, L * 6))
    w1l, w2l, w3l = [], [], []
    for _ in range(L):
        w1s, w1t = xavier(next(kiter), D, H), xavier(next(kiter), D, H)
        w2s, w2t = xavier(next(kiter), H, H), xavier(next(kiter), H, H)
        w3s, w3t = xavier(next(kiter), H, D), xavier(next(kiter), H, D)
        # fused first layer: columns [scale | translate]
        w1l.append(jnp.concatenate([w1s, w1t], axis=1))                 # (D, 2H)
        # block-diagonal second layer
        w2 = jnp.zeros((2 * H, 2 * H), jnp.float32)
        w2 = w2.at[:H, :H].set(w2s).at[H:, H:].set(w2t)
        w2l.append(w2)
        # lane-aligned third layer: s -> lanes [0, D), t -> lanes [DP, DP + D)
        w3 = jnp.zeros((2 * H, WOUT), jnp.float32)
        w3 = w3.at[:H, :D].set(w3s).at[H:, DP:DP + D].set(w3t)
        w3l.append(w3)

    w1 = jnp.stack(w1l).astype(jnp.bfloat16)
    w2 = jnp.stack(w2l).astype(jnp.bfloat16)
    w3 = jnp.stack(w3l).astype(jnp.bfloat16)

    # Linear biases are zero-initialized in the reference (nn.init.zeros_).
    b3 = jnp.zeros((L, B, WOUT), jnp.float32)

    # hvec rows (pre-broadcast over B): 0 b1, 1 g1, 2 be1, 3 b2, 4 g2, 5 be2
    hvec = jnp.zeros((L, 6, B, 2 * H), jnp.float32)
    hvec = hvec.at[:, 1].set(1.0)   # BN1 gamma
    hvec = hvec.at[:, 4].set(1.0)   # BN2 gamma

    # Masks per layer (checkerboard ignores reverse_simple_mask, matching the source).
    ckbd = (jnp.arange(D) % 2 == 0).astype(jnp.float32)
    half = (jnp.arange(D) < D // 2).astype(jnp.float32)
    mask_rows = [ckbd, ckbd, ckbd,              # scale-0 in_couplings (checkerboard)
                 half, 1.0 - half, half,        # scale-0 out_couplings (simple F/T/F)
                 ckbd, ckbd, ckbd, ckbd]        # scale-1 in_couplings (checkerboard x4)
    masks = jnp.stack(mask_rows)                # (L, D)

    # dvec rows (pre-broadcast over B): 0 mask, 1 1-mask, 2 rescale (ones at init)
    dvec = jnp.zeros((L, 3, B, D), jnp.float32)
    dvec = dvec.at[:, 0].set(masks[:, None, :])
    dvec = dvec.at[:, 1].set(1.0 - masks[:, None, :])
    dvec = dvec.at[:, 2].set(1.0)   # weight_norm(DataRescale) effective weight

    return (w1, w2, w3, b3, hvec, dvec)


if __name__ == "__main__":
    key = jax.random.PRNGKey(0)
    kx, kp = jax.random.split(key)
    x = jax.random.normal(kx, (B, D), jnp.float32)
    params = init_params(kp)

    y, sldj = jax.jit(realflow_nvp)(x, params)
    jax.block_until_ready((y, sldj))

    assert y.shape == (B, D), y.shape
    assert sldj.shape == (B,), sldj.shape
    assert bool(jnp.all(jnp.isfinite(y))) and bool(jnp.all(jnp.isfinite(sldj)))
    print("KERNEL_OK")
</pallas_src>

<mosaic_0001>
module attributes {stable_mosaic.version = 11 : i64} {
  func.func @flow_kernel(%arg0: memref<8x16xf32, #tpu.memory_space<vmem>>, %arg1: memref<10x16x64xbf16, #tpu.memory_space<vmem>>, %arg2: memref<10x64x64xbf16, #tpu.memory_space<vmem>>, %arg3: memref<10x64x256xbf16, #tpu.memory_space<vmem>>, %arg4: memref<10x8x256xf32, #tpu.memory_space<vmem>>, %arg5: memref<10x6x8x64xf32, #tpu.memory_space<vmem>>, %arg6: memref<10x3x8x16xf32, #tpu.memory_space<vmem>>, %arg7: memref<8x16xf32, #tpu.memory_space<vmem>>, %arg8: memref<8x1xf32, #tpu.memory_space<vmem>>) attributes {dimension_semantics = [], scalar_prefetch = 0 : i64, scratch_operands = 0 : i64, tpu.core_type = #tpu.core_type<tc>} {
    %c0 = arith.constant 0 : index
    %c0_0 = arith.constant 0 : index
    %0 = vector.load %arg0[%c0, %c0_0] : memref<8x16xf32, #tpu.memory_space<vmem>>, vector<8x16xf32>
    %cst = arith.constant dense<0.000000e+00> : vector<16xf32>
    %1 = vector.multi_reduction <add>, %0, %cst [0] : vector<8x16xf32> to vector<16xf32>
    %2 = vector.shape_cast %1 : vector<16xf32> to vector<1x16xf32>
    %3 = arith.mulf %0, %0 : vector<8x16xf32>
    %cst_1 = arith.constant dense<0.000000e+00> : vector<16xf32>
    %4 = vector.multi_reduction <add>, %3, %cst_1 [0] : vector<8x16xf32> to vector<16xf32>
    %5 = vector.shape_cast %4 : vector<16xf32> to vector<1x16xf32>
    %cst_2 = arith.constant 1.250000e-01 : f32
    %6 = vector.broadcast %cst_2 : f32 to vector<1x16xf32>
    %7 = arith.mulf %2, %6 : vector<1x16xf32>
    %cst_3 = arith.constant 1.250000e-01 : f32
    %8 = vector.broadcast %cst_3 : f32 to vector<1x16xf32>
    %9 = arith.mulf %5, %8 : vector<1x16xf32>
    %10 = arith.mulf %7, %7 : vector<1x16xf32>
    %11 = arith.subf %9, %10 : vector<1x16xf32>
    %cst_4 = arith.constant 9.99999997E-7 : f32
    %12 = vector.broadcast %cst_4 : f32 to vector<1x16xf32>
    %13 = arith.addf %11, %12 : vector<1x16xf32>
    %14 = math.rsqrt %13 : vector<1x16xf32>
    %cst_5 = arith.constant 9.99999997E-7 : f32
    %15 = vector.broadcast %cst_5 : f32 to vector<1x16xf32>
    %16 = arith.addf %11, %15 : vector<1x16xf32>
    %17 = arith.divf %11, %16 : vector<1x16xf32>
    %cst_6 = arith.constant 9.99999997E-7 : f32
    %18 = vector.broadcast %cst_6 : f32 to vector<1x16xf32>
    %19 = arith.addf %17, %18 : vector<1x16xf32>
    %20 = math.rsqrt %19 : vector<1x16xf32>
    %21 = arith.mulf %14, %20 : vector<1x16xf32>
    %22 = vector.broadcast %7 : vector<1x16xf32> to vector<8x16xf32>
    %23 = arith.subf %0, %22 : vector<8x16xf32>
    %24 = vector.broadcast %21 : vector<1x16xf32> to vector<8x16xf32>
    %25 = arith.mulf %23, %24 : vector<8x16xf32>
    %26 = math.absf %25 : vector<8x16xf32>
    %cst_7 = arith.constant 0.000000e+00 : f32
    %27 = vector.broadcast %cst_7 : f32 to vector<8x16xf32>
    %28 = arith.subf %27, %26 : vector<8x16xf32>
    %29 = math.exp %28 : vector<8x16xf32>
    %30 = math.log1p %29 : vector<8x16xf32>
    %cst_8 = arith.constant 2.000000e+00 : f32
    %31 = vector.broadcast %cst_8 : f32 to vector<8x16xf32>
    %32 = arith.mulf %31, %30 : vector<8x16xf32>
    %33 = arith.addf %26, %32 : vector<8x16xf32>
    %c0_9 = arith.constant 0 : index
    %c0_10 = arith.constant 0 : index
    %c0_11 = arith.constant 0 : index
    %34 = vector.load %arg1[%c0_9, %c0_10, %c0_11] : memref<10x16x64xbf16, #tpu.memory_space<vmem>>, vector<1x16x64xbf16>
    %35 = vector.shape_cast %34 : vector<1x16x64xbf16> to vector<16x64xbf16>
    %c0_12 = arith.constant 0 : index
    %c0_13 = arith.constant 0 : index
    %c0_14 = arith.constant 0 : index
    %36 = vector.load %arg2[%c0_12, %c0_13, %c0_14] : memref<10x64x64xbf16, #tpu.memory_space<vmem>>, vector<1x64x64xbf16>
    %37 = vector.shape_cast %36 : vector<1x64x64xbf16> to vector<64x64xbf16>
    %c0_15 = arith.constant 0 : index
    %c0_16 = arith.constant 0 : index
    %c0_17 = arith.constant 0 : index
    %38 = vector.load %arg3[%c0_15, %c0_16, %c0_17] : memref<10x64x256xbf16, #tpu.memory_space<vmem>>, vector<1x64x256xbf16>
    %39 = vector.shape_cast %38 : vector<1x64x256xbf16> to vector<64x256xbf16>
    %c0_18 = arith.constant 0 : index
    %c0_19 = arith.constant 0 : index
    %c0_20 = arith.constant 0 : index
    %40 = vector.load %arg4[%c0_18, %c0_19, %c0_20] : memref<10x8x256xf32, #tpu.memory_space<vmem>>, vector<1x8x256xf32>
    %41 = vector.shape_cast %40 : vector<1x8x256xf32> to vector<8x256xf32>
    %c0_21 = arith.constant 0 : index
    %c0_22 = arith.constant 0 : index
    %c0_23 = arith.constant 0 : index
    %c0_24 = arith.constant 0 : index
    %42 = vector.load %arg5[%c0_21, %c0_22, %c0_23, %c0_24] : memref<10x6x8x64xf32, #tpu.memory_space<vmem>>, vector<1x6x8x64xf32>
    %43 = vector.shape_cast %42 : vector<1x6x8x64xf32> to vector<6x8x64xf32>
    %c0_25 = arith.constant 0 : index
    %c0_26 = arith.constant 0 : index
    %c0_27 = arith.constant 0 : index
    %c0_28 = arith.constant 0 : index
    %44 = vector.load %arg6[%c0_25, %c0_26, %c0_27, %c0_28] : memref<10x3x8x16xf32, #tpu.memory_space<vmem>>, vector<1x3x8x16xf32>
    %45 = vector.shape_cast %44 : vector<1x3x8x16xf32> to vector<3x8x16xf32>
    %46 = vector.extract_strided_slice %45 {offsets = [0, 0, 0], sizes = [1, 8, 16], strides = [1, 1, 1]} : vector<3x8x16xf32> to vector<1x8x16xf32>
    %47 = vector.shape_cast %46 : vector<1x8x16xf32> to vector<8x16xf32>
    %48 = vector.extract_strided_slice %45 {offsets = [1, 0, 0], sizes = [1, 8, 16], strides = [1, 1, 1]} : vector<3x8x16xf32> to vector<1x8x16xf32>
    %49 = vector.shape_cast %48 : vector<1x8x16xf32> to vector<8x16xf32>
    %50 = vector.extract_strided_slice %45 {offsets = [2, 0, 0], sizes = [1, 8, 16], strides = [1, 1, 1]} : vector<3x8x16xf32> to vector<1x8x16xf32>
    %51 = vector.shape_cast %50 : vector<1x8x16xf32> to vector<8x16xf32>
    %52 = arith.mulf %25, %47 : vector<8x16xf32>
    %53 = arith.truncf %52 : vector<8x16xf32> to vector<8x16xbf16>
    %cst_29 = arith.constant dense<0.000000e+00> : vector<8x64xf32>
    %54 = tpu.matmul %53, %35, %cst_29 {dimension_numbers = #tpu.dot_dimension_numbers<[1], [0], [0], [1], [0, 0, 1, 1], [], []>} : vector<8x16xbf16>, vector<16x64xbf16>, vector<8x64xf32> -> vector<8x64xf32>
    %55 = vector.extract_strided_slice %43 {offsets = [0, 0, 0], sizes = [1, 8, 64], strides = [1, 1, 1]} : vector<6x8x64xf32> to vector<1x8x64xf32>
    %56 = vector.shape_cast %55 : vector<1x8x64xf32> to vector<8x64xf32>
    %57 = arith.addf %54, %56 : vector<8x64xf32>
    %cst_30 = arith.constant 0.000000e+00 : f32
    %58 = vector.broadcast %cst_30 : f32 to vector<8x64xf32>
    %59 = arith.maximumf %57, %58 : vector<8x64xf32>
    %60 = vector.extract_strided_slice %43 {offsets = [1, 0, 0], sizes = [1, 8, 64], strides = [1, 1, 1]} : vector<6x8x64xf32> to vector<1x8x64xf32>
    %61 = vector.shape_cast %60 : vector<1x8x64xf32> to vector<8x64xf32>
    %62 = vector.extract_strided_slice %43 {offsets = [2, 0, 0], sizes = [1, 8, 64], strides = [1, 1, 1]} : vector<6x8x64xf32> to vector<1x8x64xf32>
    %63 = vector.shape_cast %62 : vector<1x8x64xf32> to vector<8x64xf32>
    %cst_31 = arith.constant dense<0.000000e+00> : vector<64xf32>
    %64 = vector.multi_reduction <add>, %59, %cst_31 [0] : vector<8x64xf32> to vector<64xf32>
    %65 = vector.shape_cast %64 : vector<64xf32> to vector<1x64xf32>
    %66 = arith.mulf %59, %59 : vector<8x64xf32>
    %cst_32 = arith.constant dense<0.000000e+00> : vector<64xf32>
    %67 = vector.multi_reduction <add>, %66, %cst_32 [0] : vector<8x64xf32> to vector<64xf32>
    %68 = vector.shape_cast %67 : vector<64xf32> to vector<1x64xf32>
    %cst_33 = arith.constant 1.250000e-01 : f32
    %69 = vector.broadcast %cst_33 : f32 to vector<1x64xf32>
    %70 = arith.mulf %65, %69 : vector<1x64xf32>
    %cst_34 = arith.constant 1.250000e-01 : f32
    %71 = vector.broadcast %cst_34 : f32 to vector<1x64xf32>
    %72 = arith.mulf %68, %71 : vector<1x64xf32>
    %73 = arith.mulf %70, %70 : vector<1x64xf32>
    %74 = arith.subf %72, %73 : vector<1x64xf32>
    %75 = vector.broadcast %70 : vector<1x64xf32> to vector<8x64xf32>
    %76 = arith.subf %59, %75 : vector<8x64xf32>
    %cst_35 = arith.constant 9.99999974E-6 : f32
    %77 = vector.broadcast %cst_35 : f32 to vector<1x64xf32>
    %78 = arith.addf %74, %77 : vector<1x64xf32>
    %79 = math.rsqrt %78 : vector<1x64xf32>
    %80 = vector.broadcast %79 : vector<1x64xf32> to vector<8x64xf32>
    %81 = arith.mulf %76, %80 : vector<8x64xf32>
    %82 = arith.mulf %81, %61 : vector<8x64xf32>
    %83 = arith.addf %82, %63 : vector<8x64xf32>
    %84 = arith.truncf %83 : vector<8x64xf32> to vector<8x64xbf16>
    %cst_36 = arith.constant dense<0.000000e+00> : vector<8x64xf32>
    %85 = tpu.matmul %84, %37, %cst_36 {dimension_numbers = #tpu.dot_dimension_numbers<[1], [0], [0], [1], [0, 0, 1, 1], [], []>} : vector<8x64xbf16>, vector<64x64xbf16>, vector<8x64xf32> -> vector<8x64xf32>
    %86 = vector.extract_strided_slice %43 {offsets = [3, 0, 0], sizes = [1, 8, 64], strides = [1, 1, 1]} : vector<6x8x64xf32> to vector<1x8x64xf32>
    %87 = vector.shape_cast %86 : vector<1x8x64xf32> to vector<8x64xf32>
    %88 = arith.addf %85, %87 : vector<8x64xf32>
    %cst_37 = arith.constant 0.000000e+00 : f32
    %89 = vector.broadcast %cst_37 : f32 to vector<8x64xf32>
    %90 = arith.maximumf %88, %89 : vector<8x64xf32>
    %91 = vector.extract_strided_slice %43 {offsets = [4, 0, 0], sizes = [1, 8, 64], strides = [1, 1, 1]} : vector<6x8x64xf32> to vector<1x8x64xf32>
    %92 = vector.shape_cast %91 : vector<1x8x64xf32> to vector<8x64xf32>
    %93 = vector.extract_strided_slice %43 {offsets = [5, 0, 0], sizes = [1, 8, 64], strides = [1, 1, 1]} : vector<6x8x64xf32> to vector<1x8x64xf32>
    %94 = vector.shape_cast %93 : vector<1x8x64xf32> to vector<8x64xf32>
    %cst_38 = arith.constant dense<0.000000e+00> : vector<64xf32>
    %95 = vector.multi_reduction <add>, %90, %cst_38 [0] : vector<8x64xf32> to vector<64xf32>
    %96 = vector.shape_cast %95 : vector<64xf32> to vector<1x64xf32>
    %97 = arith.mulf %90, %90 : vector<8x64xf32>
    %cst_39 = arith.constant dense<0.000000e+00> : vector<64xf32>
    %98 = vector.multi_reduction <add>, %97, %cst_39 [0] : vector<8x64xf32> to vector<64xf32>
    %99 = vector.shape_cast %98 : vector<64xf32> to vector<1x64xf32>
    %cst_40 = arith.constant 1.250000e-01 : f32
    %100 = vector.broadcast %cst_40 : f32 to vector<1x64xf32>
    %101 = arith.mulf %96, %100 : vector<1x64xf32>
    %cst_41 = arith.constant 1.250000e-01 : f32
    %102 = vector.broadcast %cst_41 : f32 to vector<1x64xf32>
    %103 = arith.mulf %99, %102 : vector<1x64xf32>
    %104 = arith.mulf %101, %101 : vector<1x64xf32>
    %105 = arith.subf %103, %104 : vector<1x64xf32>
    %106 = vector.broadcast %101 : vector<1x64xf32> to vector<8x64xf32>
    %107 = arith.subf %90, %106 : vector<8x64xf32>
    %cst_42 = arith.constant 9.99999974E-6 : f32
    %108 = vector.broadcast %cst_42 : f32 to vector<1x64xf32>
    %109 = arith.addf %105, %108 : vector<1x64xf32>
    %110 = math.rsqrt %109 : vector<1x64xf32>
    %111 = vector.broadcast %110 : vector<1x64xf32> to vector<8x64xf32>
    %112 = arith.mulf %107, %111 : vector<8x64xf32>
    %113 = arith.mulf %112, %92 : vector<8x64xf32>
    %114 = arith.addf %113, %94 : vector<8x64xf32>
    %115 = arith.truncf %114 : vector<8x64xf32> to vector<8x64xbf16>
    %cst_43 = arith.constant dense<0.000000e+00> : vector<8x256xf32>
    %116 = tpu.matmul %115, %39, %cst_43 {dimension_numbers = #tpu.dot_dimension_numbers<[1], [0], [0], [1], [0, 0, 1, 1], [], []>} : vector<8x64xbf16>, vector<64x256xbf16>, vector<8x256xf32> -> vector<8x256xf32>
    %117 = arith.addf %116, %41 : vector<8x256xf32>
    %118 = vector.extract_strided_slice %117 {offsets = [0, 0], sizes = [8, 16], strides = [1, 1]} : vector<8x256xf32> to vector<8x16xf32>
    %119 = math.tanh %118 : vector<8x16xf32>
    %120 = arith.mulf %51, %119 : vector<8x16xf32>
    %121 = arith.mulf %120, %49 : vector<8x16xf32>
    %122 = vector.extract_strided_slice %117 {offsets = [0, 128], sizes = [8, 16], strides = [1, 1]} : vector<8x256xf32> to vector<8x16xf32>
    %123 = arith.mulf %122, %49 : vector<8x16xf32>
    %124 = math.exp %121 : vector<8x16xf32>
    %125 = arith.mulf %25, %124 : vector<8x16xf32>
    %126 = arith.addf %125, %123 : vector<8x16xf32>
    %127 = arith.addf %33, %121 : vector<8x16xf32>
    %c1 = arith.constant 1 : index
    %c0_44 = arith.constant 0 : index
    %c0_45 = arith.constant 0 : index
    %128 = vector.load %arg1[%c1, %c0_44, %c0_45] : memref<10x16x64xbf16, #tpu.memory_space<vmem>>, vector<1x16x64xbf16>
    %129 = vector.shape_cast %128 : vector<1x16x64xbf16> to vector<16x64xbf16>
    %c1_46 = arith.constant 1 : index
    %c0_47 = arith.constant 0 : index
    %c0_48 = arith.constant 0 : index
    %130 = vector.load %arg2[%c1_46, %c0_47, %c0_48] : memref<10x64x64xbf16, #tpu.memory_space<vmem>>, vector<1x64x64xbf16>
    %131 = vector.shape_cast %130 : vector<1x64x64xbf16> to vector<64x64xbf16>
    %c1_49 = arith.constant 1 : index
    %c0_50 = arith.constant 0 : index
    %c0_51 = arith.constant 0 : index
    %132 = vector.load %arg3[%c1_49, %c0_50, %c0_51] : memref<10x64x256xbf16, #tpu.memory_space<vmem>>, vector<1x64x256xbf16>
    %133 = vector.shape_cast %132 : vector<1x64x256xbf16> to vector<64x256xbf16>
    %c1_52 = arith.constant 1 : index
    %c0_53 = arith.constant 0 : index
    %c0_54 = arith.constant 0 : index
    %134 = vector.load %arg4[%c1_52, %c0_53, %c0_54] : memref<10x8x256xf32, #tpu.memory_space<vmem>>, vector<1x8x256xf32>
    %135 = vector.shape_cast %134 : vector<1x8x256xf32> to vector<8x256xf32>
    %c1_55 = arith.constant 1 : index
    %c0_56 = arith.constant 0 : index
    %c0_57 = arith.constant 0 : index
    %c0_58 = arith.constant 0 : index
    %136 = vector.load %arg5[%c1_55, %c0_56, %c0_57, %c0_58] : memref<10x6x8x64xf32, #tpu.memory_space<vmem>>, vector<1x6x8x64xf32>
    %137 = vector.shape_cast %136 : vector<1x6x8x64xf32> to vector<6x8x64xf32>
    %c1_59 = arith.constant 1 : index
    %c0_60 = arith.constant 0 : index
    %c0_61 = arith.constant 0 : index
    %c0_62 = arith.constant 0 : index
    %138 = vector.load %arg6[%c1_59, %c0_60, %c0_61, %c0_62] : memref<10x3x8x16xf32, #tpu.memory_space<vmem>>, vector<1x3x8x16xf32>
    %139 = vector.shape_cast %138 : vector<1x3x8x16xf32> to vector<3x8x16xf32>
    %140 = vector.extract_strided_slice %139 {offsets = [0, 0, 0], sizes = [1, 8, 16], strides = [1, 1, 1]} : vector<3x8x16xf32> to vector<1x8x16xf32>
    %141 = vector.shape_cast %140 : vector<1x8x16xf32> to vector<8x16xf32>
    %142 = vector.extract_strided_slice %139 {offsets = [1, 0, 0], sizes = [1, 8, 16], strides = [1, 1, 1]} : vector<3x8x16xf32> to vector<1x8x16xf32>
    %143 = vector.shape_cast %142 : vector<1x8x16xf32> to vector<8x16xf32>
    %144 = vector.extract_strided_slice %139 {offsets = [2, 0, 0], sizes = [1, 8, 16], strides = [1, 1, 1]} : vector<3x8x16xf32> to vector<1x8x16xf32>
    %145 = vector.shape_cast %144 : vector<1x8x16xf32> to vector<8x16xf32>
    %146 = arith.mulf %126, %141 : vector<8x16xf32>
    %147 = arith.truncf %146 : vector<8x16xf32> to vector<8x16xbf16>
    %cst_63 = arith.constant dense<0.000000e+00> : vector<8x64xf32>
    %148 = tpu.matmul %147, %129, %cst_63 {dimension_numbers = #tpu.dot_dimension_numbers<[1], [0], [0], [1], [0, 0, 1, 1], [], []>} : vector<8x16xbf16>, vector<16x64xbf16>, vector<8x64xf32> -> vector<8x64xf32>
    %149 = vector.extract_strided_slice %137 {offsets = [0, 0, 0], sizes = [1, 8, 64], strides = [1, 1, 1]} : vector<6x8x64xf32> to vector<1x8x64xf32>
    %150 = vector.shape_cast %149 : vector<1x8x64xf32> to vector<8x64xf32>
    %151 = arith.addf %148, %150 : vector<8x64xf32>
    %cst_64 = arith.constant 0.000000e+00 : f32
    %152 = vector.broadcast %cst_64 : f32 to vector<8x64xf32>
    %153 = arith.maximumf %151, %152 : vector<8x64xf32>
    %154 = vector.extract_strided_slice %137 {offsets = [1, 0, 0], sizes = [1, 8, 64], strides = [1, 1, 1]} : vector<6x8x64xf32> to vector<1x8x64xf32>
    %155 = vector.shape_cast %154 : vector<1x8x64xf32> to vector<8x64xf32>
    %156 = vector.extract_strided_slice %137 {offsets = [2, 0, 0], sizes = [1, 8, 64], strides = [1, 1, 1]} : vector<6x8x64xf32> to vector<1x8x64xf32>
    %157 = vector.shape_cast %156 : vector<1x8x64xf32> to vector<8x64xf32>
    %cst_65 = arith.constant dense<0.000000e+00> : vector<64xf32>
    %158 = vector.multi_reduction <add>, %153, %cst_65 [0] : vector<8x64xf32> to vector<64xf32>
    %159 = vector.shape_cast %158 : vector<64xf32> to vector<1x64xf32>
    %160 = arith.mulf %153, %153 : vector<8x64xf32>
    %cst_66 = arith.constant dense<0.000000e+00> : vector<64xf32>
    %161 = vector.multi_reduction <add>, %160, %cst_66 [0] : vector<8x64xf32> to vector<64xf32>
    %162 = vector.shape_cast %161 : vector<64xf32> to vector<1x64xf32>
    %cst_67 = arith.constant 1.250000e-01 : f32
    %163 = vector.broadcast %cst_67 : f32 to vector<1x64xf32>
    %164 = arith.mulf %159, %163 : vector<1x64xf32>
    %cst_68 = arith.constant 1.250000e-01 : f32
    %165 = vector.broadcast %cst_68 : f32 to vector<1x64xf32>
    %166 = arith.mulf %162, %165 : vector<1x64xf32>
    %167 = arith.mulf %164, %164 : vector<1x64xf32>
    %168 = arith.subf %166, %167 : vector<1x64xf32>
    %169 = vector.broadcast %164 : vector<1x64xf32> to vector<8x64xf32>
    %170 = arith.subf %153, %169 : vector<8x64xf32>
    %cst_69 = arith.constant 9.99999974E-6 : f32
    %171 = vector.broadcast %cst_69 : f32 to vector<1x64xf32>
    %172 = arith.addf %168, %171 : vector<1x64xf32>
    %173 = math.rsqrt %172 : vector<1x64xf32>
    %174 = vector.broadcast %173 : vector<1x64xf32> to vector<8x64xf32>
    %175 = arith.mulf %170, %174 : vector<8x64xf32>
    %176 = arith.mulf %175, %155 : vector<8x64xf32>
    %177 = arith.addf %176, %157 : vector<8x64xf32>
    %178 = arith.truncf %177 : vector<8x64xf32> to vector<8x64xbf16>
    %cst_70 = arith.constant dense<0.000000e+00> : vector<8x64xf32>
    %179 = tpu.matmul %178, %131, %cst_70 {dimension_numbers = #tpu.dot_dimension_numbers<[1], [0], [0], [1], [0, 0, 1, 1], [], []>} : vector<8x64xbf16>, vector<64x64xbf16>, vector<8x64xf32> -> vector<8x64xf32>
    %180 = vector.extract_strided_slice %137 {offsets = [3, 0, 0], sizes = [1, 8, 64], strides = [1, 1, 1]} : vector<6x8x64xf32> to vector<1x8x64xf32>
    %181 = vector.shape_cast %180 : vector<1x8x64xf32> to vector<8x64xf32>
    %182 = arith.addf %179, %181 : vector<8x64xf32>
    %cst_71 = arith.constant 0.000000e+00 : f32
    %183 = vector.broadcast %cst_71 : f32 to vector<8x64xf32>
    %184 = arith.maximumf %182, %183 : vector<8x64xf32>
    %185 = vector.extract_strided_slice %137 {offsets = [4, 0, 0], sizes = [1, 8, 64], strides = [1, 1, 1]} : vector<6x8x64xf32> to vector<1x8x64xf32>
    %186 = vector.shape_cast %185 : vector<1x8x64xf32> to vector<8x64xf32>
    %187 = vector.extract_strided_slice %137 {offsets = [5, 0, 0], sizes = [1, 8, 64], strides = [1, 1, 1]} : vector<6x8x64xf32> to vector<1x8x64xf32>
    %188 = vector.shape_cast %187 : vector<1x8x64xf32> to vector<8x64xf32>
    %cst_72 = arith.constant dense<0.000000e+00> : vector<64xf32>
    %189 = vector.multi_reduction <add>, %184, %cst_72 [0] : vector<8x64xf32> to vector<64xf32>
    %190 = vector.shape_cast %189 : vector<64xf32> to vector<1x64xf32>
    %191 = arith.mulf %184, %184 : vector<8x64xf32>
    %cst_73 = arith.constant dense<0.000000e+00> : vector<64xf32>
    %192 = vector.multi_reduction <add>, %191, %cst_73 [0] : vector<8x64xf32> to vector<64xf32>
    %193 = vector.shape_cast %192 : vector<64xf32> to vector<1x64xf32>
    %cst_74 = arith.constant 1.250000e-01 : f32
    %194 = vector.broadcast %cst_74 : f32 to vector<1x64xf32>
    %195 = arith.mulf %190, %194 : vector<1x64xf32>
    %cst_75 = arith.constant 1.250000e-01 : f32
    %196 = vector.broadcast %cst_75 : f32 to vector<1x64xf32>
    %197 = arith.mulf %193, %196 : vector<1x64xf32>
    %198 = arith.mulf %195, %195 : vector<1x64xf32>
    %199 = arith.subf %197, %198 : vector<1x64xf32>
    %200 = vector.broadcast %195 : vector<1x64xf32> to vector<8x64xf32>
    %201 = arith.subf %184, %200 : vector<8x64xf32>
    %cst_76 = arith.constant 9.99999974E-6 : f32
    %202 = vector.broadcast %cst_76 : f32 to vector<1x64xf32>
    %203 = arith.addf %199, %202 : vector<1x64xf32>
    %204 = math.rsqrt %203 : vector<1x64xf32>
    %205 = vector.broadcast %204 : vector<1x64xf32> to vector<8x64xf32>
    %206 = arith.mulf %201, %205 : vector<8x64xf32>
    %207 = arith.mulf %206, %186 : vector<8x64xf32>
    %208 = arith.addf %207, %188 : vector<8x64xf32>
    %209 = arith.truncf %208 : vector<8x64xf32> to vector<8x64xbf16>
    %cst_77 = arith.constant dense<0.000000e+00> : vector<8x256xf32>
    %210 = tpu.matmul %209, %133, %cst_77 {dimension_numbers = #tpu.dot_dimension_numbers<[1], [0], [0], [1], [0, 0, 1, 1], [], []>} : vector<8x64xbf16>, vector<64x256xbf16>, vector<8x256xf32> -> vector<8x256xf32>
    %211 = arith.addf %210, %135 : vector<8x256xf32>
    %212 = vector.extract_strided_slice %211 {offsets = [0, 0], sizes = [8, 16], strides = [1, 1]} : vector<8x256xf32> to vector<8x16xf32>
    %213 = math.tanh %212 : vector<8x16xf32>
    %214 = arith.mulf %145, %213 : vector<8x16xf32>
    %215 = arith.mulf %214, %143 : vector<8x16xf32>
    %216 = vector.extract_strided_slice %211 {offsets = [0, 128], sizes = [8, 16], strides = [1, 1]} : vector<8x256xf32> to vector<8x16xf32>
    %217 = arith.mulf %216, %143 : vector<8x16xf32>
    %218 = math.exp %215 : vector<8x16xf32>
    %219 = arith.mulf %126, %218 : vector<8x16xf32>
    %220 = arith.addf %219, %217 : vector<8x16xf32>
    %221 = arith.addf %127, %215 : vector<8x16xf32>
    %c2 = arith.constant 2 : index
    %c0_78 = arith.constant 0 : index
    %c0_79 = arith.constant 0 : index
    %222 = vector.load %arg1[%c2, %c0_78, %c0_79] : memref<10x16x64xbf16, #tpu.memory_space<vmem>>, vector<1x16x64xbf16>
    %223 = vector.shape_cast %222 : vector<1x16x64xbf16> to vector<16x64xbf16>
    %c2_80 = arith.constant 2 : index
    %c0_81 = arith.constant 0 : index
    %c0_82 = arith.constant 0 : index
    %224 = vector.load %arg2[%c2_80, %c0_81, %c0_82] : memref<10x64x64xbf16, #tpu.memory_space<vmem>>, vector<1x64x64xbf16>
    %225 = vector.shape_cast %224 : vector<1x64x64xbf16> to vector<64x64xbf16>
    %c2_83 = arith.constant 2 : index
    %c0_84 = arith.constant 0 : index
    %c0_85 = arith.constant 0 : index
    %226 = vector.load %arg3[%c2_83, %c0_84, %c0_85] : memref<10x64x256xbf16, #tpu.memory_space<vmem>>, vector<1x64x256xbf16>
    %227 = vector.shape_cast %226 : vector<1x64x256xbf16> to vector<64x256xbf16>
    %c2_86 = arith.constant 2 : index
    %c0_87 = arith.constant 0 : index
    %c0_88 = arith.constant 0 : index
    %228 = vector.load %arg4[%c2_86, %c0_87, %c0_88] : memref<10x8x256xf32, #tpu.memory_space<vmem>>, vector<1x8x256xf32>
    %229 = vector.shape_cast %228 : vector<1x8x256xf32> to vector<8x256xf32>
    %c2_89 = arith.constant 2 : index
    %c0_90 = arith.constant 0 : index
    %c0_91 = arith.constant 0 : index
    %c0_92 = arith.constant 0 : index
    %230 = vector.load %arg5[%c2_89, %c0_90, %c0_91, %c0_92] : memref<10x6x8x64xf32, #tpu.memory_space<vmem>>, vector<1x6x8x64xf32>
    %231 = vector.shape_cast %230 : vector<1x6x8x64xf32> to vector<6x8x64xf32>
    %c2_93 = arith.constant 2 : index
    %c0_94 = arith.constant 0 : index
    %c0_95 = arith.constant 0 : index
    %c0_96 = arith.constant 0 : index
    %232 = vector.load %arg6[%c2_93, %c0_94, %c0_95, %c0_96] : memref<10x3x8x16xf32, #tpu.memory_space<vmem>>, vector<1x3x8x16xf32>
    %233 = vector.shape_cast %232 : vector<1x3x8x16xf32> to vector<3x8x16xf32>
    %234 = vector.extract_strided_slice %233 {offsets = [0, 0, 0], sizes = [1, 8, 16], strides = [1, 1, 1]} : vector<3x8x16xf32> to vector<1x8x16xf32>
    %235 = vector.shape_cast %234 : vector<1x8x16xf32> to vector<8x16xf32>
    %236 = vector.extract_strided_slice %233 {offsets = [1, 0, 0], sizes = [1, 8, 16], strides = [1, 1, 1]} : vector<3x8x16xf32> to vector<1x8x16xf32>
    %237 = vector.shape_cast %236 : vector<1x8x16xf32> to vector<8x16xf32>
    %238 = vector.extract_strided_slice %233 {offsets = [2, 0, 0], sizes = [1, 8, 16], strides = [1, 1, 1]} : vector<3x8x16xf32> to vector<1x8x16xf32>
    %239 = vector.shape_cast %238 : vector<1x8x16xf32> to vector<8x16xf32>
    %240 = arith.mulf %220, %235 : vector<8x16xf32>
    %241 = arith.truncf %240 : vector<8x16xf32> to vector<8x16xbf16>
    %cst_97 = arith.constant dense<0.000000e+00> : vector<8x64xf32>
    %242 = tpu.matmul %241, %223, %cst_97 {dimension_numbers = #tpu.dot_dimension_numbers<[1], [0], [0], [1], [0, 0, 1, 1], [], []>} : vector<8x16xbf16>, vector<16x64xbf16>, vector<8x64xf32> -> vector<8x64xf32>
    %243 = vector.extract_strided_slice %231 {offsets = [0, 0, 0], sizes = [1, 8, 64], strides = [1, 1, 1]} : vector<6x8x64xf32> to vector<1x8x64xf32>
    %244 = vector.shape_cast %243 : vector<1x8x64xf32> to vector<8x64xf32>
    %245 = arith.addf %242, %244 : vector<8x64xf32>
    %cst_98 = arith.constant 0.000000e+00 : f32
    %246 = vector.broadcast %cst_98 : f32 to vector<8x64xf32>
    %247 = arith.maximumf %245, %246 : vector<8x64xf32>
    %248 = vector.extract_strided_slice %231 {offsets = [1, 0, 0], sizes = [1, 8, 64], strides = [1, 1, 1]} : vector<6x8x64xf32> to vector<1x8x64xf32>
    %249 = vector.shape_cast %248 : vector<1x8x64xf32> to vector<8x64xf32>
    %250 = vector.extract_strided_slice %231 {offsets = [2, 0, 0], sizes = [1, 8, 64], strides = [1, 1, 1]} : vector<6x8x64xf32> to vector<1x8x64xf32>
    %251 = vector.shape_cast %250 : vector<1x8x64xf32> to vector<8x64xf32>
    %cst_99 = arith.constant dense<0.000000e+00> : vector<64xf32>
    %252 = vector.multi_reduction <add>, %247, %cst_99 [0] : vector<8x64xf32> to vector<64xf32>
    %253 = vector.shape_cast %252 : vector<64xf32> to vector<1x64xf32>
    %254 = arith.mulf %247, %247 : vector<8x64xf32>
    %cst_100 = arith.constant dense<0.000000e+00> : vector<64xf32>
    %255 = vector.multi_reduction <add>, %254, %cst_100 [0] : vector<8x64xf32> to vector<64xf32>
    %256 = vector.shape_cast %255 : vector<64xf32> to vector<1x64xf32>
    %cst_101 = arith.constant 1.250000e-01 : f32
    %257 = vector.broadcast %cst_101 : f32 to vector<1x64xf32>
    %258 = arith.mulf %253, %257 : vector<1x64xf32>
    %cst_102 = arith.constant 1.250000e-01 : f32
    %259 = vector.broadcast %cst_102 : f32 to vector<1x64xf32>
    %260 = arith.mulf %256, %259 : vector<1x64xf32>
    %261 = arith.mulf %258, %258 : vector<1x64xf32>
    %262 = arith.subf %260, %261 : vector<1x64xf32>
    %263 = vector.broadcast %258 : vector<1x64xf32> to vector<8x64xf32>
    %264 = arith.subf %247, %263 : vector<8x64xf32>
    %cst_103 = arith.constant 9.99999974E-6 : f32
    %265 = vector.broadcast %cst_103 : f32 to vector<1x64xf32>
    %266 = arith.addf %262, %265 : vector<1x64xf32>
    %267 = math.rsqrt %266 : vector<1x64xf32>
    %268 = vector.broadcast %267 : vector<1x64xf32> to vector<8x64xf32>
    %269 = arith.mulf %264, %268 : vector<8x64xf32>
    %270 = arith.mulf %269, %249 : vector<8x64xf32>
    %271 = arith.addf %270, %251 : vector<8x64xf32>
    %272 = arith.truncf %271 : vector<8x64xf32> to vector<8x64xbf16>
    %cst_104 = arith.constant dense<0.000000e+00> : vector<8x64xf32>
    %273 = tpu.matmul %272, %225, %cst_104 {dimension_numbers = #tpu.dot_dimension_numbers<[1], [0], [0], [1], [0, 0, 1, 1], [], []>} : vector<8x64xbf16>, vector<64x64xbf16>, vector<8x64xf32> -> vector<8x64xf32>
    %274 = vector.extract_strided_slice %231 {offsets = [3, 0, 0], sizes = [1, 8, 64], strides = [1, 1, 1]} : vector<6x8x64xf32> to vector<1x8x64xf32>
    %275 = vector.shape_cast %274 : vector<1x8x64xf32> to vector<8x64xf32>
    %276 = arith.addf %273, %275 : vector<8x64xf32>
    %cst_105 = arith.constant 0.000000e+00 : f32
    %277 = vector.broadcast %cst_105 : f32 to vector<8x64xf32>
    %278 = arith.maximumf %276, %277 : vector<8x64xf32>
    %279 = vector.extract_strided_slice %231 {offsets = [4, 0, 0], sizes = [1, 8, 64], strides = [1, 1, 1]} : vector<6x8x64xf32> to vector<1x8x64xf32>
    %280 = vector.shape_cast %279 : vector<1x8x64xf32> to vector<8x64xf32>
    %281 = vector.extract_strided_slice %231 {offsets = [5, 0, 0], sizes = [1, 8, 64], strides = [1, 1, 1]} : vector<6x8x64xf32> to vector<1x8x64xf32>
    %282 = vector.shape_cast %281 : vector<1x8x64xf32> to vector<8x64xf32>
    %cst_106 = arith.constant dense<0.000000e+00> : vector<64xf32>
    %283 = vector.multi_reduction <add>, %278, %cst_106 [0] : vector<8x64xf32> to vector<64xf32>
    %284 = vector.shape_cast %283 : vector<64xf32> to vector<1x64xf32>
    %285 = arith.mulf %278, %278 : vector<8x64xf32>
    %cst_107 = arith.constant dense<0.000000e+00> : vector<64xf32>
    %286 = vector.multi_reduction <add>, %285, %cst_107 [0] : vector<8x64xf32> to vector<64xf32>
    %287 = vector.shape_cast %286 : vector<64xf32> to vector<1x64xf32>
    %cst_108 = arith.constant 1.250000e-01 : f32
    %288 = vector.broadcast %cst_108 : f32 to vector<1x64xf32>
    %289 = arith.mulf %284, %288 : vector<1x64xf32>
    %cst_109 = arith.constant 1.250000e-01 : f32
    %290 = vector.broadcast %cst_109 : f32 to vector<1x64xf32>
    %291 = arith.mulf %287, %290 : vector<1x64xf32>
    %292 = arith.mulf %289, %289 : vector<1x64xf32>
    %293 = arith.subf %291, %292 : vector<1x64xf32>
    %294 = vector.broadcast %289 : vector<1x64xf32> to vector<8x64xf32>
    %295 = arith.subf %278, %294 : vector<8x64xf32>
    %cst_110 = arith.constant 9.99999974E-6 : f32
    %296 = vector.broadcast %cst_110 : f32 to vector<1x64xf32>
    %297 = arith.addf %293, %296 : vector<1x64xf32>
    %298 = math.rsqrt %297 : vector<1x64xf32>
    %299 = vector.broadcast %298 : vector<1x64xf32> to vector<8x64xf32>
    %300 = arith.mulf %295, %299 : vector<8x64xf32>
    %301 = arith.mulf %300, %280 : vector<8x64xf32>
    %302 = arith.addf %301, %282 : vector<8x64xf32>
    %303 = arith.truncf %302 : vector<8x64xf32> to vector<8x64xbf16>
    %cst_111 = arith.constant dense<0.000000e+00> : vector<8x256xf32>
    %304 = tpu.matmul %303, %227, %cst_111 {dimension_numbers = #tpu.dot_dimension_numbers<[1], [0], [0], [1], [0, 0, 1, 1], [], []>} : vector<8x64xbf16>, vector<64x256xbf16>, vector<8x256xf32> -> vector<8x256xf32>
    %305 = arith.addf %304, %229 : vector<8x256xf32>
    %306 = vector.extract_strided_slice %305 {offsets = [0, 0], sizes = [8, 16], strides = [1, 1]} : vector<8x256xf32> to vector<8x16xf32>
    %307 = math.tanh %306 : vector<8x16xf32>
    %308 = arith.mulf %239, %307 : vector<8x16xf32>
    %309 = arith.mulf %308, %237 : vector<8x16xf32>
    %310 = vector.extract_strided_slice %305 {offsets = [0, 128], sizes = [8, 16], strides = [1, 1]} : vector<8x256xf32> to vector<8x16xf32>
    %311 = arith.mulf %310, %237 : vector<8x16xf32>
    %312 = math.exp %309 : vector<8x16xf32>
    %313 = arith.mulf %220, %312 : vector<8x16xf32>
    %314 = arith.addf %313, %311 : vector<8x16xf32>
    %315 = arith.addf %221, %309 : vector<8x16xf32>
    %c3 = arith.constant 3 : index
    %c0_112 = arith.constant 0 : index
    %c0_113 = arith.constant 0 : index
    %316 = vector.load %arg1[%c3, %c0_112, %c0_113] : memref<10x16x64xbf16, #tpu.memory_space<vmem>>, vector<1x16x64xbf16>
    %317 = vector.shape_cast %316 : vector<1x16x64xbf16> to vector<16x64xbf16>
    %c3_114 = arith.constant 3 : index
    %c0_115 = arith.constant 0 : index
    %c0_116 = arith.constant 0 : index
    %318 = vector.load %arg2[%c3_114, %c0_115, %c0_116] : memref<10x64x64xbf16, #tpu.memory_space<vmem>>, vector<1x64x64xbf16>
    %319 = vector.shape_cast %318 : vector<1x64x64xbf16> to vector<64x64xbf16>
    %c3_117 = arith.constant 3 : index
    %c0_118 = arith.constant 0 : index
    %c0_119 = arith.constant 0 : index
    %320 = vector.load %arg3[%c3_117, %c0_118, %c0_119] : memref<10x64x256xbf16, #tpu.memory_space<vmem>>, vector<1x64x256xbf16>
    %321 = vector.shape_cast %320 : vector<1x64x256xbf16> to vector<64x256xbf16>
    %c3_120 = arith.constant 3 : index
    %c0_121 = arith.constant 0 : index
    %c0_122 = arith.constant 0 : index
    %322 = vector.load %arg4[%c3_120, %c0_121, %c0_122] : memref<10x8x256xf32, #tpu.memory_space<vmem>>, vector<1x8x256xf32>
    %323 = vector.shape_cast %322 : vector<1x8x256xf32> to vector<8x256xf32>
    %c3_123 = arith.constant 3 : index
    %c0_124 = arith.constant 0 : index
    %c0_125 = arith.constant 0 : index
    %c0_126 = arith.constant 0 : index
    %324 = vector.load %arg5[%c3_123, %c0_124, %c0_125, %c0_126] : memref<10x6x8x64xf32, #tpu.memory_space<vmem>>, vector<1x6x8x64xf32>
    %325 = vector.shape_cast %324 : vector<1x6x8x64xf32> to vector<6x8x64xf32>
    %c3_127 = arith.constant 3 : index
    %c0_128 = arith.constant 0 : index
    %c0_129 = arith.constant 0 : index
    %c0_130 = arith.constant 0 : index
    %326 = vector.load %arg6[%c3_127, %c0_128, %c0_129, %c0_130] : memref<10x3x8x16xf32, #tpu.memory_space<vmem>>, vector<1x3x8x16xf32>
    %327 = vector.shape_cast %326 : vector<1x3x8x16xf32> to vector<3x8x16xf32>
    %328 = vector.extract_strided_slice %327 {offsets = [0, 0, 0], sizes = [1, 8, 16], strides = [1, 1, 1]} : vector<3x8x16xf32> to vector<1x8x16xf32>
    %329 = vector.shape_cast %328 : vector<1x8x16xf32> to vector<8x16xf32>
    %330 = vector.extract_strided_slice %327 {offsets = [1, 0, 0], sizes = [1, 8, 16], strides = [1, 1, 1]} : vector<3x8x16xf32> to vector<1x8x16xf32>
    %331 = vector.shape_cast %330 : vector<1x8x16xf32> to vector<8x16xf32>
    %332 = vector.extract_strided_slice %327 {offsets = [2, 0, 0], sizes = [1, 8, 16], strides = [1, 1, 1]} : vector<3x8x16xf32> to vector<1x8x16xf32>
    %333 = vector.shape_cast %332 : vector<1x8x16xf32> to vector<8x16xf32>
    %334 = arith.mulf %314, %329 : vector<8x16xf32>
    %335 = arith.truncf %334 : vector<8x16xf32> to vector<8x16xbf16>
    %cst_131 = arith.constant dense<0.000000e+00> : vector<8x64xf32>
    %336 = tpu.matmul %335, %317, %cst_131 {dimension_numbers = #tpu.dot_dimension_numbers<[1], [0], [0], [1], [0, 0, 1, 1], [], []>} : vector<8x16xbf16>, vector<16x64xbf16>, vector<8x64xf32> -> vector<8x64xf32>
    %337 = vector.extract_strided_slice %325 {offsets = [0, 0, 0], sizes = [1, 8, 64], strides = [1, 1, 1]} : vector<6x8x64xf32> to vector<1x8x64xf32>
    %338 = vector.shape_cast %337 : vector<1x8x64xf32> to vector<8x64xf32>
    %339 = arith.addf %336, %338 : vector<8x64xf32>
    %cst_132 = arith.constant 0.000000e+00 : f32
    %340 = vector.broadcast %cst_132 : f32 to vector<8x64xf32>
    %341 = arith.maximumf %339, %340 : vector<8x64xf32>
    %342 = vector.extract_strided_slice %325 {offsets = [1, 0, 0], sizes = [1, 8, 64], strides = [1, 1, 1]} : vector<6x8x64xf32> to vector<1x8x64xf32>
    %343 = vector.shape_cast %342 : vector<1x8x64xf32> to vector<8x64xf32>
    %344 = vector.extract_strided_slice %325 {offsets = [2, 0, 0], sizes = [1, 8, 64], strides = [1, 1, 1]} : vector<6x8x64xf32> to vector<1x8x64xf32>
    %345 = vector.shape_cast %344 : vector<1x8x64xf32> to vector<8x64xf32>
    %cst_133 = arith.constant dense<0.000000e+00> : vector<64xf32>
    %346 = vector.multi_reduction <add>, %341, %cst_133 [0] : vector<8x64xf32> to vector<64xf32>
    %347 = vector.shape_cast %346 : vector<64xf32> to vector<1x64xf32>
    %348 = arith.mulf %341, %341 : vector<8x64xf32>
    %cst_134 = arith.constant dense<0.000000e+00> : vector<64xf32>
    %349 = vector.multi_reduction <add>, %348, %cst_134 [0] : vector<8x64xf32> to vector<64xf32>
    %350 = vector.shape_cast %349 : vector<64xf32> to vector<1x64xf32>
    %cst_135 = arith.constant 1.250000e-01 : f32
    %351 = vector.broadcast %cst_135 : f32 to vector<1x64xf32>
    %352 = arith.mulf %347, %351 : vector<1x64xf32>
    %cst_136 = arith.constant 1.250000e-01 : f32
    %353 = vector.broadcast %cst_136 : f32 to vector<1x64xf32>
    %354 = arith.mulf %350, %353 : vector<1x64xf32>
    %355 = arith.mulf %352, %352 : vector<1x64xf32>
    %356 = arith.subf %354, %355 : vector<1x64xf32>
    %357 = vector.broadcast %352 : vector<1x64xf32> to vector<8x64xf32>
    %358 = arith.subf %341, %357 : vector<8x64xf32>
    %cst_137 = arith.constant 9.99999974E-6 : f32
    %359 = vector.broadcast %cst_137 : f32 to vector<1x64xf32>
    %360 = arith.addf %356, %359 : vector<1x64xf32>
    %361 = math.rsqrt %360 : vector<1x64xf32>
    %362 = vector.broadcast %361 : vector<1x64xf32> to vector<8x64xf32>
    %363 = arith.mulf %358, %362 : vector<8x64xf32>
    %364 = arith.mulf %363, %343 : vector<8x64xf32>
    %365 = arith.addf %364, %345 : vector<8x64xf32>
    %366 = arith.truncf %365 : vector<8x64xf32> to vector<8x64xbf16>
    %cst_138 = arith.constant dense<0.000000e+00> : vector<8x64xf32>
    %367 = tpu.matmul %366, %319, %cst_138 {dimension_numbers = #tpu.dot_dimension_numbers<[1], [0], [0], [1], [0, 0, 1, 1], [], []>} : vector<8x64xbf16>, vector<64x64xbf16>, vector<8x64xf32> -> vector<8x64xf32>
    %368 = vector.extract_strided_slice %325 {offsets = [3, 0, 0], sizes = [1, 8, 64], strides = [1, 1, 1]} : vector<6x8x64xf32> to vector<1x8x64xf32>
    %369 = vector.shape_cast %368 : vector<1x8x64xf32> to vector<8x64xf32>
    %370 = arith.addf %367, %369 : vector<8x64xf32>
    %cst_139 = arith.constant 0.000000e+00 : f32
    %371 = vector.broadcast %cst_139 : f32 to vector<8x64xf32>
    %372 = arith.maximumf %370, %371 : vector<8x64xf32>
    %373 = vector.extract_strided_slice %325 {offsets = [4, 0, 0], sizes = [1, 8, 64], strides = [1, 1, 1]} : vector<6x8x64xf32> to vector<1x8x64xf32>
    %374 = vector.shape_cast %373 : vector<1x8x64xf32> to vector<8x64xf32>
    %375 = vector.extract_strided_slice %325 {offsets = [5, 0, 0], sizes = [1, 8, 64], strides = [1, 1, 1]} : vector<6x8x64xf32> to vector<1x8x64xf32>
    %376 = vector.shape_cast %375 : vector<1x8x64xf32> to vector<8x64xf32>
    %cst_140 = arith.constant dense<0.000000e+00> : vector<64xf32>
    %377 = vector.multi_reduction <add>, %372, %cst_140 [0] : vector<8x64xf32> to vector<64xf32>
    %378 = vector.shape_cast %377 : vector<64xf32> to vector<1x64xf32>
    %379 = arith.mulf %372, %372 : vector<8x64xf32>
    %cst_141 = arith.constant dense<0.000000e+00> : vector<64xf32>
    %380 = vector.multi_reduction <add>, %379, %cst_141 [0] : vector<8x64xf32> to vector<64xf32>
    %381 = vector.shape_cast %380 : vector<64xf32> to vector<1x64xf32>
    %cst_142 = arith.constant 1.250000e-01 : f32
    %382 = vector.broadcast %cst_142 : f32 to vector<1x64xf32>
    %383 = arith.mulf %378, %382 : vector<1x64xf32>
    %cst_143 = arith.constant 1.250000e-01 : f32
    %384 = vector.broadcast %cst_143 : f32 to vector<1x64xf32>
    %385 = arith.mulf %381, %384 : vector<1x64xf32>
    %386 = arith.mulf %383, %383 : vector<1x64xf32>
    %387 = arith.subf %385, %386 : vector<1x64xf32>
    %388 = vector.broadcast %383 : vector<1x64xf32> to vector<8x64xf32>
    %389 = arith.subf %372, %388 : vector<8x64xf32>
    %cst_144 = arith.constant 9.99999974E-6 : f32
    %390 = vector.broadcast %cst_144 : f32 to vector<1x64xf32>
    %391 = arith.addf %387, %390 : vector<1x64xf32>
    %392 = math.rsqrt %391 : vector<1x64xf32>
    %393 = vector.broadcast %392 : vector<1x64xf32> to vector<8x64xf32>
    %394 = arith.mulf %389, %393 : vector<8x64xf32>
    %395 = arith.mulf %394, %374 : vector<8x64xf32>
    %396 = arith.addf %395, %376 : vector<8x64xf32>
    %397 = arith.truncf %396 : vector<8x64xf32> to vector<8x64xbf16>
    %cst_145 = arith.constant dense<0.000000e+00> : vector<8x256xf32>
    %398 = tpu.matmul %397, %321, %cst_145 {dimension_numbers = #tpu.dot_dimension_numbers<[1], [0], [0], [1], [0, 0, 1, 1], [], []>} : vector<8x64xbf16>, vector<64x256xbf16>, vector<8x256xf32> -> vector<8x256xf32>
    %399 = arith.addf %398, %323 : vector<8x256xf32>
    %400 = vector.extract_strided_slice %399 {offsets = [0, 0], sizes = [8, 16], strides = [1, 1]} : vector<8x256xf32> to vector<8x16xf32>
    %401 = math.tanh %400 : vector<8x16xf32>
    %402 = arith.mulf %333, %401 : vector<8x16xf32>
    %403 = arith.mulf %402, %331 : vector<8x16xf32>
    %404 = vector.extract_strided_slice %399 {offsets = [0, 128], sizes = [8, 16], strides = [1, 1]} : vector<8x256xf32> to vector<8x16xf32>
    %405 = arith.mulf %404, %331 : vector<8x16xf32>
    %406 = math.exp %403 : vector<8x16xf32>
    %407 = arith.mulf %314, %406 : vector<8x16xf32>
    %408 = arith.addf %407, %405 : vector<8x16xf32>
    %409 = arith.addf %315, %403 : vector<8x16xf32>
    %c4 = arith.constant 4 : index
    %c0_146 = arith.constant 0 : index
    %c0_147 = arith.constant 0 : index
    %410 = vector.load %arg1[%c4, %c0_146, %c0_147] : memref<10x16x64xbf16, #tpu.memory_space<vmem>>, vector<1x16x64xbf16>
    %411 = vector.shape_cast %410 : vector<1x16x64xbf16> to vector<16x64xbf16>
    %c4_148 = arith.constant 4 : index
    %c0_149 = arith.constant 0 : index
    %c0_150 = arith.constant 0 : index
    %412 = vector.load %arg2[%c4_148, %c0_149, %c0_150] : memref<10x64x64xbf16, #tpu.memory_space<vmem>>, vector<1x64x64xbf16>
    %413 = vector.shape_cast %412 : vector<1x64x64xbf16> to vector<64x64xbf16>
    %c4_151 = arith.constant 4 : index
    %c0_152 = arith.constant 0 : index
    %c0_153 = arith.constant 0 : index
    %414 = vector.load %arg3[%c4_151, %c0_152, %c0_153] : memref<10x64x256xbf16, #tpu.memory_space<vmem>>, vector<1x64x256xbf16>
    %415 = vector.shape_cast %414 : vector<1x64x256xbf16> to vector<64x256xbf16>
    %c4_154 = arith.constant 4 : index
    %c0_155 = arith.constant 0 : index
    %c0_156 = arith.constant 0 : index
    %416 = vector.load %arg4[%c4_154, %c0_155, %c0_156] : memref<10x8x256xf32, #tpu.memory_space<vmem>>, vector<1x8x256xf32>
    %417 = vector.shape_cast %416 : vector<1x8x256xf32> to vector<8x256xf32>
    %c4_157 = arith.constant 4 : index
    %c0_158 = arith.constant 0 : index
    %c0_159 = arith.constant 0 : index
    %c0_160 = arith.constant 0 : index
    %418 = vector.load %arg5[%c4_157, %c0_158, %c0_159, %c0_160] : memref<10x6x8x64xf32, #tpu.memory_space<vmem>>, vector<1x6x8x64xf32>
    %419 = vector.shape_cast %418 : vector<1x6x8x64xf32> to vector<6x8x64xf32>
    %c4_161 = arith.constant 4 : index
    %c0_162 = arith.constant 0 : index
    %c0_163 = arith.constant 0 : index
    %c0_164 = arith.constant 0 : index
    %420 = vector.load %arg6[%c4_161, %c0_162, %c0_163, %c0_164] : memref<10x3x8x16xf32, #tpu.memory_space<vmem>>, vector<1x3x8x16xf32>
    %421 = vector.shape_cast %420 : vector<1x3x8x16xf32> to vector<3x8x16xf32>
    %422 = vector.extract_strided_slice %421 {offsets = [0, 0, 0], sizes = [1, 8, 16], strides = [1, 1, 1]} : vector<3x8x16xf32> to vector<1x8x16xf32>
    %423 = vector.shape_cast %422 : vector<1x8x16xf32> to vector<8x16xf32>
    %424 = vector.extract_strided_slice %421 {offsets = [1, 0, 0], sizes = [1, 8, 16], strides = [1, 1, 1]} : vector<3x8x16xf32> to vector<1x8x16xf32>
    %425 = vector.shape_cast %424 : vector<1x8x16xf32> to vector<8x16xf32>
    %426 = vector.extract_strided_slice %421 {offsets = [2, 0, 0], sizes = [1, 8, 16], strides = [1, 1, 1]} : vector<3x8x16xf32> to vector<1x8x16xf32>
    %427 = vector.shape_cast %426 : vector<1x8x16xf32> to vector<8x16xf32>
    %428 = arith.mulf %408, %423 : vector<8x16xf32>
    %429 = arith.truncf %428 : vector<8x16xf32> to vector<8x16xbf16>
    %cst_165 = arith.constant dense<0.000000e+00> : vector<8x64xf32>
    %430 = tpu.matmul %429, %411, %cst_165 {dimension_numbers = #tpu.dot_dimension_numbers<[1], [0], [0], [1], [0, 0, 1, 1], [], []>} : vector<8x16xbf16>, vector<16x64xbf16>, vector<8x64xf32> -> vector<8x64xf32>
    %431 = vector.extract_strided_slice %419 {offsets = [0, 0, 0], sizes = [1, 8, 64], strides = [1, 1, 1]} : vector<6x8x64xf32> to vector<1x8x64xf32>
    %432 = vector.shape_cast %431 : vector<1x8x64xf32> to vector<8x64xf32>
    %433 = arith.addf %430, %432 : vector<8x64xf32>
    %cst_166 = arith.constant 0.000000e+00 : f32
    %434 = vector.broadcast %cst_166 : f32 to vector<8x64xf32>
    %435 = arith.maximumf %433, %434 : vector<8x64xf32>
    %436 = vector.extract_strided_slice %419 {offsets = [1, 0, 0], sizes = [1, 8, 64], strides = [1, 1, 1]} : vector<6x8x64xf32> to vector<1x8x64xf32>
    %437 = vector.shape_cast %436 : vector<1x8x64xf32> to vector<8x64xf32>
    %438 = vector.extract_strided_slice %419 {offsets = [2, 0, 0], sizes = [1, 8, 64], strides = [1, 1, 1]} : vector<6x8x64xf32> to vector<1x8x64xf32>
    %439 = vector.shape_cast %438 : vector<1x8x64xf32> to vector<8x64xf32>
    %cst_167 = arith.constant dense<0.000000e+00> : vector<64xf32>
    %440 = vector.multi_reduction <add>, %435, %cst_167 [0] : vector<8x64xf32> to vector<64xf32>
    %441 = vector.shape_cast %440 : vector<64xf32> to vector<1x64xf32>
    %442 = arith.mulf %435, %435 : vector<8x64xf32>
    %cst_168 = arith.constant dense<0.000000e+00> : vector<64xf32>
    %443 = vector.multi_reduction <add>, %442, %cst_168 [0] : vector<8x64xf32> to vector<64xf32>
    %444 = vector.shape_cast %443 : vector<64xf32> to vector<1x64xf32>
    %cst_169 = arith.constant 1.250000e-01 : f32
    %445 = vector.broadcast %cst_169 : f32 to vector<1x64xf32>
    %446 = arith.mulf %441, %445 : vector<1x64xf32>
    %cst_170 = arith.constant 1.250000e-01 : f32
    %447 = vector.broadcast %cst_170 : f32 to vector<1x64xf32>
    %448 = arith.mulf %444, %447 : vector<1x64xf32>
    %449 = arith.mulf %446, %446 : vector<1x64xf32>
    %450 = arith.subf %448, %449 : vector<1x64xf32>
    %451 = vector.broadcast %446 : vector<1x64xf32> to vector<8x64xf32>
    %452 = arith.subf %435, %451 : vector<8x64xf32>
    %cst_171 = arith.constant 9.99999974E-6 : f32
    %453 = vector.broadcast %cst_171 : f32 to vector<1x64xf32>
    %454 = arith.addf %450, %453 : vector<1x64xf32>
    %455 = math.rsqrt %454 : vector<1x64xf32>
    %456 = vector.broadcast %455 : vector<1x64xf32> to vector<8x64xf32>
    %457 = arith.mulf %452, %456 : vector<8x64xf32>
    %458 = arith.mulf %457, %437 : vector<8x64xf32>
    %459 = arith.addf %458, %439 : vector<8x64xf32>
    %460 = arith.truncf %459 : vector<8x64xf32> to vector<8x64xbf16>
    %cst_172 = arith.constant dense<0.000000e+00> : vector<8x64xf32>
    %461 = tpu.matmul %460, %413, %cst_172 {dimension_numbers = #tpu.dot_dimension_numbers<[1], [0], [0], [1], [0, 0, 1, 1], [], []>} : vector<8x64xbf16>, vector<64x64xbf16>, vector<8x64xf32> -> vector<8x64xf32>
    %462 = vector.extract_strided_slice %419 {offsets = [3, 0, 0], sizes = [1, 8, 64], strides = [1, 1, 1]} : vector<6x8x64xf32> to vector<1x8x64xf32>
    %463 = vector.shape_cast %462 : vector<1x8x64xf32> to vector<8x64xf32>
    %464 = arith.addf %461, %463 : vector<8x64xf32>
    %cst_173 = arith.constant 0.000000e+00 : f32
    %465 = vector.broadcast %cst_173 : f32 to vector<8x64xf32>
    %466 = arith.maximumf %464, %465 : vector<8x64xf32>
    %467 = vector.extract_strided_slice %419 {offsets = [4, 0, 0], sizes = [1, 8, 64], strides = [1, 1, 1]} : vector<6x8x64xf32> to vector<1x8x64xf32>
    %468 = vector.shape_cast %467 : vector<1x8x64xf32> to vector<8x64xf32>
    %469 = vector.extract_strided_slice %419 {offsets = [5, 0, 0], sizes = [1, 8, 64], strides = [1, 1, 1]} : vector<6x8x64xf32> to vector<1x8x64xf32>
    %470 = vector.shape_cast %469 : vector<1x8x64xf32> to vector<8x64xf32>
    %cst_174 = arith.constant dense<0.000000e+00> : vector<64xf32>
    %471 = vector.multi_reduction <add>, %466, %cst_174 [0] : vector<8x64xf32> to vector<64xf32>
    %472 = vector.shape_cast %471 : vector<64xf32> to vector<1x64xf32>
    %473 = arith.mulf %466, %466 : vector<8x64xf32>
    %cst_175 = arith.constant dense<0.000000e+00> : vector<64xf32>
    %474 = vector.multi_reduction <add>, %473, %cst_175 [0] : vector<8x64xf32> to vector<64xf32>
    %475 = vector.shape_cast %474 : vector<64xf32> to vector<1x64xf32>
    %cst_176 = arith.constant 1.250000e-01 : f32
    %476 = vector.broadcast %cst_176 : f32 to vector<1x64xf32>
    %477 = arith.mulf %472, %476 : vector<1x64xf32>
    %cst_177 = arith.constant 1.250000e-01 : f32
    %478 = vector.broadcast %cst_177 : f32 to vector<1x64xf32>
    %479 = arith.mulf %475, %478 : vector<1x64xf32>
    %480 = arith.mulf %477, %477 : vector<1x64xf32>
    %481 = arith.subf %479, %480 : vector<1x64xf32>
    %482 = vector.broadcast %477 : vector<1x64xf32> to vector<8x64xf32>
    %483 = arith.subf %466, %482 : vector<8x64xf32>
    %cst_178 = arith.constant 9.99999974E-6 : f32
    %484 = vector.broadcast %cst_178 : f32 to vector<1x64xf32>
    %485 = arith.addf %481, %484 : vector<1x64xf32>
    %486 = math.rsqrt %485 : vector<1x64xf32>
    %487 = vector.broadcast %486 : vector<1x64xf32> to vector<8x64xf32>
    %488 = arith.mulf %483, %487 : vector<8x64xf32>
    %489 = arith.mulf %488, %468 : vector<8x64xf32>
    %490 = arith.addf %489, %470 : vector<8x64xf32>
    %491 = arith.truncf %490 : vector<8x64xf32> to vector<8x64xbf16>
    %cst_179 = arith.constant dense<0.000000e+00> : vector<8x256xf32>
    %492 = tpu.matmul %491, %415, %cst_179 {dimension_numbers = #tpu.dot_dimension_numbers<[1], [0], [0], [1], [0, 0, 1, 1], [], []>} : vector<8x64xbf16>, vector<64x256xbf16>, vector<8x256xf32> -> vector<8x256xf32>
    %493 = arith.addf %492, %417 : vector<8x256xf32>
    %494 = vector.extract_strided_slice %493 {offsets = [0, 0], sizes = [8, 16], strides = [1, 1]} : vector<8x256xf32> to vector<8x16xf32>
    %495 = math.tanh %494 : vector<8x16xf32>
    %496 = arith.mulf %427, %495 : vector<8x16xf32>
    %497 = arith.mulf %496, %425 : vector<8x16xf32>
    %498 = vector.extract_strided_slice %493 {offsets = [0, 128], sizes = [8, 16], strides = [1, 1]} : vector<8x256xf32> to vector<8x16xf32>
    %499 = arith.mulf %498, %425 : vector<8x16xf32>
    %500 = math.exp %497 : vector<8x16xf32>
    %501 = arith.mulf %408, %500 : vector<8x16xf32>
    %502 = arith.addf %501, %499 : vector<8x16xf32>
    %503 = arith.addf %409, %497 : vector<8x16xf32>
    %c5 = arith.constant 5 : index
    %c0_180 = arith.constant 0 : index
    %c0_181 = arith.constant 0 : index
    %504 = vector.load %arg1[%c5, %c0_180, %c0_181] : memref<10x16x64xbf16, #tpu.memory_space<vmem>>, vector<1x16x64xbf16>
    %505 = vector.shape_cast %504 : vector<1x16x64xbf16> to vector<16x64xbf16>
    %c5_182 = arith.constant 5 : index
    %c0_183 = arith.constant 0 : index
    %c0_184 = arith.constant 0 : index
    %506 = vector.load %arg2[%c5_182, %c0_183, %c0_184] : memref<10x64x64xbf16, #tpu.memory_space<vmem>>, vector<1x64x64xbf16>
    %507 = vector.shape_cast %506 : vector<1x64x64xbf16> to vector<64x64xbf16>
    %c5_185 = arith.constant 5 : index
    %c0_186 = arith.constant 0 : index
    %c0_187 = arith.constant 0 : index
    %508 = vector.load %arg3[%c5_185, %c0_186, %c0_187] : memref<10x64x256xbf16, #tpu.memory_space<vmem>>, vector<1x64x256xbf16>
    %509 = vector.shape_cast %508 : vector<1x64x256xbf16> to vector<64x256xbf16>
    %c5_188 = arith.constant 5 : index
    %c0_189 = arith.constant 0 : index
    %c0_190 = arith.constant 0 : index
    %510 = vector.load %arg4[%c5_188, %c0_189, %c0_190] : memref<10x8x256xf32, #tpu.memory_space<vmem>>, vector<1x8x256xf32>
    %511 = vector.shape_cast %510 : vector<1x8x256xf32> to vector<8x256xf32>
    %c5_191 = arith.constant 5 : index
    %c0_192 = arith.constant 0 : index
    %c0_193 = arith.constant 0 : index
    %c0_194 = arith.constant 0 : index
    %512 = vector.load %arg5[%c5_191, %c0_192, %c0_193, %c0_194] : memref<10x6x8x64xf32, #tpu.memory_space<vmem>>, vector<1x6x8x64xf32>
    %513 = vector.shape_cast %512 : vector<1x6x8x64xf32> to vector<6x8x64xf32>
    %c5_195 = arith.constant 5 : index
    %c0_196 = arith.constant 0 : index
    %c0_197 = arith.constant 0 : index
    %c0_198 = arith.constant 0 : index
    %514 = vector.load %arg6[%c5_195, %c0_196, %c0_197, %c0_198] : memref<10x3x8x16xf32, #tpu.memory_space<vmem>>, vector<1x3x8x16xf32>
    %515 = vector.shape_cast %514 : vector<1x3x8x16xf32> to vector<3x8x16xf32>
    %516 = vector.extract_strided_slice %515 {offsets = [0, 0, 0], sizes = [1, 8, 16], strides = [1, 1, 1]} : vector<3x8x16xf32> to vector<1x8x16xf32>
    %517 = vector.shape_cast %516 : vector<1x8x16xf32> to vector<8x16xf32>
    %518 = vector.extract_strided_slice %515 {offsets = [1, 0, 0], sizes = [1, 8, 16], strides = [1, 1, 1]} : vector<3x8x16xf32> to vector<1x8x16xf32>
    %519 = vector.shape_cast %518 : vector<1x8x16xf32> to vector<8x16xf32>
    %520 = vector.extract_strided_slice %515 {offsets = [2, 0, 0], sizes = [1, 8, 16], strides = [1, 1, 1]} : vector<3x8x16xf32> to vector<1x8x16xf32>
    %521 = vector.shape_cast %520 : vector<1x8x16xf32> to vector<8x16xf32>
    %522 = arith.mulf %502, %517 : vector<8x16xf32>
    %523 = arith.truncf %522 : vector<8x16xf32> to vector<8x16xbf16>
    %cst_199 = arith.constant dense<0.000000e+00> : vector<8x64xf32>
    %524 = tpu.matmul %523, %505, %cst_199 {dimension_numbers = #tpu.dot_dimension_numbers<[1], [0], [0], [1], [0, 0, 1, 1], [], []>} : vector<8x16xbf16>, vector<16x64xbf16>, vector<8x64xf32> -> vector<8x64xf32>
    %525 = vector.extract_strided_slice %513 {offsets = [0, 0, 0], sizes = [1, 8, 64], strides = [1, 1, 1]} : vector<6x8x64xf32> to vector<1x8x64xf32>
    %526 = vector.shape_cast %525 : vector<1x8x64xf32> to vector<8x64xf32>
    %527 = arith.addf %524, %526 : vector<8x64xf32>
    %cst_200 = arith.constant 0.000000e+00 : f32
    %528 = vector.broadcast %cst_200 : f32 to vector<8x64xf32>
    %529 = arith.maximumf %527, %528 : vector<8x64xf32>
    %530 = vector.extract_strided_slice %513 {offsets = [1, 0, 0], sizes = [1, 8, 64], strides = [1, 1, 1]} : vector<6x8x64xf32> to vector<1x8x64xf32>
    %531 = vector.shape_cast %530 : vector<1x8x64xf32> to vector<8x64xf32>
    %532 = vector.extract_strided_slice %513 {offsets = [2, 0, 0], sizes = [1, 8, 64], strides = [1, 1, 1]} : vector<6x8x64xf32> to vector<1x8x64xf32>
    %533 = vector.shape_cast %532 : vector<1x8x64xf32> to vector<8x64xf32>
    %cst_201 = arith.constant dense<0.000000e+00> : vector<64xf32>
    %534 = vector.multi_reduction <add>, %529, %cst_201 [0] : vector<8x64xf32> to vector<64xf32>
    %535 = vector.shape_cast %534 : vector<64xf32> to vector<1x64xf32>
    %536 = arith.mulf %529, %529 : vector<8x64xf32>
    %cst_202 = arith.constant dense<0.000000e+00> : vector<64xf32>
    %537 = vector.multi_reduction <add>, %536, %cst_202 [0] : vector<8x64xf32> to vector<64xf32>
    %538 = vector.shape_cast %537 : vector<64xf32> to vector<1x64xf32>
    %cst_203 = arith.constant 1.250000e-01 : f32
    %539 = vector.broadcast %cst_203 : f32 to vector<1x64xf32>
    %540 = arith.mulf %535, %539 : vector<1x64xf32>
    %cst_204 = arith.constant 1.250000e-01 : f32
    %541 = vector.broadcast %cst_204 : f32 to vector<1x64xf32>
    %542 = arith.mulf %538, %541 : vector<1x64xf32>
    %543 = arith.mulf %540, %540 : vector<1x64xf32>
    %544 = arith.subf %542, %543 : vector<1x64xf32>
    %545 = vector.broadcast %540 : vector<1x64xf32> to vector<8x64xf32>
    %546 = arith.subf %529, %545 : vector<8x64xf32>
    %cst_205 = arith.constant 9.99999974E-6 : f32
    %547 = vector.broadcast %cst_205 : f32 to vector<1x64xf32>
    %548 = arith.addf %544, %547 : vector<1x64xf32>
    %549 = math.rsqrt %548 : vector<1x64xf32>
    %550 = vector.broadcast %549 : vector<1x64xf32> to vector<8x64xf32>
    %551 = arith.mulf %546, %550 : vector<8x64xf32>
    %552 = arith.mulf %551, %531 : vector<8x64xf32>
    %553 = arith.addf %552, %533 : vector<8x64xf32>
    %554 = arith.truncf %553 : vector<8x64xf32> to vector<8x64xbf16>
    %cst_206 = arith.constant dense<0.000000e+00> : vector<8x64xf32>
    %555 = tpu.matmul %554, %507, %cst_206 {dimension_numbers = #tpu.dot_dimension_numbers<[1], [0], [0], [1], [0, 0, 1, 1], [], []>} : vector<8x64xbf16>, vector<64x64xbf16>, vector<8x64xf32> -> vector<8x64xf32>
    %556 = vector.extract_strided_slice %513 {offsets = [3, 0, 0], sizes = [1, 8, 64], strides = [1, 1, 1]} : vector<6x8x64xf32> to vector<1x8x64xf32>
    %557 = vector.shape_cast %556 : vector<1x8x64xf32> to vector<8x64xf32>
    %558 = arith.addf %555, %557 : vector<8x64xf32>
    %cst_207 = arith.constant 0.000000e+00 : f32
    %559 = vector.broadcast %cst_207 : f32 to vector<8x64xf32>
    %560 = arith.maximumf %558, %559 : vector<8x64xf32>
    %561 = vector.extract_strided_slice %513 {offsets = [4, 0, 0], sizes = [1, 8, 64], strides = [1, 1, 1]} : vector<6x8x64xf32> to vector<1x8x64xf32>
    %562 = vector.shape_cast %561 : vector<1x8x64xf32> to vector<8x64xf32>
    %563 = vector.extract_strided_slice %513 {offsets = [5, 0, 0], sizes = [1, 8, 64], strides = [1, 1, 1]} : vector<6x8x64xf32> to vector<1x8x64xf32>
    %564 = vector.shape_cast %563 : vector<1x8x64xf32> to vector<8x64xf32>
    %cst_208 = arith.constant dense<0.000000e+00> : vector<64xf32>
    %565 = vector.multi_reduction <add>, %560, %cst_208 [0] : vector<8x64xf32> to vector<64xf32>
    %566 = vector.shape_cast %565 : vector<64xf32> to vector<1x64xf32>
    %567 = arith.mulf %560, %560 : vector<8x64xf32>
    %cst_209 = arith.constant dense<0.000000e+00> : vector<64xf32>
    %568 = vector.multi_reduction <add>, %567, %cst_209 [0] : vector<8x64xf32> to vector<64xf32>
    %569 = vector.shape_cast %568 : vector<64xf32> to vector<1x64xf32>
    %cst_210 = arith.constant 1.250000e-01 : f32
    %570 = vector.broadcast %cst_210 : f32 to vector<1x64xf32>
    %571 = arith.mulf %566, %570 : vector<1x64xf32>
    %cst_211 = arith.constant 1.250000e-01 : f32
    %572 = vector.broadcast %cst_211 : f32 to vector<1x64xf32>
    %573 = arith.mulf %569, %572 : vector<1x64xf32>
    %574 = arith.mulf %571, %571 : vector<1x64xf32>
    %575 = arith.subf %573, %574 : vector<1x64xf32>
    %576 = vector.broadcast %571 : vector<1x64xf32> to vector<8x64xf32>
    %577 = arith.subf %560, %576 : vector<8x64xf32>
    %cst_212 = arith.constant 9.99999974E-6 : f32
    %578 = vector.broadcast %cst_212 : f32 to vector<1x64xf32>
    %579 = arith.addf %575, %578 : vector<1x64xf32>
    %580 = math.rsqrt %579 : vector<1x64xf32>
    %581 = vector.broadcast %580 : vector<1x64xf32> to vector<8x64xf32>
    %582 = arith.mulf %577, %581 : vector<8x64xf32>
    %583 = arith.mulf %582, %562 : vector<8x64xf32>
    %584 = arith.addf %583, %564 : vector<8x64xf32>
    %585 = arith.truncf %584 : vector<8x64xf32> to vector<8x64xbf16>
    %cst_213 = arith.constant dense<0.000000e+00> : vector<8x256xf32>
    %586 = tpu.matmul %585, %509, %cst_213 {dimension_numbers = #tpu.dot_dimension_numbers<[1], [0], [0], [1], [0, 0, 1, 1], [], []>} : vector<8x64xbf16>, vector<64x256xbf16>, vector<8x256xf32> -> vector<8x256xf32>
    %587 = arith.addf %586, %511 : vector<8x256xf32>
    %588 = vector.extract_strided_slice %587 {offsets = [0, 0], sizes = [8, 16], strides = [1, 1]} : vector<8x256xf32> to vector<8x16xf32>
    %589 = math.tanh %588 : vector<8x16xf32>
    %590 = arith.mulf %521, %589 : vector<8x16xf32>
    %591 = arith.mulf %590, %519 : vector<8x16xf32>
    %592 = vector.extract_strided_slice %587 {offsets = [0, 128], sizes = [8, 16], strides = [1, 1]} : vector<8x256xf32> to vector<8x16xf32>
    %593 = arith.mulf %592, %519 : vector<8x16xf32>
    %594 = math.exp %591 : vector<8x16xf32>
    %595 = arith.mulf %502, %594 : vector<8x16xf32>
    %596 = arith.addf %595, %593 : vector<8x16xf32>
    %597 = arith.addf %503, %591 : vector<8x16xf32>
    %c6 = arith.constant 6 : index
    %c0_214 = arith.constant 0 : index
    %c0_215 = arith.constant 0 : index
    %598 = vector.load %arg1[%c6, %c0_214, %c0_215] : memref<10x16x64xbf16, #tpu.memory_space<vmem>>, vector<1x16x64xbf16>
    %599 = vector.shape_cast %598 : vector<1x16x64xbf16> to vector<16x64xbf16>
    %c6_216 = arith.constant 6 : index
    %c0_217 = arith.constant 0 : index
    %c0_218 = arith.constant 0 : index
    %600 = vector.load %arg2[%c6_216, %c0_217, %c0_218] : memref<10x64x64xbf16, #tpu.memory_space<vmem>>, vector<1x64x64xbf16>
    %601 = vector.shape_cast %600 : vector<1x64x64xbf16> to vector<64x64xbf16>
    %c6_219 = arith.constant 6 : index
    %c0_220 = arith.constant 0 : index
    %c0_221 = arith.constant 0 : index
    %602 = vector.load %arg3[%c6_219, %c0_220, %c0_221] : memref<10x64x256xbf16, #tpu.memory_space<vmem>>, vector<1x64x256xbf16>
    %603 = vector.shape_cast %602 : vector<1x64x256xbf16> to vector<64x256xbf16>
    %c6_222 = arith.constant 6 : index
    %c0_223 = arith.constant 0 : index
    %c0_224 = arith.constant 0 : index
    %604 = vector.load %arg4[%c6_222, %c0_223, %c0_224] : memref<10x8x256xf32, #tpu.memory_space<vmem>>, vector<1x8x256xf32>
    %605 = vector.shape_cast %604 : vector<1x8x256xf32> to vector<8x256xf32>
    %c6_225 = arith.constant 6 : index
    %c0_226 = arith.constant 0 : index
    %c0_227 = arith.constant 0 : index
    %c0_228 = arith.constant 0 : index
    %606 = vector.load %arg5[%c6_225, %c0_226, %c0_227, %c0_228] : memref<10x6x8x64xf32, #tpu.memory_space<vmem>>, vector<1x6x8x64xf32>
    %607 = vector.shape_cast %606 : vector<1x6x8x64xf32> to vector<6x8x64xf32>
    %c6_229 = arith.constant 6 : index
    %c0_230 = arith.constant 0 : index
    %c0_231 = arith.constant 0 : index
    %c0_232 = arith.constant 0 : index
    %608 = vector.load %arg6[%c6_229, %c0_230, %c0_231, %c0_232] : memref<10x3x8x16xf32, #tpu.memory_space<vmem>>, vector<1x3x8x16xf32>
    %609 = vector.shape_cast %608 : vector<1x3x8x16xf32> to vector<3x8x16xf32>
    %610 = vector.extract_strided_slice %609 {offsets = [0, 0, 0], sizes = [1, 8, 16], strides = [1, 1, 1]} : vector<3x8x16xf32> to vector<1x8x16xf32>
    %611 = vector.shape_cast %610 : vector<1x8x16xf32> to vector<8x16xf32>
    %612 = vector.extract_strided_slice %609 {offsets = [1, 0, 0], sizes = [1, 8, 16], strides = [1, 1, 1]} : vector<3x8x16xf32> to vector<1x8x16xf32>
    %613 = vector.shape_cast %612 : vector<1x8x16xf32> to vector<8x16xf32>
    %614 = vector.extract_strided_slice %609 {offsets = [2, 0, 0], sizes = [1, 8, 16], strides = [1, 1, 1]} : vector<3x8x16xf32> to vector<1x8x16xf32>
    %615 = vector.shape_cast %614 : vector<1x8x16xf32> to vector<8x16xf32>
    %616 = arith.mulf %596, %611 : vector<8x16xf32>
    %617 = arith.truncf %616 : vector<8x16xf32> to vector<8x16xbf16>
    %cst_233 = arith.constant dense<0.000000e+00> : vector<8x64xf32>
    %618 = tpu.matmul %617, %599, %cst_233 {dimension_numbers = #tpu.dot_dimension_numbers<[1], [0], [0], [1], [0, 0, 1, 1], [], []>} : vector<8x16xbf16>, vector<16x64xbf16>, vector<8x64xf32> -> vector<8x64xf32>
    %619 = vector.extract_strided_slice %607 {offsets = [0, 0, 0], sizes = [1, 8, 64], strides = [1, 1, 1]} : vector<6x8x64xf32> to vector<1x8x64xf32>
    %620 = vector.shape_cast %619 : vector<1x8x64xf32> to vector<8x64xf32>
    %621 = arith.addf %618, %620 : vector<8x64xf32>
    %cst_234 = arith.constant 0.000000e+00 : f32
    %622 = vector.broadcast %cst_234 : f32 to vector<8x64xf32>
    %623 = arith.maximumf %621, %622 : vector<8x64xf32>
    %624 = vector.extract_strided_slice %607 {offsets = [1, 0, 0], sizes = [1, 8, 64], strides = [1, 1, 1]} : vector<6x8x64xf32> to vector<1x8x64xf32>
    %625 = vector.shape_cast %624 : vector<1x8x64xf32> to vector<8x64xf32>
    %626 = vector.extract_strided_slice %607 {offsets = [2, 0, 0], sizes = [1, 8, 64], strides = [1, 1, 1]} : vector<6x8x64xf32> to vector<1x8x64xf32>
    %627 = vector.shape_cast %626 : vector<1x8x64xf32> to vector<8x64xf32>
    %cst_235 = arith.constant dense<0.000000e+00> : vector<64xf32>
    %628 = vector.multi_reduction <add>, %623, %cst_235 [0] : vector<8x64xf32> to vector<64xf32>
    %629 = vector.shape_cast %628 : vector<64xf32> to vector<1x64xf32>
    %630 = arith.mulf %623, %623 : vector<8x64xf32>
    %cst_236 = arith.constant dense<0.000000e+00> : vector<64xf32>
    %631 = vector.multi_reduction <add>, %630, %cst_236 [0] : vector<8x64xf32> to vector<64xf32>
    %632 = vector.shape_cast %631 : vector<64xf32> to vector<1x64xf32>
    %cst_237 = arith.constant 1.250000e-01 : f32
    %633 = vector.broadcast %cst_237 : f32 to vector<1x64xf32>
    %634 = arith.mulf %629, %633 : vector<1x64xf32>
    %cst_238 = arith.constant 1.250000e-01 : f32
    %635 = vector.broadcast %cst_238 : f32 to vector<1x64xf32>
    %636 = arith.mulf %632, %635 : vector<1x64xf32>
    %637 = arith.mulf %634, %634 : vector<1x64xf32>
    %638 = arith.subf %636, %637 : vector<1x64xf32>
    %639 = vector.broadcast %634 : vector<1x64xf32> to vector<8x64xf32>
    %640 = arith.subf %623, %639 : vector<8x64xf32>
    %cst_239 = arith.constant 9.99999974E-6 : f32
    %641 = vector.broadcast %cst_239 : f32 to vector<1x64xf32>
    %642 = arith.addf %638, %641 : vector<1x64xf32>
    %643 = math.rsqrt %642 : vector<1x64xf32>
    %644 = vector.broadcast %643 : vector<1x64xf32> to vector<8x64xf32>
    %645 = arith.mulf %640, %644 : vector<8x64xf32>
    %646 = arith.mulf %645, %625 : vector<8x64xf32>
    %647 = arith.addf %646, %627 : vector<8x64xf32>
    %648 = arith.truncf %647 : vector<8x64xf32> to vector<8x64xbf16>
    %cst_240 = arith.constant dense<0.000000e+00> : vector<8x64xf32>
    %649 = tpu.matmul %648, %601, %cst_240 {dimension_numbers = #tpu.dot_dimension_numbers<[1], [0], [0], [1], [0, 0, 1, 1], [], []>} : vector<8x64xbf16>, vector<64x64xbf16>, vector<8x64xf32> -> vector<8x64xf32>
    %650 = vector.extract_strided_slice %607 {offsets = [3, 0, 0], sizes = [1, 8, 64], strides = [1, 1, 1]} : vector<6x8x64xf32> to vector<1x8x64xf32>
    %651 = vector.shape_cast %650 : vector<1x8x64xf32> to vector<8x64xf32>
    %652 = arith.addf %649, %651 : vector<8x64xf32>
    %cst_241 = arith.constant 0.000000e+00 : f32
    %653 = vector.broadcast %cst_241 : f32 to vector<8x64xf32>
    %654 = arith.maximumf %652, %653 : vector<8x64xf32>
    %655 = vector.extract_strided_slice %607 {offsets = [4, 0, 0], sizes = [1, 8, 64], strides = [1, 1, 1]} : vector<6x8x64xf32> to vector<1x8x64xf32>
    %656 = vector.shape_cast %655 : vector<1x8x64xf32> to vector<8x64xf32>
    %657 = vector.extract_strided_slice %607 {offsets = [5, 0, 0], sizes = [1, 8, 64], strides = [1, 1, 1]} : vector<6x8x64xf32> to vector<1x8x64xf32>
    %658 = vector.shape_cast %657 : vector<1x8x64xf32> to vector<8x64xf32>
    %cst_242 = arith.constant dense<0.000000e+00> : vector<64xf32>
    %659 = vector.multi_reduction <add>, %654, %cst_242 [0] : vector<8x64xf32> to vector<64xf32>
    %660 = vector.shape_cast %659 : vector<64xf32> to vector<1x64xf32>
    %661 = arith.mulf %654, %654 : vector<8x64xf32>
    %cst_243 = arith.constant dense<0.000000e+00> : vector<64xf32>
    %662 = vector.multi_reduction <add>, %661, %cst_243 [0] : vector<8x64xf32> to vector<64xf32>
    %663 = vector.shape_cast %662 : vector<64xf32> to vector<1x64xf32>
    %cst_244 = arith.constant 1.250000e-01 : f32
    %664 = vector.broadcast %cst_244 : f32 to vector<1x64xf32>
    %665 = arith.mulf %660, %664 : vector<1x64xf32>
    %cst_245 = arith.constant 1.250000e-01 : f32
    %666 = vector.broadcast %cst_245 : f32 to vector<1x64xf32>
    %667 = arith.mulf %663, %666 : vector<1x64xf32>
    %668 = arith.mulf %665, %665 : vector<1x64xf32>
    %669 = arith.subf %667, %668 : vector<1x64xf32>
    %670 = vector.broadcast %665 : vector<1x64xf32> to vector<8x64xf32>
    %671 = arith.subf %654, %670 : vector<8x64xf32>
    %cst_246 = arith.constant 9.99999974E-6 : f32
    %672 = vector.broadcast %cst_246 : f32 to vector<1x64xf32>
    %673 = arith.addf %669, %672 : vector<1x64xf32>
    %674 = math.rsqrt %673 : vector<1x64xf32>
    %675 = vector.broadcast %674 : vector<1x64xf32> to vector<8x64xf32>
    %676 = arith.mulf %671, %675 : vector<8x64xf32>
    %677 = arith.mulf %676, %656 : vector<8x64xf32>
    %678 = arith.addf %677, %658 : vector<8x64xf32>
    %679 = arith.truncf %678 : vector<8x64xf32> to vector<8x64xbf16>
    %cst_247 = arith.constant dense<0.000000e+00> : vector<8x256xf32>
    %680 = tpu.matmul %679, %603, %cst_247 {dimension_numbers = #tpu.dot_dimension_numbers<[1], [0], [0], [1], [0, 0, 1, 1], [], []>} : vector<8x64xbf16>, vector<64x256xbf16>, vector<8x256xf32> -> vector<8x256xf32>
    %681 = arith.addf %680, %605 : vector<8x256xf32>
    %682 = vector.extract_strided_slice %681 {offsets = [0, 0], sizes = [8, 16], strides = [1, 1]} : vector<8x256xf32> to vector<8x16xf32>
    %683 = math.tanh %682 : vector<8x16xf32>
    %684 = arith.mulf %615, %683 : vector<8x16xf32>
    %685 = arith.mulf %684, %613 : vector<8x16xf32>
    %686 = vector.extract_strided_slice %681 {offsets = [0, 128], sizes = [8, 16], strides = [1, 1]} : vector<8x256xf32> to vector<8x16xf32>
    %687 = arith.mulf %686, %613 : vector<8x16xf32>
    %688 = math.exp %685 : vector<8x16xf32>
    %689 = arith.mulf %596, %688 : vector<8x16xf32>
    %690 = arith.addf %689, %687 : vector<8x16xf32>
    %691 = arith.addf %597, %685 : vector<8x16xf32>
    %c7 = arith.constant 7 : index
    %c0_248 = arith.constant 0 : index
    %c0_249 = arith.constant 0 : index
    %692 = vector.load %arg1[%c7, %c0_248, %c0_249] : memref<10x16x64xbf16, #tpu.memory_space<vmem>>, vector<1x16x64xbf16>
    %693 = vector.shape_cast %692 : vector<1x16x64xbf16> to vector<16x64xbf16>
    %c7_250 = arith.constant 7 : index
    %c0_251 = arith.constant 0 : index
    %c0_252 = arith.constant 0 : index
    %694 = vector.load %arg2[%c7_250, %c0_251, %c0_252] : memref<10x64x64xbf16, #tpu.memory_space<vmem>>, vector<1x64x64xbf16>
    %695 = vector.shape_cast %694 : vector<1x64x64xbf16> to vector<64x64xbf16>
    %c7_253 = arith.constant 7 : index
    %c0_254 = arith.constant 0 : index
    %c0_255 = arith.constant 0 : index
    %696 = vector.load %arg3[%c7_253, %c0_254, %c0_255] : memref<10x64x256xbf16, #tpu.memory_space<vmem>>, vector<1x64x256xbf16>
    %697 = vector.shape_cast %696 : vector<1x64x256xbf16> to vector<64x256xbf16>
    %c7_256 = arith.constant 7 : index
    %c0_257 = arith.constant 0 : index
    %c0_258 = arith.constant 0 : index
    %698 = vector.load %arg4[%c7_256, %c0_257, %c0_258] : memref<10x8x256xf32, #tpu.memory_space<vmem>>, vector<1x8x256xf32>
    %699 = vector.shape_cast %698 : vector<1x8x256xf32> to vector<8x256xf32>
    %c7_259 = arith.constant 7 : index
    %c0_260 = arith.constant 0 : index
    %c0_261 = arith.constant 0 : index
    %c0_262 = arith.constant 0 : index
    %700 = vector.load %arg5[%c7_259, %c0_260, %c0_261, %c0_262] : memref<10x6x8x64xf32, #tpu.memory_space<vmem>>, vector<1x6x8x64xf32>
    %701 = vector.shape_cast %700 : vector<1x6x8x64xf32> to vector<6x8x64xf32>
    %c7_263 = arith.constant 7 : index
    %c0_264 = arith.constant 0 : index
    %c0_265 = arith.constant 0 : index
    %c0_266 = arith.constant 0 : index
    %702 = vector.load %arg6[%c7_263, %c0_264, %c0_265, %c0_266] : memref<10x3x8x16xf32, #tpu.memory_space<vmem>>, vector<1x3x8x16xf32>
    %703 = vector.shape_cast %702 : vector<1x3x8x16xf32> to vector<3x8x16xf32>
    %704 = vector.extract_strided_slice %703 {offsets = [0, 0, 0], sizes = [1, 8, 16], strides = [1, 1, 1]} : vector<3x8x16xf32> to vector<1x8x16xf32>
    %705 = vector.shape_cast %704 : vector<1x8x16xf32> to vector<8x16xf32>
    %706 = vector.extract_strided_slice %703 {offsets = [1, 0, 0], sizes = [1, 8, 16], strides = [1, 1, 1]} : vector<3x8x16xf32> to vector<1x8x16xf32>
    %707 = vector.shape_cast %706 : vector<1x8x16xf32> to vector<8x16xf32>
    %708 = vector.extract_strided_slice %703 {offsets = [2, 0, 0], sizes = [1, 8, 16], strides = [1, 1, 1]} : vector<3x8x16xf32> to vector<1x8x16xf32>
    %709 = vector.shape_cast %708 : vector<1x8x16xf32> to vector<8x16xf32>
    %710 = arith.mulf %690, %705 : vector<8x16xf32>
    %711 = arith.truncf %710 : vector<8x16xf32> to vector<8x16xbf16>
    %cst_267 = arith.constant dense<0.000000e+00> : vector<8x64xf32>
    %712 = tpu.matmul %711, %693, %cst_267 {dimension_numbers = #tpu.dot_dimension_numbers<[1], [0], [0], [1], [0, 0, 1, 1], [], []>} : vector<8x16xbf16>, vector<16x64xbf16>, vector<8x64xf32> -> vector<8x64xf32>
    %713 = vector.extract_strided_slice %701 {offsets = [0, 0, 0], sizes = [1, 8, 64], strides = [1, 1, 1]} : vector<6x8x64xf32> to vector<1x8x64xf32>
    %714 = vector.shape_cast %713 : vector<1x8x64xf32> to vector<8x64xf32>
    %715 = arith.addf %712, %714 : vector<8x64xf32>
    %cst_268 = arith.constant 0.000000e+00 : f32
    %716 = vector.broadcast %cst_268 : f32 to vector<8x64xf32>
    %717 = arith.maximumf %715, %716 : vector<8x64xf32>
    %718 = vector.extract_strided_slice %701 {offsets = [1, 0, 0], sizes = [1, 8, 64], strides = [1, 1, 1]} : vector<6x8x64xf32> to vector<1x8x64xf32>
    %719 = vector.shape_cast %718 : vector<1x8x64xf32> to vector<8x64xf32>
    %720 = vector.extract_strided_slice %701 {offsets = [2, 0, 0], sizes = [1, 8, 64], strides = [1, 1, 1]} : vector<6x8x64xf32> to vector<1x8x64xf32>
    %721 = vector.shape_cast %720 : vector<1x8x64xf32> to vector<8x64xf32>
    %cst_269 = arith.constant dense<0.000000e+00> : vector<64xf32>
    %722 = vector.multi_reduction <add>, %717, %cst_269 [0] : vector<8x64xf32> to vector<64xf32>
    %723 = vector.shape_cast %722 : vector<64xf32> to vector<1x64xf32>
    %724 = arith.mulf %717, %717 : vector<8x64xf32>
    %cst_270 = arith.constant dense<0.000000e+00> : vector<64xf32>
    %725 = vector.multi_reduction <add>, %724, %cst_270 [0] : vector<8x64xf32> to vector<64xf32>
    %726 = vector.shape_cast %725 : vector<64xf32> to vector<1x64xf32>
    %cst_271 = arith.constant 1.250000e-01 : f32
    %727 = vector.broadcast %cst_271 : f32 to vector<1x64xf32>
    %728 = arith.mulf %723, %727 : vector<1x64xf32>
    %cst_272 = arith.constant 1.250000e-01 : f32
    %729 = vector.broadcast %cst_272 : f32 to vector<1x64xf32>
    %730 = arith.mulf %726, %729 : vector<1x64xf32>
    %731 = arith.mulf %728, %728 : vector<1x64xf32>
    %732 = arith.subf %730, %731 : vector<1x64xf32>
    %733 = vector.broadcast %728 : vector<1x64xf32> to vector<8x64xf32>
    %734 = arith.subf %717, %733 : vector<8x64xf32>
    %cst_273 = arith.constant 9.99999974E-6 : f32
    %735 = vector.broadcast %cst_273 : f32 to vector<1x64xf32>
    %736 = arith.addf %732, %735 : vector<1x64xf32>
    %737 = math.rsqrt %736 : vector<1x64xf32>
    %738 = vector.broadcast %737 : vector<1x64xf32> to vector<8x64xf32>
    %739 = arith.mulf %734, %738 : vector<8x64xf32>
    %740 = arith.mulf %739, %719 : vector<8x64xf32>
    %741 = arith.addf %740, %721 : vector<8x64xf32>
    %742 = arith.truncf %741 : vector<8x64xf32> to vector<8x64xbf16>
    %cst_274 = arith.constant dense<0.000000e+00> : vector<8x64xf32>
    %743 = tpu.matmul %742, %695, %cst_274 {dimension_numbers = #tpu.dot_dimension_numbers<[1], [0], [0], [1], [0, 0, 1, 1], [], []>} : vector<8x64xbf16>, vector<64x64xbf16>, vector<8x64xf32> -> vector<8x64xf32>
    %744 = vector.extract_strided_slice %701 {offsets = [3, 0, 0], sizes = [1, 8, 64], strides = [1, 1, 1]} : vector<6x8x64xf32> to vector<1x8x64xf32>
    %745 = vector.shape_cast %744 : vector<1x8x64xf32> to vector<8x64xf32>
    %746 = arith.addf %743, %745 : vector<8x64xf32>
    %cst_275 = arith.constant 0.000000e+00 : f32
    %747 = vector.broadcast %cst_275 : f32 to vector<8x64xf32>
    %748 = arith.maximumf %746, %747 : vector<8x64xf32>
    %749 = vector.extract_strided_slice %701 {offsets = [4, 0, 0], sizes = [1, 8, 64], strides = [1, 1, 1]} : vector<6x8x64xf32> to vector<1x8x64xf32>
    %750 = vector.shape_cast %749 : vector<1x8x64xf32> to vector<8x64xf32>
    %751 = vector.extract_strided_slice %701 {offsets = [5, 0, 0], sizes = [1, 8, 64], strides = [1, 1, 1]} : vector<6x8x64xf32> to vector<1x8x64xf32>
    %752 = vector.shape_cast %751 : vector<1x8x64xf32> to vector<8x64xf32>
    %cst_276 = arith.constant dense<0.000000e+00> : vector<64xf32>
    %753 = vector.multi_reduction <add>, %748, %cst_276 [0] : vector<8x64xf32> to vector<64xf32>
    %754 = vector.shape_cast %753 : vector<64xf32> to vector<1x64xf32>
    %755 = arith.mulf %748, %748 : vector<8x64xf32>
    %cst_277 = arith.constant dense<0.000000e+00> : vector<64xf32>
    %756 = vector.multi_reduction <add>, %755, %cst_277 [0] : vector<8x64xf32> to vector<64xf32>
    %757 = vector.shape_cast %756 : vector<64xf32> to vector<1x64xf32>
    %cst_278 = arith.constant 1.250000e-01 : f32
    %758 = vector.broadcast %cst_278 : f32 to vector<1x64xf32>
    %759 = arith.mulf %754, %758 : vector<1x64xf32>
    %cst_279 = arith.constant 1.250000e-01 : f32
    %760 = vector.broadcast %cst_279 : f32 to vector<1x64xf32>
    %761 = arith.mulf %757, %760 : vector<1x64xf32>
    %762 = arith.mulf %759, %759 : vector<1x64xf32>
    %763 = arith.subf %761, %762 : vector<1x64xf32>
    %764 = vector.broadcast %759 : vector<1x64xf32> to vector<8x64xf32>
    %765 = arith.subf %748, %764 : vector<8x64xf32>
    %cst_280 = arith.constant 9.99999974E-6 : f32
    %766 = vector.broadcast %cst_280 : f32 to vector<1x64xf32>
    %767 = arith.addf %763, %766 : vector<1x64xf32>
    %768 = math.rsqrt %767 : vector<1x64xf32>
    %769 = vector.broadcast %768 : vector<1x64xf32> to vector<8x64xf32>
    %770 = arith.mulf %765, %769 : vector<8x64xf32>
    %771 = arith.mulf %770, %750 : vector<8x64xf32>
    %772 = arith.addf %771, %752 : vector<8x64xf32>
    %773 = arith.truncf %772 : vector<8x64xf32> to vector<8x64xbf16>
    %cst_281 = arith.constant dense<0.000000e+00> : vector<8x256xf32>
    %774 = tpu.matmul %773, %697, %cst_281 {dimension_numbers = #tpu.dot_dimension_numbers<[1], [0], [0], [1], [0, 0, 1, 1], [], []>} : vector<8x64xbf16>, vector<64x256xbf16>, vector<8x256xf32> -> vector<8x256xf32>
    %775 = arith.addf %774, %699 : vector<8x256xf32>
    %776 = vector.extract_strided_slice %775 {offsets = [0, 0], sizes = [8, 16], strides = [1, 1]} : vector<8x256xf32> to vector<8x16xf32>
    %777 = math.tanh %776 : vector<8x16xf32>
    %778 = arith.mulf %709, %777 : vector<8x16xf32>
    %779 = arith.mulf %778, %707 : vector<8x16xf32>
    %780 = vector.extract_strided_slice %775 {offsets = [0, 128], sizes = [8, 16], strides = [1, 1]} : vector<8x256xf32> to vector<8x16xf32>
    %781 = arith.mulf %780, %707 : vector<8x16xf32>
    %782 = math.exp %779 : vector<8x16xf32>
    %783 = arith.mulf %690, %782 : vector<8x16xf32>
    %784 = arith.addf %783, %781 : vector<8x16xf32>
    %785 = arith.addf %691, %779 : vector<8x16xf32>
    %c8 = arith.constant 8 : index
    %c0_282 = arith.constant 0 : index
    %c0_283 = arith.constant 0 : index
    %786 = vector.load %arg1[%c8, %c0_282, %c0_283] : memref<10x16x64xbf16, #tpu.memory_space<vmem>>, vector<1x16x64xbf16>
    %787 = vector.shape_cast %786 : vector<1x16x64xbf16> to vector<16x64xbf16>
    %c8_284 = arith.constant 8 : index
    %c0_285 = arith.constant 0 : index
    %c0_286 = arith.constant 0 : index
    %788 = vector.load %arg2[%c8_284, %c0_285, %c0_286] : memref<10x64x64xbf16, #tpu.memory_space<vmem>>, vector<1x64x64xbf16>
    %789 = vector.shape_cast %788 : vector<1x64x64xbf16> to vector<64x64xbf16>
    %c8_287 = arith.constant 8 : index
    %c0_288 = arith.constant 0 : index
    %c0_289 = arith.constant 0 : index
    %790 = vector.load %arg3[%c8_287, %c0_288, %c0_289] : memref<10x64x256xbf16, #tpu.memory_space<vmem>>, vector<1x64x256xbf16>
    %791 = vector.shape_cast %790 : vector<1x64x256xbf16> to vector<64x256xbf16>
    %c8_290 = arith.constant 8 : index
    %c0_291 = arith.constant 0 : index
    %c0_292 = arith.constant 0 : index
    %792 = vector.load %arg4[%c8_290, %c0_291, %c0_292] : memref<10x8x256xf32, #tpu.memory_space<vmem>>, vector<1x8x256xf32>
    %793 = vector.shape_cast %792 : vector<1x8x256xf32> to vector<8x256xf32>
    %c8_293 = arith.constant 8 : index
    %c0_294 = arith.constant 0 : index
    %c0_295 = arith.constant 0 : index
    %c0_296 = arith.constant 0 : index
    %794 = vector.load %arg5[%c8_293, %c0_294, %c0_295, %c0_296] : memref<10x6x8x64xf32, #tpu.memory_space<vmem>>, vector<1x6x8x64xf32>
    %795 = vector.shape_cast %794 : vector<1x6x8x64xf32> to vector<6x8x64xf32>
    %c8_297 = arith.constant 8 : index
    %c0_298 = arith.constant 0 : index
    %c0_299 = arith.constant 0 : index
    %c0_300 = arith.constant 0 : index
    %796 = vector.load %arg6[%c8_297, %c0_298, %c0_299, %c0_300] : memref<10x3x8x16xf32, #tpu.memory_space<vmem>>, vector<1x3x8x16xf32>
    %797 = vector.shape_cast %796 : vector<1x3x8x16xf32> to vector<3x8x16xf32>
    %798 = vector.extract_strided_slice %797 {offsets = [0, 0, 0], sizes = [1, 8, 16], strides = [1, 1, 1]} : vector<3x8x16xf32> to vector<1x8x16xf32>
    %799 = vector.shape_cast %798 : vector<1x8x16xf32> to vector<8x16xf32>
    %800 = vector.extract_strided_slice %797 {offsets = [1, 0, 0], sizes = [1, 8, 16], strides = [1, 1, 1]} : vector<3x8x16xf32> to vector<1x8x16xf32>
    %801 = vector.shape_cast %800 : vector<1x8x16xf32> to vector<8x16xf32>
    %802 = vector.extract_strided_slice %797 {offsets = [2, 0, 0], sizes = [1, 8, 16], strides = [1, 1, 1]} : vector<3x8x16xf32> to vector<1x8x16xf32>
    %803 = vector.shape_cast %802 : vector<1x8x16xf32> to vector<8x16xf32>
    %804 = arith.mulf %784, %799 : vector<8x16xf32>
    %805 = arith.truncf %804 : vector<8x16xf32> to vector<8x16xbf16>
    %cst_301 = arith.constant dense<0.000000e+00> : vector<8x64xf32>
    %806 = tpu.matmul %805, %787, %cst_301 {dimension_numbers = #tpu.dot_dimension_numbers<[1], [0], [0], [1], [0, 0, 1, 1], [], []>} : vector<8x16xbf16>, vector<16x64xbf16>, vector<8x64xf32> -> vector<8x64xf32>
    %807 = vector.extract_strided_slice %795 {offsets = [0, 0, 0], sizes = [1, 8, 64], strides = [1, 1, 1]} : vector<6x8x64xf32> to vector<1x8x64xf32>
    %808 = vector.shape_cast %807 : vector<1x8x64xf32> to vector<8x64xf32>
    %809 = arith.addf %806, %808 : vector<8x64xf32>
    %cst_302 = arith.constant 0.000000e+00 : f32
    %810 = vector.broadcast %cst_302 : f32 to vector<8x64xf32>
    %811 = arith.maximumf %809, %810 : vector<8x64xf32>
    %812 = vector.extract_strided_slice %795 {offsets = [1, 0, 0], sizes = [1, 8, 64], strides = [1, 1, 1]} : vector<6x8x64xf32> to vector<1x8x64xf32>
    %813 = vector.shape_cast %812 : vector<1x8x64xf32> to vector<8x64xf32>
    %814 = vector.extract_strided_slice %795 {offsets = [2, 0, 0], sizes = [1, 8, 64], strides = [1, 1, 1]} : vector<6x8x64xf32> to vector<1x8x64xf32>
    %815 = vector.shape_cast %814 : vector<1x8x64xf32> to vector<8x64xf32>
    %cst_303 = arith.constant dense<0.000000e+00> : vector<64xf32>
    %816 = vector.multi_reduction <add>, %811, %cst_303 [0] : vector<8x64xf32> to vector<64xf32>
    %817 = vector.shape_cast %816 : vector<64xf32> to vector<1x64xf32>
    %818 = arith.mulf %811, %811 : vector<8x64xf32>
    %cst_304 = arith.constant dense<0.000000e+00> : vector<64xf32>
    %819 = vector.multi_reduction <add>, %818, %cst_304 [0] : vector<8x64xf32> to vector<64xf32>
    %820 = vector.shape_cast %819 : vector<64xf32> to vector<1x64xf32>
    %cst_305 = arith.constant 1.250000e-01 : f32
    %821 = vector.broadcast %cst_305 : f32 to vector<1x64xf32>
    %822 = arith.mulf %817, %821 : vector<1x64xf32>
    %cst_306 = arith.constant 1.250000e-01 : f32
    %823 = vector.broadcast %cst_306 : f32 to vector<1x64xf32>
    %824 = arith.mulf %820, %823 : vector<1x64xf32>
    %825 = arith.mulf %822, %822 : vector<1x64xf32>
    %826 = arith.subf %824, %825 : vector<1x64xf32>
    %827 = vector.broadcast %822 : vector<1x64xf32> to vector<8x64xf32>
    %828 = arith.subf %811, %827 : vector<8x64xf32>
    %cst_307 = arith.constant 9.99999974E-6 : f32
    %829 = vector.broadcast %cst_307 : f32 to vector<1x64xf32>
    %830 = arith.addf %826, %829 : vector<1x64xf32>
    %831 = math.rsqrt %830 : vector<1x64xf32>
    %832 = vector.broadcast %831 : vector<1x64xf32> to vector<8x64xf32>
    %833 = arith.mulf %828, %832 : vector<8x64xf32>
    %834 = arith.mulf %833, %813 : vector<8x64xf32>
    %835 = arith.addf %834, %815 : vector<8x64xf32>
    %836 = arith.truncf %835 : vector<8x64xf32> to vector<8x64xbf16>
    %cst_308 = arith.constant dense<0.000000e+00> : vector<8x64xf32>
    %837 = tpu.matmul %836, %789, %cst_308 {dimension_numbers = #tpu.dot_dimension_numbers<[1], [0], [0], [1], [0, 0, 1, 1], [], []>} : vector<8x64xbf16>, vector<64x64xbf16>, vector<8x64xf32> -> vector<8x64xf32>
    %838 = vector.extract_strided_slice %795 {offsets = [3, 0, 0], sizes = [1, 8, 64], strides = [1, 1, 1]} : vector<6x8x64xf32> to vector<1x8x64xf32>
    %839 = vector.shape_cast %838 : vector<1x8x64xf32> to vector<8x64xf32>
    %840 = arith.addf %837, %839 : vector<8x64xf32>
    %cst_309 = arith.constant 0.000000e+00 : f32
    %841 = vector.broadcast %cst_309 : f32 to vector<8x64xf32>
    %842 = arith.maximumf %840, %841 : vector<8x64xf32>
    %843 = vector.extract_strided_slice %795 {offsets = [4, 0, 0], sizes = [1, 8, 64], strides = [1, 1, 1]} : vector<6x8x64xf32> to vector<1x8x64xf32>
    %844 = vector.shape_cast %843 : vector<1x8x64xf32> to vector<8x64xf32>
    %845 = vector.extract_strided_slice %795 {offsets = [5, 0, 0], sizes = [1, 8, 64], strides = [1, 1, 1]} : vector<6x8x64xf32> to vector<1x8x64xf32>
    %846 = vector.shape_cast %845 : vector<1x8x64xf32> to vector<8x64xf32>
    %cst_310 = arith.constant dense<0.000000e+00> : vector<64xf32>
    %847 = vector.multi_reduction <add>, %842, %cst_310 [0] : vector<8x64xf32> to vector<64xf32>
    %848 = vector.shape_cast %847 : vector<64xf32> to vector<1x64xf32>
    %849 = arith.mulf %842, %842 : vector<8x64xf32>
    %cst_311 = arith.constant dense<0.000000e+00> : vector<64xf32>
    %850 = vector.multi_reduction <add>, %849, %cst_311 [0] : vector<8x64xf32> to vector<64xf32>
    %851 = vector.shape_cast %850 : vector<64xf32> to vector<1x64xf32>
    %cst_312 = arith.constant 1.250000e-01 : f32
    %852 = vector.broadcast %cst_312 : f32 to vector<1x64xf32>
    %853 = arith.mulf %848, %852 : vector<1x64xf32>
    %cst_313 = arith.constant 1.250000e-01 : f32
    %854 = vector.broadcast %cst_313 : f32 to vector<1x64xf32>
    %855 = arith.mulf %851, %854 : vector<1x64xf32>
    %856 = arith.mulf %853, %853 : vector<1x64xf32>
    %857 = arith.subf %855, %856 : vector<1x64xf32>
    %858 = vector.broadcast %853 : vector<1x64xf32> to vector<8x64xf32>
    %859 = arith.subf %842, %858 : vector<8x64xf32>
    %cst_314 = arith.constant 9.99999974E-6 : f32
    %860 = vector.broadcast %cst_314 : f32 to vector<1x64xf32>
    %861 = arith.addf %857, %860 : vector<1x64xf32>
    %862 = math.rsqrt %861 : vector<1x64xf32>
    %863 = vector.broadcast %862 : vector<1x64xf32> to vector<8x64xf32>
    %864 = arith.mulf %859, %863 : vector<8x64xf32>
    %865 = arith.mulf %864, %844 : vector<8x64xf32>
    %866 = arith.addf %865, %846 : vector<8x64xf32>
    %867 = arith.truncf %866 : vector<8x64xf32> to vector<8x64xbf16>
    %cst_315 = arith.constant dense<0.000000e+00> : vector<8x256xf32>
    %868 = tpu.matmul %867, %791, %cst_315 {dimension_numbers = #tpu.dot_dimension_numbers<[1], [0], [0], [1], [0, 0, 1, 1], [], []>} : vector<8x64xbf16>, vector<64x256xbf16>, vector<8x256xf32> -> vector<8x256xf32>
    %869 = arith.addf %868, %793 : vector<8x256xf32>
    %870 = vector.extract_strided_slice %869 {offsets = [0, 0], sizes = [8, 16], strides = [1, 1]} : vector<8x256xf32> to vector<8x16xf32>
    %871 = math.tanh %870 : vector<8x16xf32>
    %872 = arith.mulf %803, %871 : vector<8x16xf32>
    %873 = arith.mulf %872, %801 : vector<8x16xf32>
    %874 = vector.extract_strided_slice %869 {offsets = [0, 128], sizes = [8, 16], strides = [1, 1]} : vector<8x256xf32> to vector<8x16xf32>
    %875 = arith.mulf %874, %801 : vector<8x16xf32>
    %876 = math.exp %873 : vector<8x16xf32>
    %877 = arith.mulf %784, %876 : vector<8x16xf32>
    %878 = arith.addf %877, %875 : vector<8x16xf32>
    %879 = arith.addf %785, %873 : vector<8x16xf32>
    %c9 = arith.constant 9 : index
    %c0_316 = arith.constant 0 : index
    %c0_317 = arith.constant 0 : index
    %880 = vector.load %arg1[%c9, %c0_316, %c0_317] : memref<10x16x64xbf16, #tpu.memory_space<vmem>>, vector<1x16x64xbf16>
    %881 = vector.shape_cast %880 : vector<1x16x64xbf16> to vector<16x64xbf16>
    %c9_318 = arith.constant 9 : index
    %c0_319 = arith.constant 0 : index
    %c0_320 = arith.constant 0 : index
    %882 = vector.load %arg2[%c9_318, %c0_319, %c0_320] : memref<10x64x64xbf16, #tpu.memory_space<vmem>>, vector<1x64x64xbf16>
    %883 = vector.shape_cast %882 : vector<1x64x64xbf16> to vector<64x64xbf16>
    %c9_321 = arith.constant 9 : index
    %c0_322 = arith.constant 0 : index
    %c0_323 = arith.constant 0 : index
    %884 = vector.load %arg3[%c9_321, %c0_322, %c0_323] : memref<10x64x256xbf16, #tpu.memory_space<vmem>>, vector<1x64x256xbf16>
    %885 = vector.shape_cast %884 : vector<1x64x256xbf16> to vector<64x256xbf16>
    %c9_324 = arith.constant 9 : index
    %c0_325 = arith.constant 0 : index
    %c0_326 = arith.constant 0 : index
    %886 = vector.load %arg4[%c9_324, %c0_325, %c0_326] : memref<10x8x256xf32, #tpu.memory_space<vmem>>, vector<1x8x256xf32>
    %887 = vector.shape_cast %886 : vector<1x8x256xf32> to vector<8x256xf32>
    %c9_327 = arith.constant 9 : index
    %c0_328 = arith.constant 0 : index
    %c0_329 = arith.constant 0 : index
    %c0_330 = arith.constant 0 : index
    %888 = vector.load %arg5[%c9_327, %c0_328, %c0_329, %c0_330] : memref<10x6x8x64xf32, #tpu.memory_space<vmem>>, vector<1x6x8x64xf32>
    %889 = vector.shape_cast %888 : vector<1x6x8x64xf32> to vector<6x8x64xf32>
    %c9_331 = arith.constant 9 : index
    %c0_332 = arith.constant 0 : index
    %c0_333 = arith.constant 0 : index
    %c0_334 = arith.constant 0 : index
    %890 = vector.load %arg6[%c9_331, %c0_332, %c0_333, %c0_334] : memref<10x3x8x16xf32, #tpu.memory_space<vmem>>, vector<1x3x8x16xf32>
    %891 = vector.shape_cast %890 : vector<1x3x8x16xf32> to vector<3x8x16xf32>
    %892 = vector.extract_strided_slice %891 {offsets = [0, 0, 0], sizes = [1, 8, 16], strides = [1, 1, 1]} : vector<3x8x16xf32> to vector<1x8x16xf32>
    %893 = vector.shape_cast %892 : vector<1x8x16xf32> to vector<8x16xf32>
    %894 = vector.extract_strided_slice %891 {offsets = [1, 0, 0], sizes = [1, 8, 16], strides = [1, 1, 1]} : vector<3x8x16xf32> to vector<1x8x16xf32>
    %895 = vector.shape_cast %894 : vector<1x8x16xf32> to vector<8x16xf32>
    %896 = vector.extract_strided_slice %891 {offsets = [2, 0, 0], sizes = [1, 8, 16], strides = [1, 1, 1]} : vector<3x8x16xf32> to vector<1x8x16xf32>
    %897 = vector.shape_cast %896 : vector<1x8x16xf32> to vector<8x16xf32>
    %898 = arith.mulf %878, %893 : vector<8x16xf32>
    %899 = arith.truncf %898 : vector<8x16xf32> to vector<8x16xbf16>
    %cst_335 = arith.constant dense<0.000000e+00> : vector<8x64xf32>
    %900 = tpu.matmul %899, %881, %cst_335 {dimension_numbers = #tpu.dot_dimension_numbers<[1], [0], [0], [1], [0, 0, 1, 1], [], []>} : vector<8x16xbf16>, vector<16x64xbf16>, vector<8x64xf32> -> vector<8x64xf32>
    %901 = vector.extract_strided_slice %889 {offsets = [0, 0, 0], sizes = [1, 8, 64], strides = [1, 1, 1]} : vector<6x8x64xf32> to vector<1x8x64xf32>
    %902 = vector.shape_cast %901 : vector<1x8x64xf32> to vector<8x64xf32>
    %903 = arith.addf %900, %902 : vector<8x64xf32>
    %cst_336 = arith.constant 0.000000e+00 : f32
    %904 = vector.broadcast %cst_336 : f32 to vector<8x64xf32>
    %905 = arith.maximumf %903, %904 : vector<8x64xf32>
    %906 = vector.extract_strided_slice %889 {offsets = [1, 0, 0], sizes = [1, 8, 64], strides = [1, 1, 1]} : vector<6x8x64xf32> to vector<1x8x64xf32>
    %907 = vector.shape_cast %906 : vector<1x8x64xf32> to vector<8x64xf32>
    %908 = vector.extract_strided_slice %889 {offsets = [2, 0, 0], sizes = [1, 8, 64], strides = [1, 1, 1]} : vector<6x8x64xf32> to vector<1x8x64xf32>
    %909 = vector.shape_cast %908 : vector<1x8x64xf32> to vector<8x64xf32>
    %cst_337 = arith.constant dense<0.000000e+00> : vector<64xf32>
    %910 = vector.multi_reduction <add>, %905, %cst_337 [0] : vector<8x64xf32> to vector<64xf32>
    %911 = vector.shape_cast %910 : vector<64xf32> to vector<1x64xf32>
    %912 = arith.mulf %905, %905 : vector<8x64xf32>
    %cst_338 = arith.constant dense<0.000000e+00> : vector<64xf32>
    %913 = vector.multi_reduction <add>, %912, %cst_338 [0] : vector<8x64xf32> to vector<64xf32>
    %914 = vector.shape_cast %913 : vector<64xf32> to vector<1x64xf32>
    %cst_339 = arith.constant 1.250000e-01 : f32
    %915 = vector.broadcast %cst_339 : f32 to vector<1x64xf32>
    %916 = arith.mulf %911, %915 : vector<1x64xf32>
    %cst_340 = arith.constant 1.250000e-01 : f32
    %917 = vector.broadcast %cst_340 : f32 to vector<1x64xf32>
    %918 = arith.mulf %914, %917 : vector<1x64xf32>
    %919 = arith.mulf %916, %916 : vector<1x64xf32>
    %920 = arith.subf %918, %919 : vector<1x64xf32>
    %921 = vector.broadcast %916 : vector<1x64xf32> to vector<8x64xf32>
    %922 = arith.subf %905, %921 : vector<8x64xf32>
    %cst_341 = arith.constant 9.99999974E-6 : f32
    %923 = vector.broadcast %cst_341 : f32 to vector<1x64xf32>
    %924 = arith.addf %920, %923 : vector<1x64xf32>
    %925 = math.rsqrt %924 : vector<1x64xf32>
    %926 = vector.broadcast %925 : vector<1x64xf32> to vector<8x64xf32>
    %927 = arith.mulf %922, %926 : vector<8x64xf32>
    %928 = arith.mulf %927, %907 : vector<8x64xf32>
    %929 = arith.addf %928, %909 : vector<8x64xf32>
    %930 = arith.truncf %929 : vector<8x64xf32> to vector<8x64xbf16>
    %cst_342 = arith.constant dense<0.000000e+00> : vector<8x64xf32>
    %931 = tpu.matmul %930, %883, %cst_342 {dimension_numbers = #tpu.dot_dimension_numbers<[1], [0], [0], [1], [0, 0, 1, 1], [], []>} : vector<8x64xbf16>, vector<64x64xbf16>, vector<8x64xf32> -> vector<8x64xf32>
    %932 = vector.extract_strided_slice %889 {offsets = [3, 0, 0], sizes = [1, 8, 64], strides = [1, 1, 1]} : vector<6x8x64xf32> to vector<1x8x64xf32>
    %933 = vector.shape_cast %932 : vector<1x8x64xf32> to vector<8x64xf32>
    %934 = arith.addf %931, %933 : vector<8x64xf32>
    %cst_343 = arith.constant 0.000000e+00 : f32
    %935 = vector.broadcast %cst_343 : f32 to vector<8x64xf32>
    %936 = arith.maximumf %934, %935 : vector<8x64xf32>
    %937 = vector.extract_strided_slice %889 {offsets = [4, 0, 0], sizes = [1, 8, 64], strides = [1, 1, 1]} : vector<6x8x64xf32> to vector<1x8x64xf32>
    %938 = vector.shape_cast %937 : vector<1x8x64xf32> to vector<8x64xf32>
    %939 = vector.extract_strided_slice %889 {offsets = [5, 0, 0], sizes = [1, 8, 64], strides = [1, 1, 1]} : vector<6x8x64xf32> to vector<1x8x64xf32>
    %940 = vector.shape_cast %939 : vector<1x8x64xf32> to vector<8x64xf32>
    %cst_344 = arith.constant dense<0.000000e+00> : vector<64xf32>
    %941 = vector.multi_reduction <add>, %936, %cst_344 [0] : vector<8x64xf32> to vector<64xf32>
    %942 = vector.shape_cast %941 : vector<64xf32> to vector<1x64xf32>
    %943 = arith.mulf %936, %936 : vector<8x64xf32>
    %cst_345 = arith.constant dense<0.000000e+00> : vector<64xf32>
    %944 = vector.multi_reduction <add>, %943, %cst_345 [0] : vector<8x64xf32> to vector<64xf32>
    %945 = vector.shape_cast %944 : vector<64xf32> to vector<1x64xf32>
    %cst_346 = arith.constant 1.250000e-01 : f32
    %946 = vector.broadcast %cst_346 : f32 to vector<1x64xf32>
    %947 = arith.mulf %942, %946 : vector<1x64xf32>
    %cst_347 = arith.constant 1.250000e-01 : f32
    %948 = vector.broadcast %cst_347 : f32 to vector<1x64xf32>
    %949 = arith.mulf %945, %948 : vector<1x64xf32>
    %950 = arith.mulf %947, %947 : vector<1x64xf32>
    %951 = arith.subf %949, %950 : vector<1x64xf32>
    %952 = vector.broadcast %947 : vector<1x64xf32> to vector<8x64xf32>
    %953 = arith.subf %936, %952 : vector<8x64xf32>
    %cst_348 = arith.constant 9.99999974E-6 : f32
    %954 = vector.broadcast %cst_348 : f32 to vector<1x64xf32>
    %955 = arith.addf %951, %954 : vector<1x64xf32>
    %956 = math.rsqrt %955 : vector<1x64xf32>
    %957 = vector.broadcast %956 : vector<1x64xf32> to vector<8x64xf32>
    %958 = arith.mulf %953, %957 : vector<8x64xf32>
    %959 = arith.mulf %958, %938 : vector<8x64xf32>
    %960 = arith.addf %959, %940 : vector<8x64xf32>
    %961 = arith.truncf %960 : vector<8x64xf32> to vector<8x64xbf16>
    %cst_349 = arith.constant dense<0.000000e+00> : vector<8x256xf32>
    %962 = tpu.matmul %961, %885, %cst_349 {dimension_numbers = #tpu.dot_dimension_numbers<[1], [0], [0], [1], [0, 0, 1, 1], [], []>} : vector<8x64xbf16>, vector<64x256xbf16>, vector<8x256xf32> -> vector<8x256xf32>
    %963 = arith.addf %962, %887 : vector<8x256xf32>
    %964 = vector.extract_strided_slice %963 {offsets = [0, 0], sizes = [8, 16], strides = [1, 1]} : vector<8x256xf32> to vector<8x16xf32>
    %965 = math.tanh %964 : vector<8x16xf32>
    %966 = arith.mulf %897, %965 : vector<8x16xf32>
    %967 = arith.mulf %966, %895 : vector<8x16xf32>
    %968 = vector.extract_strided_slice %963 {offsets = [0, 128], sizes = [8, 16], strides = [1, 1]} : vector<8x256xf32> to vector<8x16xf32>
    %969 = arith.mulf %968, %895 : vector<8x16xf32>
    %970 = math.exp %967 : vector<8x16xf32>
    %971 = arith.mulf %878, %970 : vector<8x16xf32>
    %972 = arith.addf %971, %969 : vector<8x16xf32>
    %973 = arith.addf %879, %967 : vector<8x16xf32>
    %c0_350 = arith.constant 0 : index
    %c0_351 = arith.constant 0 : index
    %974 = vector.load %arg7[%c0_350, %c0_351] : memref<8x16xf32, #tpu.memory_space<vmem>>, vector<8x16xf32>
    tpu.vector_store %arg7[%c0_350, %c0_351], %972 {strides = array<i32>} : memref<8x16xf32, #tpu.memory_space<vmem>>, vector<8x16xf32>,
    %cst_352 = arith.constant dense<0.000000e+00> : vector<8xf32>
    %975 = vector.multi_reduction <add>, %973, %cst_352 [1] : vector<8x16xf32> to vector<8xf32>
    %976 = vector.shape_cast %975 : vector<8xf32> to vector<8x1xf32>
    %c0_353 = arith.constant 0 : index
    %c0_354 = arith.constant 0 : index
    %977 = vector.load %arg8[%c0_353, %c0_354] : memref<8x1xf32, #tpu.memory_space<vmem>>, vector<8x1xf32>
    tpu.vector_store %arg8[%c0_353, %c0_354], %976 {strides = array<i32>} : memref<8x1xf32, #tpu.memory_space<vmem>>, vector<8x1xf32>,
    return
  }
}

</mosaic_0001>

<bundles_post_ra>
// kernel: realflow_nvp.1
= control target key start
LH: loop header
LB: loop body
LE: loop exit
PB: predicated region body
PF: predicated region fallthrough
CT: control target
= control target key end

     0   :  { %14 = vsyncpa [#allocation3], 0  ;;  %s4490_s0 = inlined_call_operand.hbm [shape: f32[8,16], index: 0, kind: input, shape index: {}]   ;;  %s4491_s1 = inlined_call_operand.hbm [shape: bf16[10,16,64], index: 1, kind: input, shape index: {}]   ;;  %s4492_s2 = inlined_call_operand.hbm [shape: bf16[10,64,64], index: 2, kind: input, shape index: {}]   ;;  %s4493_s3 = inlined_call_operand.hbm [shape: bf16[10,64,256], index: 3, kind: input, shape index: {}]   ;;  %s4494_s4 = inlined_call_operand.hbm [shape: f32[10,8,256], index: 4, kind: input, shape index: {}]   ;;  %s4495_s5 = inlined_call_operand.hbm [shape: f32[10,6,8,64], index: 5, kind: input, shape index: {}]   ;;  %s4496_s6 = inlined_call_operand.hbm [shape: f32[10,3,8,16], index: 6, kind: input, shape index: {}]   ;;  %s4497_s7 = inlined_call_operand.hbm [shape: f32[8,16], index: 7, kind: output, shape index: {0}]   ;;  %s4498_s8 = inlined_call_operand.vmem [shape: f32[8,1], index: 8, kind: output, shape index: {1}]  }
   0x1   :  { %15 = vsyncpa [#allocation6], 0 }
   0x2   :  { %16 = vsyncpa [#allocation9], 0 }
   0x3   :  { %17 = vsyncpa [#allocation12], 0 }
   0x4   :  { %18 = vsyncpa [#allocation4], 0  ;;  %s4064_s27 = smov [#allocation5]   ;;  %s3878_s9 = scalar_lea.hbm %s4491_s1, 1280 }
   0x5   :  { %s34_s28 = sshll.u32 %s4064_s27, 4  ;;  %p3879_p0 = scmp.ne.s32.totalorder %s4491_s1, %s3878_s9  ;;  %s35_s28 = int_to_ptr.vmem [resolvable:$true] %s34_s28 }
   0x6   :  { %p3882_p1 = scmp.lt.u32.totalorder %s3878_s9, %s4491_s1 }
   0x8   :  { %p3884_p2 = pnand %p3882_p1, %p3879_p0 }
   0xa   :  { %3887 = shalt.err (!%p3884_p2)
}
   0xb   :  { %s3888_s14 = scalar_lea.vmem %s35_s28, 1280  ;;  %p3893_p4 = scmp.lt.s32.totalorder %s35_s28, %s35_s28 }
   0xc   :  { %p3889_p3 = scmp.ne.s32.totalorder %s35_s28, %s3888_s14  ;;  %p3894_p5 = scmp.lt.s32.totalorder %s3888_s14, %s3888_s14 }
   0xe   :  { %p3895_p6 = por %p3894_p5, %p3893_p4 }
  0x10   :  { %p3896_p7 = pnand %p3895_p6, %p3889_p3 }
  0x12   :  { %3899 = shalt.err (!%p3896_p7)
}
  0x13   :  { %s4065_s15 = smov 64   ;;  %s4066_s16 = smov 4  }
  0x14   :  { %40 = dma.hbm_to_vmem [thread:$0]  %s4491_s1, 1280, %s35_s28, [#allocation6], %s4065_s15, %s4065_s15, %s4066_s16  }
  0x15   :  { %s4067_s19 = smov [#allocation8]   ;;  %s3900_s23 = scalar_lea.hbm %s4493_s3, 10240 }
  0x16   :  { %s58_s20 = sshll.u32 %s4067_s19, 4  ;;  %p3901_p8 = scmp.ne.s32.totalorder %s4493_s3, %s3900_s23  ;;  %s59_s20 = int_to_ptr.vmem [resolvable:$true] %s58_s20 }
  0x17   :  { %p3904_p9 = scmp.lt.u32.totalorder %s3900_s23, %s4493_s3 }
  0x19   :  { %p3906_p10 = pnand %p3904_p9, %p3901_p8 }
  0x1b   :  { %3909 = shalt.err (!%p3906_p10)
}
  0x1c   :  { %s3910_s29 = scalar_lea.vmem %s59_s20, 10240  ;;  %p3915_p12 = scmp.lt.s32.totalorder %s59_s20, %s59_s20 }
  0x1d   :  { %p3911_p11 = scmp.ne.s32.totalorder %s59_s20, %s3910_s29  ;;  %p3916_p13 = scmp.lt.s32.totalorder %s3910_s29, %s3910_s29 }
  0x1f   :  { %p3917_p0 = por %p3916_p13, %p3915_p12 }
  0x21   :  { %p3918_p1 = pnand %p3917_p0, %p3911_p11 }
  0x23   :  { %3921 = shalt.err (!%p3918_p1)
}
  0x24   :  { %s4068_s1 = smov 128   ;;  %s4069_s28 = smov 8  }
  0x25   :  { %64 = dma.hbm_to_vmem [thread:$0]  %s4493_s3, 10240, %s59_s20, [#allocation9], %s4068_s1, %s4068_s1, %s4069_s28  }
  0x26   :  { %s4070_s10 = smov [#allocation11]   ;;  %s4071_s12 = smov [#allocation2]  }
  0x27   :  { %s82_s11 = sshll.u32 %s4070_s10, 4  ;;  %s25_s13 = sshll.u32 %s4071_s12, 4  ;;  %s83_s11 = int_to_ptr.vmem [resolvable:$true] %s82_s11  ;;  %s26_s13 = int_to_ptr.vmem [resolvable:$true] %s25_s13 }
  0x28   :  { %s3922_s18 = scalar_lea.hbm %s4495_s5, 7680 }
  0x29   :  { %p3923_p2 = scmp.ne.s32.totalorder %s4495_s5, %s3922_s18  ;;  %p3926_p3 = scmp.lt.u32.totalorder %s3922_s18, %s4495_s5 }
  0x2b   :  { %p3928_p4 = pnand %p3926_p3, %p3923_p2 }
  0x2d   :  { %3931 = shalt.err (!%p3928_p4)
}
  0x2e   :  { %s3932_s3 = scalar_lea.vmem %s83_s11, 7680  ;;  %p3937_p6 = scmp.lt.s32.totalorder %s83_s11, %s83_s11 }
  0x2f   :  { %p3933_p5 = scmp.ne.s32.totalorder %s83_s11, %s3932_s3  ;;  %p3938_p7 = scmp.lt.s32.totalorder %s3932_s3, %s3932_s3 }
  0x31   :  { %p3939_p8 = por %p3938_p7, %p3937_p6 }
  0x33   :  { %p3940_p9 = pnand %p3939_p8, %p3933_p5 }
  0x35   :  { %3943 = shalt.err (!%p3940_p9)
}
  0x36   :  { %88 = dma.hbm_to_vmem [thread:$0]  %s4495_s5, 7680, %s83_s11, [#allocation12], %s4068_s1, %s4068_s1, %s4069_s28  }
  0x37   :  { %s3944_s27 = scalar_lea.hbm %s4490_s0, 128 }
  0x38   :  { %p3945_p10 = scmp.ne.s32.totalorder %s4490_s0, %s3944_s27  ;;  %p3948_p11 = scmp.lt.u32.totalorder %s3944_s27, %s4490_s0 }
  0x3a   :  { %p3950_p12 = pnand %p3948_p11, %p3945_p10 }
  0x3c   :  { %3953 = shalt.err (!%p3950_p12)
}
  0x3d   :  { %s3954_s12 = scalar_lea.vmem %s26_s13, 128  ;;  %p3959_p0 = scmp.lt.s32.totalorder %s26_s13, %s26_s13 }
  0x3e   :  { %p3955_p13 = scmp.ne.s32.totalorder %s26_s13, %s3954_s12  ;;  %p3960_p1 = scmp.lt.s32.totalorder %s3954_s12, %s3954_s12 }
  0x40   :  { %p3961_p2 = por %p3960_p1, %p3959_p0 }
  0x42   :  { %p3962_p3 = pnand %p3961_p2, %p3955_p13 }
  0x44   :  { %3965 = shalt.err (!%p3962_p3)
}
  0x45   :  { %28 = dma.hbm_to_vmem [thread:$0]  %s4490_s0, 128, %s26_s13, [#allocation3]  }
  0x46   :  { %s4072_s14 = smov [#allocation7]   ;;  %s4073_s18 = smov [#allocation10]  }
  0x47   :  { %s46_s17 = sshll.u32 %s4072_s14, 4  ;;  %s70_s19 = sshll.u32 %s4073_s18, 4  ;;  %s47_s17 = int_to_ptr.vmem [resolvable:$true] %s46_s17  ;;  %s4183_s19 = int_to_ptr.vmem [resolvable:$true] %s70_s19 }
  0x48   :  { %s3966_s23 = scalar_lea.hbm %s4492_s2, 5120 }
  0x49   :  { %p3967_p4 = scmp.ne.s32.totalorder %s4492_s2, %s3966_s23  ;;  %p3970_p5 = scmp.lt.u32.totalorder %s3966_s23, %s4492_s2 }
  0x4b   :  { %p3972_p6 = pnand %p3970_p5, %p3967_p4 }
  0x4d   :  { %3975 = shalt.err (!%p3972_p6)
}
  0x4e   :  { %s3976_s0 = scalar_lea.vmem %s47_s17, 5120  ;;  %p3981_p8 = scmp.lt.s32.totalorder %s47_s17, %s47_s17 }
  0x4f   :  { %p3977_p7 = scmp.ne.s32.totalorder %s47_s17, %s3976_s0  ;;  %p3982_p9 = scmp.lt.s32.totalorder %s3976_s0, %s3976_s0 }
  0x51   :  { %p3983_p10 = por %p3982_p9, %p3981_p8 }
  0x53   :  { %p3984_p11 = pnand %p3983_p10, %p3977_p7 }
  0x55   :  { %3987 = shalt.err (!%p3984_p11)
}
  0x56   :  { %52 = dma.hbm_to_vmem [thread:$0]  %s4492_s2, 5120, %s47_s17, [#allocation6], %s4065_s15, %s4065_s15, %s4066_s16  }
  0x57   :  { %s3988_s30 = scalar_lea.hbm %s4494_s4, 2560 }
  0x58   :  { %p3989_p12 = scmp.ne.s32.totalorder %s4494_s4, %s3988_s30  ;;  %p3992_p13 = scmp.lt.u32.totalorder %s3988_s30, %s4494_s4 }
  0x5a   :  { %p3994_p0 = pnand %p3992_p13, %p3989_p12 }
  0x5c   :  { %3997 = shalt.err (!%p3994_p0)
}
  0x5d   :  { %s3998_s11 = scalar_lea.vmem %s4183_s19, 2560  ;;  %p4003_p2 = scmp.lt.s32.totalorder %s4183_s19, %s4183_s19 }
  0x5e   :  { %p3999_p1 = scmp.ne.s32.totalorder %s4183_s19, %s3998_s11  ;;  %p4004_p3 = scmp.lt.s32.totalorder %s3998_s11, %s3998_s11 }
  0x60   :  { %p4005_p4 = por %p4004_p3, %p4003_p2 }
  0x62   :  { %p4006_p5 = pnand %p4005_p4, %p3999_p1 }
  0x64   :  { %4009 = shalt.err (!%p4006_p5)
}
  0x65   :  { %s4074_s2 = smov 256   ;;  %s4075_s15 = smov 16  }
  0x66   :  { %76 = dma.hbm_to_vmem [thread:$0]  %s4494_s4, 2560, %s4183_s19, [#allocation9], %s4074_s2, %s4074_s2, %s4075_s15  }
  0x67   :  { %s4076_s17 = smov [#allocation13]   ;;  %s4010_s23 = scalar_lea.hbm %s4496_s6, 3840 }
  0x68   :  { %s94_s18 = sshll.u32 %s4076_s17, 4  ;;  %p4011_p6 = scmp.ne.s32.totalorder %s4496_s6, %s4010_s23  ;;  %s95_s18 = int_to_ptr.vmem [resolvable:$true] %s94_s18 }
  0x69   :  { %p4014_p7 = scmp.lt.u32.totalorder %s4010_s23, %s4496_s6 }
  0x6b   :  { %p4016_p8 = pnand %p4014_p7, %p4011_p6 }
  0x6d   :  { %4019 = shalt.err (!%p4016_p8)
}
  0x6e   :  { %s4020_s0 = scalar_lea.vmem %s95_s18, 3840  ;;  %p4025_p10 = scmp.lt.s32.totalorder %s95_s18, %s95_s18 }
  0x6f   :  { %p4021_p9 = scmp.ne.s32.totalorder %s95_s18, %s4020_s0  ;;  %p4026_p11 = scmp.lt.s32.totalorder %s4020_s0, %s4020_s0 }
  0x71   :  { %p4027_p12 = por %p4026_p11, %p4025_p10 }
  0x73   :  { %p4028_p13 = pnand %p4027_p12, %p4021_p9 }
  0x75   :  { %4031 = shalt.err (!%p4028_p13)
}
  0x76   :  { %100 = dma.hbm_to_vmem [thread:$0]  %s4496_s6, 3840, %s95_s18, [#allocation12], %s4068_s1, %s4068_s1, %s4069_s28  }
  0x77   :  { %4054 = dma.done.wait [#allocation3], 128  }
  0x78   :  { %4055 = vsyncadd [#allocation3], 4294967168 }
  0x79   :  { %4056 = dma.done.wait [#allocation6], 6400  }
  0x7a   :  { %4057 = vsyncadd [#allocation6], 4294960896 }
  0x7b   :  { %4058 = dma.done.wait [#allocation9], 12800  }
  0x7c   :  { %4059 = vsyncadd [#allocation9], 4294954496 }
  0x7d   :  { %4060 = dma.done.wait [#allocation12], 11520  }
  0x7e   :  { %4061 = vsyncadd [#allocation12], 4294955776  ;;  %v4077_v0 = vmov 0.0   ;;  %vm4078_vm0 = vmmov 0   ;;  %vm124_vm1 = vcmask 130048   ;;  %v3618_v1 = vld [vmem:[#allocation5] sm:$0xff]  }
  0x7f   :  { %3421 = vmatprep.subr.bf16.mxu0 %v4077_v0  ;;  %3423 = vmatprep.mubr.msk.bf16.mxu0 %vm4078_vm0, %v4077_v0  ;;  %v123_v2 = vld [vmem:[#allocation2] sm:$0xff]  ;;  %v194_v29 = vld [vmem:[#allocation13] sm:$0xff]  ;;  %v3621_v36 = vld [vmem:[#allocation7 + $0x10] sm:$0xff]   ;;  %vm249_vm2 = vcmask 523264   ;;  %s4080_s6 = smov [#allocation14]  }
  0x80   :  { %3427 = vmatprep.subr.bf16.mxu1 %v4077_v0  ;;  %3435 = vmatprep.mubr.msk.bf16.mxu1 %vm4078_vm0, %v4077_v0  ;;  %v125_v3 = vsel %vm124_vm1, %v123_v2, 0.0  ;;  %v132_v4 = vmul.f32 %v123_v2, %v123_v2  ;;  %v3619_v34 = vld [vmem:[#allocation7] sm:$0xff]   ;;  %v3620_v35 = vld [vmem:[#allocation7 + $0x8] sm:$0xff]   ;;  %v3622_v37 = vld [vmem:[#allocation7 + $0x18] sm:$0xff]   ;;  %s3175_s1 = sshll.u32 %s4080_s6, 4  ;;  %s3176_s1 = int_to_ptr.vmem [resolvable:$true] %s3175_s1 }
  0x81   :  { %3422 = vmatpush3.bf16.msra.mxu0 %v3618_v1  ;;  %v126_v5 = vrot.slane %v125_v3, 4  ;;  %3428 = vmatpush3.bf16.msra.mxu1 %v3619_v34  ;;  %v188_v38 = vld [vmem:[#allocation11] sm:$0xff]  ;;  %s4032_s28 = scalar_lea.vmem %s3176_s1, 128  ;;  %p4037_p1 = scmp.lt.s32.totalorder %s3176_s1, %s3176_s1 }
  0x82   :  { %v133_v6 = vsel %vm124_vm1, %v132_v4, 0.0  ;;  %3429 = vmatprep.subr.bf16.mxu1 %v4077_v0  ;;  %v189_v4 = vld [vmem:[#allocation11 + $0x8] sm:$0xff]  ;;  %p4033_p0 = scmp.ne.s32.totalorder %s3176_s1, %s4032_s28  ;;  %p4038_p2 = scmp.lt.s32.totalorder %s4032_s28, %s4032_s28 }
  0x83   :  { %v127_v7 = vadd.f32 %v126_v5, %v125_v3  ;;  %v134_v8 = vrot.slane %v133_v6, 4 }
  0x84   :  { %p4039_p3 = por %p4038_p2, %p4037_p1 }
  0x85   :  { %v128_v9 = vrot.slane %v127_v7, 2  ;;  %v135_v10 = vadd.f32 %v134_v8, %v133_v6  ;;  %3430 = vmatpush3.bf16.msra.mxu1 %v3620_v35  ;;  %v190_v6 = vld [vmem:[#allocation11 + $0x10] sm:$0xff] }
  0x86   :  { %3431 = vmatprep.subr.bf16.mxu1 %v4077_v0  ;;  %p4040_p4 = pnand %p4039_p3, %p4033_p0 }
  0x87   :  { %v129_v11 = vadd.f32 %v128_v9, %v127_v7  ;;  %v136_v12 = vrot.slane %v135_v10, 2 }
  0x89   :  { %v130_v13 = vrot.slane %v129_v11, 1  ;;  %v137_v14 = vadd.f32 %v136_v12, %v135_v10  ;;  %3432 = vmatpush3.bf16.msra.mxu1 %v3621_v36  ;;  %v3625_v10 = vld [vmem:[#allocation8 + $0x4] ss:$8 sps:$4 sm:$0xff]   ;;  %v3628_v12 = vld [vmem:[#allocation8 + $0x14] ss:$8 sps:$4 sm:$0xff]  }
  0x8a   :  { %3433 = vmatprep.subr.bf16.mxu1 %v4077_v0  ;;  %413 = vmatprep.subr.bf16.mxu0 %v3625_v10  ;;  %v495_v10 = vld [vmem:[#allocation13 + $0x18] sm:$0xff] }
  0x8b   :  { %v131_v15 = vadd.f32 %v130_v13, %v129_v11  ;;  %v138_v16 = vrot.slane %v137_v14, 1  ;;  %v3623_v11 = vld [vmem:[#allocation8] ss:$8 sps:$4 sm:$0xff]   ;;  %v3626_v13 = vld [vmem:[#allocation8 + $0x10] ss:$8 sps:$4 sm:$0xff]  }
  0x8d   :  { %v139_v17 = vadd.f32 %v138_v16, %v137_v14  ;;  %v140_v18 = vmul.f32 0.125, %v131_v15  ;;  %3434 = vmatpush3.bf16.msra.mxu1 %v3622_v37  ;;  %v3631_v14 = vld [vmem:[#allocation8 + $0x24] ss:$8 sps:$4 sm:$0xff]   ;;  %v3629_v15 = vld [vmem:[#allocation8 + $0x20] ss:$8 sps:$4 sm:$0xff]  }
  0x8e   :  { %3439 = vmatprep.subr.bf16.mxu1 %v4077_v0  ;;  %v3634_v16 = vld [vmem:[#allocation8 + $0x34] ss:$8 sps:$4 sm:$0xff]  }
  0x8f   :  { %v141_v19 = vmul.f32 0.125, %v139_v17  ;;  %v142_v20 = vmul.f32 %v140_v18, %v140_v18  ;;  %v151_v27 = vsub.f32 %v123_v2, %v140_v18  ;;  %v3632_v17 = vld [vmem:[#allocation8 + $0x30] ss:$8 sps:$4 sm:$0xff]   ;;  %v4079_v18 = vmov 0  }
  0x91   :  { %v143_v21 = vsub.f32 %v141_v19, %v142_v20  ;;  %v191_v19 = vld [vmem:[#allocation11 + $0x18] sm:$0xff] }
  0x93   :  { %v144_v22 = vadd.f32 1e-06, %v143_v21 }
  0x95   :  { %3788 = vrcp.f32 %v144_v22 }
  0x96   :  { %3790 = vrsqrt.f32 %v144_v22 }
  0x9f   :  { %v3789_v23 = vpop.eup %3788 }
  0xa0   :  { %v147_v24 = vmul.f32 %v3789_v23, %v143_v21  ;;  %v3791_v26 = vpop.eup %3790 }
  0xa2   :  { %v148_v25 = vadd.f32 1e-06, %v147_v24 }
  0xa4   :  { %3792 = vrsqrt.f32 %v148_v25 }
  0xae   :  { %v3793_v28 = vpop.eup %3792 }
  0xaf   :  { %v150_v30 = vmul.f32 %v3793_v28, %v3791_v26 }
  0xb1   :  { %v4240_v31 = vmul.f32 %v151_v27, %v150_v30 }
  0xb3   :  { %v197_v32 = vmul.f32 %v194_v29, %v4240_v31 }
  0xb5   :  { %v198_v33 = vpack.c.bf16 %v197_v32, %v197_v32 }
  0xb7   :  { %3424 = vmatmul.mubr.msk.bf16.vlgmr.msra.gmra.mrb[0].mxu0 %vm124_vm1, %v198_v33 }
  0xb8   :  { %414 = vmatpush1.bf16.msra.mxu0 %v3623_v11  ;;  %445 = vmatprep.mubr.bf16.mxu0 %v4079_v18 }
  0xb9   :  { %415 = vmatprep.subr.bf16.mxu0 %v3628_v12 }
  0xbc   :  { %416 = vmatpush1.bf16.msra.mxu0 %v3626_v13 }
  0xbd   :  { %417 = vmatprep.subr.bf16.mxu0 %v3631_v14  ;;  %v3636_v14 = vld [vmem:[#allocation7 + $0x20] sm:$0xff]  }
  0xc0   :  { %418 = vmatpush1.bf16.msra.mxu0 %v3629_v15  ;;  %v3637_v15 = vld [vmem:[#allocation7 + $0x28] sm:$0xff]  }
  0xc1   :  { %419 = vmatprep.subr.bf16.mxu0 %v3634_v16  ;;  %v3638_v16 = vld [vmem:[#allocation7 + $0x30] sm:$0xff]  }
  0xc4   :  { %420 = vmatpush1.bf16.msra.mxu0 %v3632_v17  ;;  %v3639_v17 = vld [vmem:[#allocation7 + $0x38] sm:$0xff]  }
  0xc5   :  { %3445 = vmatprep.subr.bf16.mxu0 %v4077_v0 }
 0x18a   :  { %v242_v39 = vpop.f32.mrb[0].mxu0 }
 0x18b   :  { %v243_v40 = vadd.f32 %v242_v39, %v188_v38  ;;  %v3425_v41 = vpop.f32.mrb[1].mxu0 }
 0x18c   :  { %v245_v42 = vpop.f32.mrb[2].mxu0 }
 0x18d   :  { %v248_v43 = vmax.f32 %v243_v40, 0.0  ;;  %v3426_v44 = vpop.f32.mrb[3].mxu0 }
 0x18f   :  { %v250_v45 = vsel %vm249_vm2, %v248_v43, 0.0  ;;  %v257_v46 = vmul.f32 %v248_v43, %v248_v43 }
 0x190   :  { %v251_v47 = vrot.slane %v250_v45, 4 }
 0x191   :  { %v258_v48 = vsel %vm249_vm2, %v257_v46, 0.0 }
 0x192   :  { %v252_v49 = vadd.f32 %v251_v47, %v250_v45  ;;  %v259_v50 = vrot.slane %v258_v48, 4 }
 0x194   :  { %v253_v51 = vrot.slane %v252_v49, 2  ;;  %v260_v52 = vadd.f32 %v259_v50, %v258_v48 }
 0x196   :  { %v254_v53 = vadd.f32 %v253_v51, %v252_v49  ;;  %v261_v54 = vrot.slane %v260_v52, 2  ;;  %v192_v49 = vld [vmem:[#allocation11 + $0x20] sm:$0xff]  ;;  %v193_v51 = vld [vmem:[#allocation11 + $0x28] sm:$0xff] }
 0x198   :  { %v255_v55 = vrot.slane %v254_v53, 1  ;;  %v262_v56 = vadd.f32 %v261_v54, %v260_v52 }
 0x19a   :  { %v256_v57 = vadd.f32 %v255_v55, %v254_v53  ;;  %v263_v58 = vrot.slane %v262_v56, 1  ;;  %v3635_v55 = vld [vmem:[#allocation5 + $0x8] sm:$0xff]  }
 0x19c   :  { %v264_v59 = vadd.f32 %v263_v58, %v262_v56  ;;  %v265_v60 = vmul.f32 0.125, %v256_v57  ;;  %v186_v56 = vld [vmem:[#allocation10] sm:$0xff] }
 0x19e   :  { %v266_v61 = vmul.f32 0.125, %v264_v59  ;;  %v267_v62 = vmul.f32 %v265_v60, %v265_v60  ;;  %v269_v2 = vsub.f32 %v248_v43, %v265_v60 }
 0x1a0   :  { %v268_v63 = vsub.f32 %v266_v61, %v267_v62  ;;  %v196_v62 = vld [vmem:[#allocation13 + $0x10] sm:$0xff] }
 0x1a2   :  { %v270_v1 = vadd.f32 1e-05, %v268_v63 }
 0x1a4   :  { %3794 = vrsqrt.f32 %v270_v1 }
 0x1ae   :  { %v3795_v3 = vpop.eup %3794 }
 0x1af   :  { %v272_v5 = vmul.f32 %v3795_v3, %v269_v2  ;;  %v195_v2 = vld [vmem:[#allocation13 + $0x8] sm:$0xff] }
 0x1b1   :  { %v273_v7 = vmul.f32 %v272_v5, %v189_v4  ;;  %v187_v5 = vld [vmem:[#allocation10 + $0x8] sm:$0xff] }
 0x1b3   :  { %v274_v8 = vadd.f32 %v273_v7, %v190_v6 }
 0x1b5   :  { %v275_v9 = vpack.c.bf16 %v274_v8, %v274_v8 }
 0x1b7   :  { %3436 = vmatmul.mubr.msk.bf16.vlgmr.msra.gmra.mrb[0].mxu1 %vm249_vm2, %v275_v9 }
 0x1b8   :  { %3441 = vmatprep.mubr.msk.bf16.mxu1 %vm4078_vm0, %v4077_v0  ;;  %3440 = vmatpush3.bf16.msra.mxu1 %v3635_v55  ;;  %v3642_v55 = vld [vmem:[#allocation8 + $0x44] ss:$8 sps:$4 sm:$0xff]  }
 0x1b9   :  { %713 = vmatprep.subr.bf16.mxu1 %v3642_v55 }
 0x28a   :  { %v337_v20 = vpop.f32.mrb[0].mxu1 }
 0x28b   :  { %v338_v21 = vadd.f32 %v337_v20, %v191_v19  ;;  %v3437_v22 = vpop.f32.mrb[1].mxu1  ;;  %v488_v19 = vld [vmem:[#allocation11 + $0x30] sm:$0xff] }
 0x28c   :  { %v340_v23 = vpop.f32.mrb[2].mxu1 }
 0x28d   :  { %v343_v24 = vmax.f32 %v338_v21, 0.0  ;;  %v3438_v25 = vpop.f32.mrb[3].mxu1 }
 0x28f   :  { %v344_v26 = vsel %vm249_vm2, %v343_v24, 0.0  ;;  %v351_v27 = vmul.f32 %v343_v24, %v343_v24 }
 0x290   :  { %v345_v28 = vrot.slane %v344_v26, 4 }
 0x291   :  { %v352_v29 = vsel %vm249_vm2, %v351_v27, 0.0 }
 0x292   :  { %v346_v30 = vadd.f32 %v345_v28, %v344_v26  ;;  %v353_v32 = vrot.slane %v352_v29, 4 }
 0x294   :  { %v347_v33 = vrot.slane %v346_v30, 2  ;;  %v354_v34 = vadd.f32 %v353_v32, %v352_v29 }
 0x296   :  { %v348_v35 = vadd.f32 %v347_v33, %v346_v30  ;;  %v355_v36 = vrot.slane %v354_v34, 2 }
 0x298   :  { %v349_v37 = vrot.slane %v348_v35, 1  ;;  %v356_v38 = vadd.f32 %v355_v36, %v354_v34 }
 0x29a   :  { %v350_v39 = vadd.f32 %v349_v37, %v348_v35  ;;  %v357_v40 = vrot.slane %v356_v38, 1 }
 0x29c   :  { %v358_v41 = vadd.f32 %v357_v40, %v356_v38  ;;  %v359_v42 = vmul.f32 0.125, %v350_v39 }
 0x29e   :  { %v360_v43 = vmul.f32 0.125, %v358_v41  ;;  %v361_v44 = vmul.f32 %v359_v42, %v359_v42  ;;  %v363_v47 = vsub.f32 %v343_v24, %v359_v42 }
 0x2a0   :  { %v362_v45 = vsub.f32 %v360_v43, %v361_v44 }
 0x2a2   :  { %v364_v46 = vadd.f32 1e-05, %v362_v45 }
 0x2a4   :  { %3796 = vrsqrt.f32 %v364_v46 }
 0x2ae   :  { %v3797_v48 = vpop.eup %3796 }
 0x2af   :  { %v366_v50 = vmul.f32 %v3797_v48, %v363_v47 }
 0x2b1   :  { %v367_v52 = vmul.f32 %v366_v50, %v192_v49  ;;  %v489_v49 = vld [vmem:[#allocation11 + $0x38] sm:$0xff] }
 0x2b3   :  { %v368_v53 = vadd.f32 %v367_v52, %v193_v51  ;;  %v490_v51 = vld [vmem:[#allocation11 + $0x40] sm:$0xff] }
 0x2b5   :  { %v369_v54 = vpack.c.bf16 %v368_v53, %v368_v53 }
 0x2b7   :  { %3206 = vmatmul.mubr.msk.bf16.vlgmr.msra.gmra.mrb[4].mxu0 %vm249_vm2, %v369_v54 }
 0x2b8   :  { %3453 = vmatprep.mubr.msk.bf16.mxu0 %vm4078_vm0, %v4077_v0  ;;  %3446 = vmatpush3.bf16.msra.mxu0 %v3636_v14 }
 0x2b9   :  { %3447 = vmatprep.subr.bf16.mxu0 %v4077_v0 }
 0x2bc   :  { %3448 = vmatpush3.bf16.msra.mxu0 %v3637_v15 }
 0x2bd   :  { %3449 = vmatprep.subr.bf16.mxu0 %v4077_v0 }
 0x2c0   :  { %3450 = vmatpush3.bf16.msra.mxu0 %v3638_v16 }
 0x2c1   :  { %3451 = vmatprep.subr.bf16.mxu0 %v4077_v0 }
 0x2c4   :  { %3452 = vmatpush3.bf16.msra.mxu0 %v3639_v17 }
 0x2c5   :  { %3457 = vmatprep.subr.bf16.mxu0 %v4077_v0 }
 0x38a   :  { %v447_v57 = vpop.f32.mrb[4].mxu0 }
 0x38b   :  { %v448_v58 = vadd.f32 %v447_v57, %v186_v56  ;;  %v449_v59 = vpop.f32.mrb[5].mxu0  ;;  %v3640_v56 = vld [vmem:[#allocation8 + $0x40] ss:$8 sps:$4 sm:$0xff]   ;;  %v3645_v57 = vld [vmem:[#allocation8 + $0x54] ss:$8 sps:$4 sm:$0xff]  }
 0x38c   :  { %v451_v60 = vpop.f32.mrb[6].mxu0  ;;  %v450_v6 = vadd.f32 %v449_v59, %v187_v5  ;;  %v3648_v59 = vld [vmem:[#allocation8 + $0x64] ss:$8 sps:$4 sm:$0xff]  }
 0x38d   :  { %3798 = vtanh.f32 %v448_v58  ;;  %v452_v61 = vpop.f32.mrb[7].mxu0  ;;  %v3643_v58 = vld [vmem:[#allocation8 + $0x50] ss:$8 sps:$4 sm:$0xff]   ;;  %v3646_v60 = vld [vmem:[#allocation8 + $0x60] ss:$8 sps:$4 sm:$0xff]  }
 0x38e   :  { %v457_v8 = vmul.f32 %v450_v6, %v195_v2  ;;  %v3651_v61 = vld [vmem:[#allocation8 + $0x74] ss:$8 sps:$4 sm:$0xff]  }
 0x397   :  { %v3799_v63 = vpop.eup %3798 }
 0x398   :  { %v455_v1 = vmul.f32 %v3799_v63, %v196_v62  ;;  %v3649_v62 = vld [vmem:[#allocation8 + $0x70] ss:$8 sps:$4 sm:$0xff]   ;;  %v491_v63 = vld [vmem:[#allocation11 + $0x48] sm:$0xff] }
 0x39a   :  { %v4260_v3 = vmul.f32 %v455_v1, %v195_v2 }
 0x39c   :  { %v458_v4 = vmul.f32 1.442695, %v4260_v3 }
 0x39e   :  { %3800 = vpow2.f32 %v458_v4 }
 0x3a8   :  { %v3801_v7 = vpop.eup %3800 }
 0x3a9   :  { %v460_v9 = vmul.f32 %v3801_v7, %v4240_v31 }
 0x3ab   :  { %v4264_v11 = vadd.f32 %v460_v9, %v457_v8 }
 0x3ad   :  { %v498_v12 = vmul.f32 %v495_v10, %v4264_v11 }
 0x3af   :  { %v499_v13 = vpack.c.bf16 %v498_v12, %v498_v12 }
 0x3b1   :  { %3442 = vmatmul.mubr.msk.bf16.vlgmr.msra.gmra.mrb[4].mxu1 %vm124_vm1, %v499_v13 }
 0x3b2   :  { %745 = vmatprep.mubr.bf16.mxu1 %v4079_v18  ;;  %714 = vmatpush1.bf16.msra.mxu1 %v3640_v56 }
 0x3b3   :  { %715 = vmatprep.subr.bf16.mxu1 %v3645_v57 }
 0x3b6   :  { %716 = vmatpush1.bf16.msra.mxu1 %v3643_v58  ;;  %v497_v58 = vld [vmem:[#allocation13 + $0x28] sm:$0xff] }
 0x3b7   :  { %717 = vmatprep.subr.bf16.mxu1 %v3648_v59 }
 0x3ba   :  { %718 = vmatpush1.bf16.msra.mxu1 %v3646_v60 }
 0x3bb   :  { %719 = vmatprep.subr.bf16.mxu1 %v3651_v61 }
 0x3be   :  { %720 = vmatpush1.bf16.msra.mxu1 %v3649_v62  ;;  %v496_v62 = vld [vmem:[#allocation13 + $0x20] sm:$0xff] }
 0x3bf   :  { %3463 = vmatprep.subr.bf16.mxu1 %v4077_v0 }
 0x484   :  { %v543_v20 = vpop.f32.mrb[4].mxu1 }
 0x485   :  { %v544_v21 = vadd.f32 %v543_v20, %v488_v19  ;;  %v3443_v22 = vpop.f32.mrb[5].mxu1 }
 0x486   :  { %v546_v23 = vpop.f32.mrb[6].mxu1 }
 0x487   :  { %v549_v24 = vmax.f32 %v544_v21, 0.0  ;;  %v3444_v25 = vpop.f32.mrb[7].mxu1 }
 0x489   :  { %v550_v26 = vsel %vm249_vm2, %v549_v24, 0.0  ;;  %v557_v27 = vmul.f32 %v549_v24, %v549_v24 }
 0x48a   :  { %v551_v28 = vrot.slane %v550_v26, 4 }
 0x48b   :  { %v558_v29 = vsel %vm249_vm2, %v557_v27, 0.0 }
 0x48c   :  { %v552_v30 = vadd.f32 %v551_v28, %v550_v26  ;;  %v559_v32 = vrot.slane %v558_v29, 4 }
 0x48e   :  { %v553_v33 = vrot.slane %v552_v30, 2  ;;  %v560_v34 = vadd.f32 %v559_v32, %v558_v29 }
 0x490   :  { %v554_v35 = vadd.f32 %v553_v33, %v552_v30  ;;  %v561_v36 = vrot.slane %v560_v34, 2  ;;  %v492_v33 = vld [vmem:[#allocation11 + $0x50] sm:$0xff] }
 0x492   :  { %v555_v37 = vrot.slane %v554_v35, 1  ;;  %v562_v38 = vadd.f32 %v561_v36, %v560_v34 }
 0x494   :  { %v556_v39 = vadd.f32 %v555_v37, %v554_v35  ;;  %v563_v40 = vrot.slane %v562_v38, 1  ;;  %v493_v35 = vld [vmem:[#allocation11 + $0x58] sm:$0xff] }
 0x496   :  { %v564_v41 = vadd.f32 %v563_v40, %v562_v38  ;;  %v565_v42 = vmul.f32 0.125, %v556_v39  ;;  %v3652_v39 = vld [vmem:[#allocation5 + $0x10] sm:$0xff]   ;;  %v153_v40 = vand.u32 2147483647, %v4240_v31 }
 0x498   :  { %v566_v43 = vmul.f32 0.125, %v564_v41  ;;  %v567_v44 = vmul.f32 %v565_v42, %v565_v42  ;;  %v569_v47 = vsub.f32 %v549_v24, %v565_v42  ;;  %v154_v41 = vsub.f32 0.0, %v153_v40 }
 0x49a   :  { %v568_v45 = vsub.f32 %v566_v43, %v567_v44  ;;  %v155_v42 = vmul.f32 1.442695, %v154_v41 }
 0x49c   :  { %v570_v46 = vadd.f32 1e-05, %v568_v45 }
 0x49e   :  { %3802 = vrsqrt.f32 %v570_v46 }
 0x4a8   :  { %v3803_v48 = vpop.eup %3802 }
 0x4a9   :  { %v572_v50 = vmul.f32 %v3803_v48, %v569_v47 }
 0x4ab   :  { %v573_v52 = vmul.f32 %v572_v50, %v489_v49  ;;  %v485_v49 = vld [vmem:[#allocation10 + $0x10] sm:$0xff] }
 0x4ad   :  { %v574_v53 = vadd.f32 %v573_v52, %v490_v51 }
 0x4af   :  { %v575_v54 = vpack.c.bf16 %v574_v53, %v574_v53 }
 0x4b1   :  { %3454 = vmatmul.mubr.msk.bf16.vlgmr.msra.gmra.mrb[8].mxu0 %vm249_vm2, %v575_v54 }
 0x4b2   :  { %3459 = vmatprep.mubr.msk.bf16.mxu0 %vm4078_vm0, %v4077_v0  ;;  %3458 = vmatpush3.bf16.msra.mxu0 %v3652_v39 }
 0x584   :  { %v637_v1 = vpop.f32.mrb[8].mxu0 }
 0x585   :  { %v638_v2 = vadd.f32 %v637_v1, %v491_v63  ;;  %v3455_v4 = vpop.f32.mrb[9].mxu0 }
 0x586   :  { %v640_v5 = vpop.f32.mrb[10].mxu0 }
 0x587   :  { %v643_v6 = vmax.f32 %v638_v2, 0.0  ;;  %v3456_v7 = vpop.f32.mrb[11].mxu0  ;;  %v486_v5 = vld [vmem:[#allocation10 + $0x18] sm:$0xff] }
 0x589   :  { %v644_v8 = vsel %vm249_vm2, %v643_v6, 0.0  ;;  %v651_v9 = vmul.f32 %v643_v6, %v643_v6 }
 0x58a   :  { %v645_v10 = vrot.slane %v644_v8, 4 }
 0x58b   :  { %v652_v12 = vsel %vm249_vm2, %v651_v9, 0.0 }
 0x58c   :  { %v646_v13 = vadd.f32 %v645_v10, %v644_v8  ;;  %v653_v14 = vrot.slane %v652_v12, 4  ;;  %v795_v10 = vld [vmem:[#allocation13 + $0x30] sm:$0xff] }
 0x58e   :  { %v647_v15 = vrot.slane %v646_v13, 2  ;;  %v654_v16 = vadd.f32 %v653_v14, %v652_v12 }
 0x590   :  { %v648_v17 = vadd.f32 %v647_v15, %v646_v13  ;;  %v655_v19 = vrot.slane %v654_v16, 2  ;;  %v3654_v15 = vld [vmem:[#allocation7 + $0x48] sm:$0xff]  }
 0x592   :  { %v649_v20 = vrot.slane %v648_v17, 1  ;;  %v656_v21 = vadd.f32 %v655_v19, %v654_v16  ;;  %v3655_v16 = vld [vmem:[#allocation7 + $0x50] sm:$0xff]  }
 0x594   :  { %v650_v22 = vadd.f32 %v649_v20, %v648_v17  ;;  %v657_v23 = vrot.slane %v656_v21, 1  ;;  %v788_v17 = vld [vmem:[#allocation11 + $0x60] sm:$0xff] }
 0x596   :  { %v658_v24 = vadd.f32 %v657_v23, %v656_v21  ;;  %v659_v25 = vmul.f32 0.125, %v650_v22 }
 0x598   :  { %v660_v26 = vmul.f32 0.125, %v658_v24  ;;  %v661_v27 = vmul.f32 %v659_v25, %v659_v25  ;;  %v663_v30 = vsub.f32 %v643_v6, %v659_v25 }
 0x59a   :  { %v662_v28 = vsub.f32 %v660_v26, %v661_v27 }
 0x59c   :  { %v664_v29 = vadd.f32 1e-05, %v662_v28 }
 0x59e   :  { %3804 = vrsqrt.f32 %v664_v29 }
 0x59f   :  { %3806 = vpow2.f32 %v155_v42 }
 0x5a8   :  { %v3805_v32 = vpop.eup %3804 }
 0x5a9   :  { %v666_v34 = vmul.f32 %v3805_v32, %v663_v30  ;;  %v3807_v43 = vpop.eup %3806 }
 0x5aa   :  { %v157_v44 = vadd.f32 1.0, %v3807_v43  ;;  %v160_v45 = vmul.f32 -0.5, %v3807_v43  ;;  %v163_v48 = vand.u32 2147483647, %v3807_v43 }
 0x5ab   :  { %v667_v36 = vmul.f32 %v666_v34, %v492_v33 }
 0x5ac   :  { %3808 = vlog2.f32 %v157_v44  ;;  %v161_v46 = vadd.f32 1.0, %v160_v45  ;;  %vm164_vm3 = vcmp.lt.f32.partialorder %v163_v48, 0.0004427343  ;;  %v789_v48 = vld [vmem:[#allocation11 + $0x68] sm:$0xff] }
 0x5ad   :  { %v668_v37 = vadd.f32 %v667_v36, %v493_v35 }
 0x5ae   :  { %v162_v52 = vmul.f32 %v3807_v43, %v161_v46 }
 0x5af   :  { %v669_v38 = vpack.c.bf16 %v668_v37, %v668_v37 }
 0x5b1   :  { %3222 = vmatmul.mubr.msk.bf16.vlgmr.msra.gmra.mrb[8].mxu1 %vm249_vm2, %v669_v38 }
 0x5b2   :  { %3471 = vmatprep.mubr.msk.bf16.mxu1 %vm4078_vm0, %v4077_v0 }
 0x5b6   :  { %v3809_v47 = vpop.eup %3808 }
 0x5b7   :  { %v159_v51 = vmul.f32 0.6931472, %v3809_v47 }
 0x5b9   :  { %v165_v56 = vsel %vm164_vm3, %v162_v52, %v159_v51 }
 0x5ba   :  { %v166_v57 = vmul.f32 2.0, %v165_v56  ;;  %v3660_v56 = vld [vmem:[#allocation8 + $0x90] ss:$8 sps:$4 sm:$0xff]  }
 0x5bc   :  { %v167_v59 = vadd.f32 %v166_v57, %v153_v40  ;;  %v3665_v57 = vld [vmem:[#allocation8 + $0xa4] ss:$8 sps:$4 sm:$0xff]  }
 0x5be   :  { %v462_v63 = vadd.f32 %v4260_v3, %v167_v59  ;;  %v3653_v3 = vld [vmem:[#allocation7 + $0x40] sm:$0xff]   ;;  %v3668_v59 = vld [vmem:[#allocation8 + $0xb4] ss:$8 sps:$4 sm:$0xff]  }
 0x5bf   :  { %3464 = vmatpush3.bf16.msra.mxu1 %v3653_v3 }
 0x5c0   :  { %3465 = vmatprep.subr.bf16.mxu1 %v4077_v0 }
 0x5c3   :  { %3466 = vmatpush3.bf16.msra.mxu1 %v3654_v15 }
 0x5c4   :  { %3467 = vmatprep.subr.bf16.mxu1 %v4077_v0 }
 0x5c7   :  { %3468 = vmatpush3.bf16.msra.mxu1 %v3655_v16 }
 0x5c8   :  { %3469 = vmatprep.subr.bf16.mxu1 %v4077_v0 }
 0x684   :  { %v747_v50 = vpop.f32.mrb[8].mxu1 }
 0x685   :  { %v748_v53 = vadd.f32 %v747_v50, %v485_v49  ;;  %v749_v54 = vpop.f32.mrb[9].mxu1  ;;  %v790_v50 = vld [vmem:[#allocation11 + $0x70] sm:$0xff] }
 0x686   :  { %v751_v55 = vpop.f32.mrb[10].mxu1  ;;  %v750_v6 = vadd.f32 %v749_v54, %v486_v5  ;;  %v3659_v54 = vld [vmem:[#allocation8 + $0x84] ss:$8 sps:$4 sm:$0xff]  }
 0x687   :  { %3810 = vtanh.f32 %v748_v53  ;;  %v752_v31 = vpop.f32.mrb[11].mxu1  ;;  %v3657_v55 = vld [vmem:[#allocation8 + $0x80] ss:$8 sps:$4 sm:$0xff]   ;;  %1013 = vmatprep.subr.bf16.mxu0 %v3659_v54 }
 0x688   :  { %v757_v8 = vmul.f32 %v750_v6, %v496_v62  ;;  %v3662_v31 = vld [vmem:[#allocation8 + $0x94] ss:$8 sps:$4 sm:$0xff]  }
 0x691   :  { %v3811_v60 = vpop.eup %3810 }
 0x692   :  { %v755_v61 = vmul.f32 %v3811_v60, %v497_v58  ;;  %v3663_v58 = vld [vmem:[#allocation8 + $0xa0] ss:$8 sps:$4 sm:$0xff]   ;;  %v3666_v60 = vld [vmem:[#allocation8 + $0xb0] ss:$8 sps:$4 sm:$0xff]  }
 0x694   :  { %v756_v1 = vmul.f32 %v755_v61, %v496_v62  ;;  %v791_v61 = vld [vmem:[#allocation11 + $0x78] sm:$0xff] }
 0x696   :  { %v758_v2 = vmul.f32 1.442695, %v756_v1  ;;  %v4286_v4 = vadd.f32 %v756_v1, %v462_v63 }
 0x698   :  { %3812 = vpow2.f32 %v758_v2 }
 0x6a2   :  { %v3813_v7 = vpop.eup %3812 }
 0x6a3   :  { %v760_v9 = vmul.f32 %v3813_v7, %v4264_v11  ;;  %v3656_v11 = vld [vmem:[#allocation7 + $0x58] sm:$0xff]  }
 0x6a4   :  { %3470 = vmatpush3.bf16.msra.mxu1 %v3656_v11 }
 0x6a5   :  { %v4289_v12 = vadd.f32 %v760_v9, %v757_v8  ;;  %3475 = vmatprep.subr.bf16.mxu1 %v4077_v0 }
 0x6a7   :  { %v798_v13 = vmul.f32 %v795_v10, %v4289_v12 }
 0x6a9   :  { %v799_v14 = vpack.c.bf16 %v798_v13, %v798_v13 }
 0x6ab   :  { %3460 = vmatmul.mubr.msk.bf16.vlgmr.msra.gmra.mrb[12].mxu0 %vm124_vm1, %v799_v14 }
 0x6ac   :  { %1045 = vmatprep.mubr.bf16.mxu0 %v4079_v18  ;;  %1014 = vmatpush1.bf16.msra.mxu0 %v3657_v55 }
 0x6ad   :  { %1015 = vmatprep.subr.bf16.mxu0 %v3662_v31  ;;  %v1095_v31 = vld [vmem:[#allocation13 + $0x48] sm:$0xff] }
 0x6b0   :  { %1016 = vmatpush1.bf16.msra.mxu0 %v3660_v56 }
 0x6b1   :  { %1017 = vmatprep.subr.bf16.mxu0 %v3665_v57 }
 0x6b4   :  { %1018 = vmatpush1.bf16.msra.mxu0 %v3663_v58 }
 0x6b5   :  { %1019 = vmatprep.subr.bf16.mxu0 %v3668_v59  ;;  %v3670_v59 = vld [vmem:[#allocation7 + $0x60] sm:$0xff]  }
 0x6b8   :  { %1020 = vmatpush1.bf16.msra.mxu0 %v3666_v60  ;;  %v3672_v60 = vld [vmem:[#allocation7 + $0x70] sm:$0xff]  }
 0x6b9   :  { %3481 = vmatprep.subr.bf16.mxu0 %v4077_v0 }
 0x77e   :  { %v843_v19 = vpop.f32.mrb[12].mxu0 }
 0x77f   :  { %v844_v20 = vadd.f32 %v843_v19, %v788_v17  ;;  %v3461_v21 = vpop.f32.mrb[13].mxu0 }
 0x780   :  { %v846_v22 = vpop.f32.mrb[14].mxu0 }
 0x781   :  { %v849_v23 = vmax.f32 %v844_v20, 0.0  ;;  %v3462_v24 = vpop.f32.mrb[15].mxu0 }
 0x783   :  { %v850_v25 = vsel %vm249_vm2, %v849_v23, 0.0  ;;  %v857_v26 = vmul.f32 %v849_v23, %v849_v23 }
 0x784   :  { %v851_v27 = vrot.slane %v850_v25, 4 }
 0x785   :  { %v858_v28 = vsel %vm249_vm2, %v857_v26, 0.0 }
 0x786   :  { %v852_v29 = vadd.f32 %v851_v27, %v850_v25  ;;  %v859_v30 = vrot.slane %v858_v28, 4 }
 0x788   :  { %v853_v32 = vrot.slane %v852_v29, 2  ;;  %v860_v33 = vadd.f32 %v859_v30, %v858_v28  ;;  %v792_v30 = vld [vmem:[#allocation11 + $0x80] sm:$0xff] }
 0x78a   :  { %v854_v34 = vadd.f32 %v853_v32, %v852_v29  ;;  %v861_v35 = vrot.slane %v860_v33, 2 }
 0x78c   :  { %v855_v36 = vrot.slane %v854_v34, 1  ;;  %v862_v37 = vadd.f32 %v861_v35, %v860_v33  ;;  %v793_v33 = vld [vmem:[#allocation11 + $0x88] sm:$0xff] }
 0x78e   :  { %v856_v38 = vadd.f32 %v855_v36, %v854_v34  ;;  %v863_v39 = vrot.slane %v862_v37, 1 }
 0x790   :  { %v864_v40 = vadd.f32 %v863_v39, %v862_v37  ;;  %v865_v41 = vmul.f32 0.125, %v856_v38  ;;  %v3669_v37 = vld [vmem:[#allocation5 + $0x18] sm:$0xff]   ;;  %v785_v38 = vld [vmem:[#allocation10 + $0x20] sm:$0xff] }
 0x792   :  { %v866_v42 = vmul.f32 0.125, %v864_v40  ;;  %v867_v43 = vmul.f32 %v865_v41, %v865_v41  ;;  %v869_v46 = vsub.f32 %v849_v23, %v865_v41 }
 0x794   :  { %v868_v44 = vsub.f32 %v866_v42, %v867_v43 }
 0x796   :  { %v870_v45 = vadd.f32 1e-05, %v868_v44  ;;  %v797_v44 = vld [vmem:[#allocation13 + $0x40] sm:$0xff] }
 0x798   :  { %3814 = vrsqrt.f32 %v870_v45 }
 0x7a2   :  { %v3815_v47 = vpop.eup %3814 }
 0x7a3   :  { %v872_v49 = vmul.f32 %v3815_v47, %v869_v46  ;;  %v796_v47 = vld [vmem:[#allocation13 + $0x38] sm:$0xff] }
 0x7a5   :  { %v873_v51 = vmul.f32 %v872_v49, %v789_v48 }
 0x7a7   :  { %v874_v52 = vadd.f32 %v873_v51, %v790_v50  ;;  %v786_v51 = vld [vmem:[#allocation10 + $0x28] sm:$0xff] }
 0x7a9   :  { %v875_v53 = vpack.c.bf16 %v874_v52, %v874_v52 }
 0x7ab   :  { %3472 = vmatmul.mubr.msk.bf16.vlgmr.msra.gmra.mrb[12].mxu1 %vm249_vm2, %v875_v53 }
 0x7ac   :  { %3477 = vmatprep.mubr.msk.bf16.mxu1 %vm4078_vm0, %v4077_v0  ;;  %3476 = vmatpush3.bf16.msra.mxu1 %v3669_v37  ;;  %v3676_v37 = vld [vmem:[#allocation8 + $0xc4] ss:$8 sps:$4 sm:$0xff]  }
 0x7ad   :  { %1313 = vmatprep.subr.bf16.mxu1 %v3676_v37 }
 0x87e   :  { %v937_v62 = vpop.f32.mrb[12].mxu1 }
 0x87f   :  { %v938_v63 = vadd.f32 %v937_v62, %v791_v61  ;;  %v3473_v1 = vpop.f32.mrb[13].mxu1  ;;  %v1088_v61 = vld [vmem:[#allocation11 + $0x90] sm:$0xff] }
 0x880   :  { %v940_v2 = vpop.f32.mrb[14].mxu1 }
 0x881   :  { %v943_v5 = vmax.f32 %v938_v63, 0.0  ;;  %v3474_v6 = vpop.f32.mrb[15].mxu1 }
 0x883   :  { %v944_v7 = vsel %vm249_vm2, %v943_v5, 0.0  ;;  %v951_v8 = vmul.f32 %v943_v5, %v943_v5 }
 0x884   :  { %v945_v9 = vrot.slane %v944_v7, 4 }
 0x885   :  { %v952_v10 = vsel %vm249_vm2, %v951_v8, 0.0 }
 0x886   :  { %v946_v13 = vadd.f32 %v945_v9, %v944_v7  ;;  %v953_v14 = vrot.slane %v952_v10, 4 }
 0x888   :  { %v947_v3 = vrot.slane %v946_v13, 2  ;;  %v954_v15 = vadd.f32 %v953_v14, %v952_v10 }
 0x88a   :  { %v948_v16 = vadd.f32 %v947_v3, %v946_v13  ;;  %v955_v11 = vrot.slane %v954_v15, 2 }
 0x88c   :  { %v949_v17 = vrot.slane %v948_v16, 1  ;;  %v956_v19 = vadd.f32 %v955_v11, %v954_v15 }
 0x88e   :  { %v950_v20 = vadd.f32 %v949_v17, %v948_v16  ;;  %v957_v21 = vrot.slane %v956_v19, 1 }
 0x890   :  { %v958_v22 = vadd.f32 %v957_v21, %v956_v19  ;;  %v959_v23 = vmul.f32 0.125, %v950_v20 }
 0x892   :  { %v960_v24 = vmul.f32 0.125, %v958_v22  ;;  %v961_v25 = vmul.f32 %v959_v23, %v959_v23  ;;  %v963_v28 = vsub.f32 %v943_v5, %v959_v23 }
 0x894   :  { %v962_v26 = vsub.f32 %v960_v24, %v961_v25 }
 0x896   :  { %v964_v27 = vadd.f32 1e-05, %v962_v26 }
 0x898   :  { %3816 = vrsqrt.f32 %v964_v27 }
 0x8a2   :  { %v3817_v29 = vpop.eup %3816 }
 0x8a3   :  { %v966_v32 = vmul.f32 %v3817_v29, %v963_v28 }
 0x8a5   :  { %v967_v34 = vmul.f32 %v966_v32, %v792_v30  ;;  %v1089_v30 = vld [vmem:[#allocation11 + $0x98] sm:$0xff] }
 0x8a7   :  { %v968_v35 = vadd.f32 %v967_v34, %v793_v33  ;;  %v1090_v33 = vld [vmem:[#allocation11 + $0xa0] sm:$0xff] }
 0x8a9   :  { %v969_v36 = vpack.c.bf16 %v968_v35, %v968_v35 }
 0x8ab   :  { %3238 = vmatmul.mubr.msk.bf16.vlgmr.msra.gmra.mrb[16].mxu0 %vm249_vm2, %v969_v36 }
 0x8ac   :  { %3489 = vmatprep.mubr.msk.bf16.mxu0 %vm4078_vm0, %v4077_v0  ;;  %3482 = vmatpush3.bf16.msra.mxu0 %v3670_v59 }
 0x8ad   :  { %3483 = vmatprep.subr.bf16.mxu0 %v4077_v0 }
 0x97e   :  { %v1047_v39 = vpop.f32.mrb[16].mxu0 }
 0x97f   :  { %v1048_v40 = vadd.f32 %v1047_v39, %v785_v38  ;;  %v1049_v41 = vpop.f32.mrb[17].mxu0  ;;  %v3674_v38 = vld [vmem:[#allocation8 + $0xc0] ss:$8 sps:$4 sm:$0xff]   ;;  %v3679_v39 = vld [vmem:[#allocation8 + $0xd4] ss:$8 sps:$4 sm:$0xff]  }
 0x980   :  { %v1051_v42 = vpop.f32.mrb[18].mxu0  ;;  %v1050_v52 = vadd.f32 %v1049_v41, %v786_v51  ;;  %v3682_v41 = vld [vmem:[#allocation8 + $0xe4] ss:$8 sps:$4 sm:$0xff]  }
 0x981   :  { %3818 = vtanh.f32 %v1048_v40  ;;  %v1052_v43 = vpop.f32.mrb[19].mxu0  ;;  %v3677_v40 = vld [vmem:[#allocation8 + $0xd0] ss:$8 sps:$4 sm:$0xff]   ;;  %v3680_v42 = vld [vmem:[#allocation8 + $0xe0] ss:$8 sps:$4 sm:$0xff]  }
 0x982   :  { %v1057_v54 = vmul.f32 %v1050_v52, %v796_v47  ;;  %v3685_v43 = vld [vmem:[#allocation8 + $0xf4] ss:$8 sps:$4 sm:$0xff]  }
 0x98b   :  { %v3819_v45 = vpop.eup %3818 }
 0x98c   :  { %v1055_v46 = vmul.f32 %v3819_v45, %v797_v44  ;;  %v3683_v44 = vld [vmem:[#allocation8 + $0xf0] ss:$8 sps:$4 sm:$0xff]   ;;  %v1091_v45 = vld [vmem:[#allocation11 + $0xa8] sm:$0xff] }
 0x98e   :  { %v1056_v48 = vmul.f32 %v1055_v46, %v796_v47 }
 0x990   :  { %v1058_v49 = vmul.f32 1.442695, %v1056_v48  ;;  %v4310_v50 = vadd.f32 %v1056_v48, %v4286_v4  ;;  %v3671_v4 = vld [vmem:[#allocation7 + $0x68] sm:$0xff]  }
 0x991   :  { %3484 = vmatpush3.bf16.msra.mxu0 %v3671_v4 }
 0x992   :  { %3820 = vpow2.f32 %v1058_v49  ;;  %3485 = vmatprep.subr.bf16.mxu0 %v4077_v0 }
 0x995   :  { %3486 = vmatpush3.bf16.msra.mxu0 %v3672_v60 }
 0x996   :  { %3487 = vmatprep.subr.bf16.mxu0 %v4077_v0 }
 0x99c   :  { %v3821_v53 = vpop.eup %3820 }
 0x99d   :  { %v1060_v55 = vmul.f32 %v3821_v53, %v4289_v12  ;;  %v3673_v12 = vld [vmem:[#allocation7 + $0x78] sm:$0xff]  }
 0x99e   :  { %3488 = vmatpush3.bf16.msra.mxu0 %v3673_v12 }
 0x99f   :  { %v4313_v56 = vadd.f32 %v1060_v55, %v1057_v54  ;;  %3493 = vmatprep.subr.bf16.mxu0 %v4077_v0 }
 0x9a1   :  { %v1098_v57 = vmul.f32 %v1095_v31, %v4313_v56 }
 0x9a3   :  { %v1099_v58 = vpack.c.bf16 %v1098_v57, %v1098_v57 }
 0x9a5   :  { %3478 = vmatmul.mubr.msk.bf16.vlgmr.msra.gmra.mrb[16].mxu1 %vm124_vm1, %v1099_v58 }
 0x9a6   :  { %1345 = vmatprep.mubr.bf16.mxu1 %v4079_v18  ;;  %1314 = vmatpush1.bf16.msra.mxu1 %v3674_v38 }
 0x9a7   :  { %1315 = vmatprep.subr.bf16.mxu1 %v3679_v39  ;;  %v1395_v39 = vld [vmem:[#allocation13 + $0x60] sm:$0xff] }
 0x9aa   :  { %1316 = vmatpush1.bf16.msra.mxu1 %v3677_v40 }
 0x9ab   :  { %1317 = vmatprep.subr.bf16.mxu1 %v3682_v41 }
 0x9ae   :  { %1318 = vmatpush1.bf16.msra.mxu1 %v3680_v42 }
 0x9af   :  { %1319 = vmatprep.subr.bf16.mxu1 %v3685_v43  ;;  %v3687_v43 = vld [vmem:[#allocation7 + $0x80] sm:$0xff]  }
 0x9b2   :  { %1320 = vmatpush1.bf16.msra.mxu1 %v3683_v44  ;;  %v3689_v44 = vld [vmem:[#allocation7 + $0x90] sm:$0xff]  }
 0x9b3   :  { %3499 = vmatprep.subr.bf16.mxu1 %v4077_v0 }
 0xa78   :  { %v1143_v62 = vpop.f32.mrb[16].mxu1 }
 0xa79   :  { %v1144_v63 = vadd.f32 %v1143_v62, %v1088_v61  ;;  %v3479_v1 = vpop.f32.mrb[17].mxu1 }
 0xa7a   :  { %v1146_v2 = vpop.f32.mrb[18].mxu1 }
 0xa7b   :  { %v1149_v5 = vmax.f32 %v1144_v63, 0.0  ;;  %v3480_v6 = vpop.f32.mrb[19].mxu1 }
 0xa7d   :  { %v1150_v7 = vsel %vm249_vm2, %v1149_v5, 0.0  ;;  %v1157_v8 = vmul.f32 %v1149_v5, %v1149_v5 }
 0xa7e   :  { %v1151_v9 = vrot.slane %v1150_v7, 4 }
 0xa7f   :  { %v1158_v10 = vsel %vm249_vm2, %v1157_v8, 0.0 }
 0xa80   :  { %v1152_v13 = vadd.f32 %v1151_v9, %v1150_v7  ;;  %v1159_v14 = vrot.slane %v1158_v10, 4 }
 0xa82   :  { %v1153_v3 = vrot.slane %v1152_v13, 2  ;;  %v1160_v15 = vadd.f32 %v1159_v14, %v1158_v10  ;;  %v1092_v14 = vld [vmem:[#allocation11 + $0xb0] sm:$0xff] }
 0xa84   :  { %v1154_v16 = vadd.f32 %v1153_v3, %v1152_v13  ;;  %v1161_v11 = vrot.slane %v1160_v15, 2 }
 0xa86   :  { %v1155_v17 = vrot.slane %v1154_v16, 1  ;;  %v1162_v19 = vadd.f32 %v1161_v11, %v1160_v15  ;;  %v1093_v15 = vld [vmem:[#allocation11 + $0xb8] sm:$0xff] }
 0xa88   :  { %v1156_v20 = vadd.f32 %v1155_v17, %v1154_v16  ;;  %v1163_v21 = vrot.slane %v1162_v19, 1 }
 0xa8a   :  { %v1164_v22 = vadd.f32 %v1163_v21, %v1162_v19  ;;  %v1165_v23 = vmul.f32 0.125, %v1156_v20  ;;  %v3686_v19 = vld [vmem:[#allocation5 + $0x20] sm:$0xff]  }
 0xa8b   :  { %v1085_v20 = vld [vmem:[#allocation10 + $0x30] sm:$0xff] }
 0xa8c   :  { %v1166_v24 = vmul.f32 0.125, %v1164_v22  ;;  %v1167_v25 = vmul.f32 %v1165_v23, %v1165_v23  ;;  %v1169_v28 = vsub.f32 %v1149_v5, %v1165_v23 }
 0xa8e   :  { %v1168_v26 = vsub.f32 %v1166_v24, %v1167_v25 }
 0xa90   :  { %v1170_v27 = vadd.f32 1e-05, %v1168_v26  ;;  %v1097_v26 = vld [vmem:[#allocation13 + $0x58] sm:$0xff] }
 0xa92   :  { %3822 = vrsqrt.f32 %v1170_v27 }
 0xa9c   :  { %v3823_v29 = vpop.eup %3822 }
 0xa9d   :  { %v1172_v32 = vmul.f32 %v3823_v29, %v1169_v28  ;;  %v1096_v29 = vld [vmem:[#allocation13 + $0x50] sm:$0xff] }
 0xa9f   :  { %v1173_v34 = vmul.f32 %v1172_v32, %v1089_v30 }
 0xaa1   :  { %v1174_v35 = vadd.f32 %v1173_v34, %v1090_v33  ;;  %v1086_v34 = vld [vmem:[#allocation10 + $0x38] sm:$0xff] }
 0xaa3   :  { %v1175_v36 = vpack.c.bf16 %v1174_v35, %v1174_v35 }
 0xaa5   :  { %3490 = vmatmul.mubr.msk.bf16.vlgmr.msra.gmra.mrb[20].mxu0 %vm249_vm2, %v1175_v36 }
 0xaa6   :  { %3495 = vmatprep.mubr.msk.bf16.mxu0 %vm4078_vm0, %v4077_v0  ;;  %3494 = vmatpush3.bf16.msra.mxu0 %v3686_v19  ;;  %v3693_v19 = vld [vmem:[#allocation8 + $0x104] ss:$8 sps:$4 sm:$0xff]  }
 0xaa7   :  { %1613 = vmatprep.subr.bf16.mxu0 %v3693_v19 }
 0xb78   :  { %v1237_v46 = vpop.f32.mrb[20].mxu0 }
 0xb79   :  { %v1238_v47 = vadd.f32 %v1237_v46, %v1091_v45  ;;  %v3491_v48 = vpop.f32.mrb[21].mxu0  ;;  %v1388_v45 = vld [vmem:[#allocation11 + $0xc0] sm:$0xff] }
 0xb7a   :  { %v1240_v49 = vpop.f32.mrb[22].mxu0 }
 0xb7b   :  { %v1243_v51 = vmax.f32 %v1238_v47, 0.0  ;;  %v3492_v52 = vpop.f32.mrb[23].mxu0 }
 0xb7d   :  { %v1244_v53 = vsel %vm249_vm2, %v1243_v51, 0.0  ;;  %v1251_v54 = vmul.f32 %v1243_v51, %v1243_v51 }
 0xb7e   :  { %v1245_v55 = vrot.slane %v1244_v53, 4 }
 0xb7f   :  { %v1252_v31 = vsel %vm249_vm2, %v1251_v54, 0.0 }
 0xb80   :  { %v1246_v57 = vadd.f32 %v1245_v55, %v1244_v53  ;;  %v1253_v58 = vrot.slane %v1252_v31, 4 }
 0xb82   :  { %v1247_v59 = vrot.slane %v1246_v57, 2  ;;  %v1254_v4 = vadd.f32 %v1253_v58, %v1252_v31 }
 0xb84   :  { %v1248_v60 = vadd.f32 %v1247_v59, %v1246_v57  ;;  %v1255_v12 = vrot.slane %v1254_v4, 2 }
 0xb86   :  { %v1249_v61 = vrot.slane %v1248_v60, 1  ;;  %v1256_v62 = vadd.f32 %v1255_v12, %v1254_v4 }
 0xb88   :  { %v1250_v63 = vadd.f32 %v1249_v61, %v1248_v60  ;;  %v1257_v1 = vrot.slane %v1256_v62, 1 }
 0xb8a   :  { %v1258_v2 = vadd.f32 %v1257_v1, %v1256_v62  ;;  %v1259_v5 = vmul.f32 0.125, %v1250_v63 }
 0xb8c   :  { %v1260_v6 = vmul.f32 0.125, %v1258_v2  ;;  %v1261_v7 = vmul.f32 %v1259_v5, %v1259_v5  ;;  %v1263_v10 = vsub.f32 %v1243_v51, %v1259_v5 }
 0xb8e   :  { %v1262_v8 = vsub.f32 %v1260_v6, %v1261_v7 }
 0xb90   :  { %v1264_v9 = vadd.f32 1e-05, %v1262_v8 }
 0xb92   :  { %3824 = vrsqrt.f32 %v1264_v9 }
 0xb9c   :  { %v3825_v13 = vpop.eup %3824 }
 0xb9d   :  { %v1266_v3 = vmul.f32 %v3825_v13, %v1263_v10 }
 0xb9f   :  { %v1267_v16 = vmul.f32 %v1266_v3, %v1092_v14  ;;  %v1389_v14 = vld [vmem:[#allocation11 + $0xc8] sm:$0xff] }
 0xba1   :  { %v1268_v11 = vadd.f32 %v1267_v16, %v1093_v15  ;;  %v1390_v15 = vld [vmem:[#allocation11 + $0xd0] sm:$0xff] }
 0xba3   :  { %v1269_v17 = vpack.c.bf16 %v1268_v11, %v1268_v11 }
 0xba5   :  { %3254 = vmatmul.mubr.msk.bf16.vlgmr.msra.gmra.mrb[20].mxu1 %vm249_vm2, %v1269_v17 }
 0xba6   :  { %3507 = vmatprep.mubr.msk.bf16.mxu1 %vm4078_vm0, %v4077_v0  ;;  %3500 = vmatpush3.bf16.msra.mxu1 %v3687_v43 }
 0xba7   :  { %3501 = vmatprep.subr.bf16.mxu1 %v4077_v0 }
 0xc78   :  { %v1347_v21 = vpop.f32.mrb[20].mxu1 }
 0xc79   :  { %v1348_v22 = vadd.f32 %v1347_v21, %v1085_v20  ;;  %v1349_v23 = vpop.f32.mrb[21].mxu1  ;;  %v3691_v20 = vld [vmem:[#allocation8 + $0x100] ss:$8 sps:$4 sm:$0xff]   ;;  %v3696_v21 = vld [vmem:[#allocation8 + $0x114] ss:$8 sps:$4 sm:$0xff]  }
 0xc7a   :  { %v1351_v24 = vpop.f32.mrb[22].mxu1  ;;  %v1350_v35 = vadd.f32 %v1349_v23, %v1086_v34  ;;  %v3699_v23 = vld [vmem:[#allocation8 + $0x124] ss:$8 sps:$4 sm:$0xff]  }
 0xc7b   :  { %3826 = vtanh.f32 %v1348_v22  ;;  %v1352_v25 = vpop.f32.mrb[23].mxu1  ;;  %v3694_v22 = vld [vmem:[#allocation8 + $0x110] ss:$8 sps:$4 sm:$0xff]   ;;  %v3697_v24 = vld [vmem:[#allocation8 + $0x120] ss:$8 sps:$4 sm:$0xff]  }
 0xc7c   :  { %v1357_v37 = vmul.f32 %v1350_v35, %v1096_v29  ;;  %v3702_v25 = vld [vmem:[#allocation8 + $0x134] ss:$8 sps:$4 sm:$0xff]  }
 0xc85   :  { %v3827_v27 = vpop.eup %3826 }
 0xc86   :  { %v1355_v28 = vmul.f32 %v3827_v27, %v1097_v26  ;;  %v3700_v26 = vld [vmem:[#allocation8 + $0x130] ss:$8 sps:$4 sm:$0xff]  }
 0xc87   :  { %v1391_v27 = vld [vmem:[#allocation11 + $0xd8] sm:$0xff] }
 0xc88   :  { %v1356_v30 = vmul.f32 %v1355_v28, %v1096_v29 }
 0xc8a   :  { %v1358_v32 = vmul.f32 1.442695, %v1356_v30  ;;  %v4334_v33 = vadd.f32 %v1356_v30, %v4310_v50  ;;  %v3688_v50 = vld [vmem:[#allocation7 + $0x88] sm:$0xff]  }
 0xc8b   :  { %3502 = vmatpush3.bf16.msra.mxu1 %v3688_v50 }
 0xc8c   :  { %3828 = vpow2.f32 %v1358_v32  ;;  %3503 = vmatprep.subr.bf16.mxu1 %v4077_v0 }
 0xc8f   :  { %3504 = vmatpush3.bf16.msra.mxu1 %v3689_v44 }
 0xc90   :  { %3505 = vmatprep.subr.bf16.mxu1 %v4077_v0 }
 0xc96   :  { %v3829_v36 = vpop.eup %3828 }
 0xc97   :  { %v1360_v38 = vmul.f32 %v3829_v36, %v4313_v56  ;;  %v3690_v56 = vld [vmem:[#allocation7 + $0x98] sm:$0xff]  }
 0xc98   :  { %3506 = vmatpush3.bf16.msra.mxu1 %v3690_v56 }
 0xc99   :  { %v4337_v40 = vadd.f32 %v1360_v38, %v1357_v37  ;;  %3511 = vmatprep.subr.bf16.mxu1 %v4077_v0 }
 0xc9b   :  { %v1398_v41 = vmul.f32 %v1395_v39, %v4337_v40 }
 0xc9d   :  { %v1399_v42 = vpack.c.bf16 %v1398_v41, %v1398_v41 }
 0xc9f   :  { %3496 = vmatmul.mubr.msk.bf16.vlgmr.msra.gmra.mrb[24].mxu0 %vm124_vm1, %v1399_v42 }
 0xca0   :  { %1645 = vmatprep.mubr.bf16.mxu0 %v4079_v18  ;;  %1614 = vmatpush1.bf16.msra.mxu0 %v3691_v20 }
 0xca1   :  { %1615 = vmatprep.subr.bf16.mxu0 %v3696_v21  ;;  %v1695_v21 = vld [vmem:[#allocation13 + $0x78] sm:$0xff] }
 0xca4   :  { %1616 = vmatpush1.bf16.msra.mxu0 %v3694_v22 }
 0xca5   :  { %1617 = vmatprep.subr.bf16.mxu0 %v3699_v23 }
 0xca8   :  { %1618 = vmatpush1.bf16.msra.mxu0 %v3697_v24 }
 0xca9   :  { %1619 = vmatprep.subr.bf16.mxu0 %v3702_v25  ;;  %v3704_v25 = vld [vmem:[#allocation7 + $0xa0] sm:$0xff]  }
 0xcac   :  { %1620 = vmatpush1.bf16.msra.mxu0 %v3700_v26  ;;  %v3706_v26 = vld [vmem:[#allocation7 + $0xb0] sm:$0xff]  }
 0xcad   :  { %3517 = vmatprep.subr.bf16.mxu0 %v4077_v0 }
 0xd72   :  { %v1443_v46 = vpop.f32.mrb[24].mxu0 }
 0xd73   :  { %v1444_v47 = vadd.f32 %v1443_v46, %v1388_v45  ;;  %v3497_v48 = vpop.f32.mrb[25].mxu0 }
 0xd74   :  { %v1446_v49 = vpop.f32.mrb[26].mxu0 }
 0xd75   :  { %v1449_v51 = vmax.f32 %v1444_v47, 0.0  ;;  %v3498_v52 = vpop.f32.mrb[27].mxu0 }
 0xd77   :  { %v1450_v53 = vsel %vm249_vm2, %v1449_v51, 0.0  ;;  %v1457_v54 = vmul.f32 %v1449_v51, %v1449_v51 }
 0xd78   :  { %v1451_v55 = vrot.slane %v1450_v53, 4 }
 0xd79   :  { %v1458_v31 = vsel %vm249_vm2, %v1457_v54, 0.0 }
 0xd7a   :  { %v1452_v57 = vadd.f32 %v1451_v55, %v1450_v53  ;;  %v1459_v58 = vrot.slane %v1458_v31, 4 }
 0xd7c   :  { %v1453_v59 = vrot.slane %v1452_v57, 2  ;;  %v1460_v4 = vadd.f32 %v1459_v58, %v1458_v31  ;;  %v1392_v58 = vld [vmem:[#allocation11 + $0xe0] sm:$0xff] }
 0xd7e   :  { %v1454_v60 = vadd.f32 %v1453_v59, %v1452_v57  ;;  %v1461_v12 = vrot.slane %v1460_v4, 2 }
 0xd80   :  { %v1455_v61 = vrot.slane %v1454_v60, 1  ;;  %v1462_v62 = vadd.f32 %v1461_v12, %v1460_v4  ;;  %v1393_v4 = vld [vmem:[#allocation11 + $0xe8] sm:$0xff] }
 0xd82   :  { %v1456_v63 = vadd.f32 %v1455_v61, %v1454_v60  ;;  %v1463_v1 = vrot.slane %v1462_v62, 1 }
 0xd84   :  { %v1464_v2 = vadd.f32 %v1463_v1, %v1462_v62  ;;  %v1465_v5 = vmul.f32 0.125, %v1456_v63  ;;  %v3703_v62 = vld [vmem:[#allocation5 + $0x28] sm:$0xff]   ;;  %v1385_v63 = vld [vmem:[#allocation10 + $0x40] sm:$0xff] }
 0xd86   :  { %v1466_v6 = vmul.f32 0.125, %v1464_v2  ;;  %v1467_v7 = vmul.f32 %v1465_v5, %v1465_v5  ;;  %v1469_v10 = vsub.f32 %v1449_v51, %v1465_v5 }
 0xd88   :  { %v1468_v8 = vsub.f32 %v1466_v6, %v1467_v7 }
 0xd8a   :  { %v1470_v9 = vadd.f32 1e-05, %v1468_v8  ;;  %v1397_v8 = vld [vmem:[#allocation13 + $0x70] sm:$0xff] }
 0xd8c   :  { %3830 = vrsqrt.f32 %v1470_v9 }
 0xd96   :  { %v3831_v13 = vpop.eup %3830 }
 0xd97   :  { %v1472_v3 = vmul.f32 %v3831_v13, %v1469_v10  ;;  %v1396_v13 = vld [vmem:[#allocation13 + $0x68] sm:$0xff] }
 0xd99   :  { %v1473_v16 = vmul.f32 %v1472_v3, %v1389_v14 }
 0xd9b   :  { %v1474_v11 = vadd.f32 %v1473_v16, %v1390_v15  ;;  %v1386_v16 = vld [vmem:[#allocation10 + $0x48] sm:$0xff] }
 0xd9d   :  { %v1475_v17 = vpack.c.bf16 %v1474_v11, %v1474_v11 }
 0xd9f   :  { %3508 = vmatmul.mubr.msk.bf16.vlgmr.msra.gmra.mrb[24].mxu1 %vm249_vm2, %v1475_v17 }
 0xda0   :  { %3513 = vmatprep.mubr.msk.bf16.mxu1 %vm4078_vm0, %v4077_v0  ;;  %3512 = vmatpush3.bf16.msra.mxu1 %v3703_v62  ;;  %v3710_v62 = vld [vmem:[#allocation8 + $0x144] ss:$8 sps:$4 sm:$0xff]  }
 0xda1   :  { %1913 = vmatprep.subr.bf16.mxu1 %v3710_v62 }
 0xe72   :  { %v1537_v28 = vpop.f32.mrb[24].mxu1 }
 0xe73   :  { %v1538_v29 = vadd.f32 %v1537_v28, %v1391_v27  ;;  %v3509_v30 = vpop.f32.mrb[25].mxu1  ;;  %v1688_v27 = vld [vmem:[#allocation11 + $0xf0] sm:$0xff] }
 0xe74   :  { %v1540_v32 = vpop.f32.mrb[26].mxu1 }
 0xe75   :  { %v1543_v34 = vmax.f32 %v1538_v29, 0.0  ;;  %v3510_v35 = vpop.f32.mrb[27].mxu1 }
 0xe77   :  { %v1544_v36 = vsel %vm249_vm2, %v1543_v34, 0.0  ;;  %v1551_v37 = vmul.f32 %v1543_v34, %v1543_v34 }
 0xe78   :  { %v1545_v38 = vrot.slane %v1544_v36, 4 }
 0xe79   :  { %v1552_v39 = vsel %vm249_vm2, %v1551_v37, 0.0 }
 0xe7a   :  { %v1546_v41 = vadd.f32 %v1545_v38, %v1544_v36  ;;  %v1553_v42 = vrot.slane %v1552_v39, 4 }
 0xe7c   :  { %v1547_v43 = vrot.slane %v1546_v41, 2  ;;  %v1554_v50 = vadd.f32 %v1553_v42, %v1552_v39 }
 0xe7e   :  { %v1548_v44 = vadd.f32 %v1547_v43, %v1546_v41  ;;  %v1555_v56 = vrot.slane %v1554_v50, 2 }
 0xe80   :  { %v1549_v45 = vrot.slane %v1548_v44, 1  ;;  %v1556_v46 = vadd.f32 %v1555_v56, %v1554_v50 }
 0xe82   :  { %v1550_v47 = vadd.f32 %v1549_v45, %v1548_v44  ;;  %v1557_v48 = vrot.slane %v1556_v46, 1 }
 0xe84   :  { %v1558_v49 = vadd.f32 %v1557_v48, %v1556_v46  ;;  %v1559_v51 = vmul.f32 0.125, %v1550_v47 }
 0xe86   :  { %v1560_v52 = vmul.f32 0.125, %v1558_v49  ;;  %v1561_v53 = vmul.f32 %v1559_v51, %v1559_v51  ;;  %v1563_v31 = vsub.f32 %v1543_v34, %v1559_v51 }
 0xe88   :  { %v1562_v54 = vsub.f32 %v1560_v52, %v1561_v53 }
 0xe8a   :  { %v1564_v55 = vadd.f32 1e-05, %v1562_v54 }
 0xe8c   :  { %3832 = vrsqrt.f32 %v1564_v55 }
 0xe96   :  { %v3833_v57 = vpop.eup %3832 }
 0xe97   :  { %v1566_v59 = vmul.f32 %v3833_v57, %v1563_v31 }
 0xe99   :  { %v1567_v60 = vmul.f32 %v1566_v59, %v1392_v58  ;;  %v1689_v58 = vld [vmem:[#allocation11 + $0xf8] sm:$0xff] }
 0xe9b   :  { %v1568_v12 = vadd.f32 %v1567_v60, %v1393_v4  ;;  %v1690_v4 = vld [vmem:[#allocation11 + $0x100] sm:$0xff] }
 0xe9d   :  { %v1569_v61 = vpack.c.bf16 %v1568_v12, %v1568_v12 }
 0xe9f   :  { %3270 = vmatmul.mubr.msk.bf16.vlgmr.msra.gmra.mrb[28].mxu0 %vm249_vm2, %v1569_v61 }
 0xea0   :  { %3525 = vmatprep.mubr.msk.bf16.mxu0 %vm4078_vm0, %v4077_v0  ;;  %3518 = vmatpush3.bf16.msra.mxu0 %v3704_v25 }
 0xea1   :  { %3519 = vmatprep.subr.bf16.mxu0 %v4077_v0 }
 0xf72   :  { %v1647_v1 = vpop.f32.mrb[28].mxu0 }
 0xf73   :  { %v1648_v2 = vadd.f32 %v1647_v1, %v1385_v63  ;;  %v1649_v5 = vpop.f32.mrb[29].mxu0  ;;  %v3708_v63 = vld [vmem:[#allocation8 + $0x140] ss:$8 sps:$4 sm:$0xff]   ;;  %v3713_v1 = vld [vmem:[#allocation8 + $0x154] ss:$8 sps:$4 sm:$0xff]  }
 0xf74   :  { %v1651_v6 = vpop.f32.mrb[30].mxu0  ;;  %v1650_v11 = vadd.f32 %v1649_v5, %v1386_v16  ;;  %v3716_v5 = vld [vmem:[#allocation8 + $0x164] ss:$8 sps:$4 sm:$0xff]  }
 0xf75   :  { %3834 = vtanh.f32 %v1648_v2  ;;  %v1652_v7 = vpop.f32.mrb[31].mxu0  ;;  %v3711_v2 = vld [vmem:[#allocation8 + $0x150] ss:$8 sps:$4 sm:$0xff]   ;;  %v3714_v6 = vld [vmem:[#allocation8 + $0x160] ss:$8 sps:$4 sm:$0xff]  }
 0xf76   :  { %v1657_v19 = vmul.f32 %v1650_v11, %v1396_v13  ;;  %v3719_v7 = vld [vmem:[#allocation8 + $0x174] ss:$8 sps:$4 sm:$0xff]  }
 0xf7f   :  { %v3835_v9 = vpop.eup %3834 }
 0xf80   :  { %v1655_v10 = vmul.f32 %v3835_v9, %v1397_v8  ;;  %v3717_v8 = vld [vmem:[#allocation8 + $0x170] ss:$8 sps:$4 sm:$0xff]   ;;  %v1691_v9 = vld [vmem:[#allocation11 + $0x108] sm:$0xff] }
 0xf82   :  { %v1656_v14 = vmul.f32 %v1655_v10, %v1396_v13 }
 0xf84   :  { %v1658_v3 = vmul.f32 1.442695, %v1656_v14  ;;  %v4358_v15 = vadd.f32 %v1656_v14, %v4334_v33  ;;  %v3705_v33 = vld [vmem:[#allocation7 + $0xa8] sm:$0xff]  }
 0xf85   :  { %3520 = vmatpush3.bf16.msra.mxu0 %v3705_v33 }
 0xf86   :  { %3836 = vpow2.f32 %v1658_v3  ;;  %3521 = vmatprep.subr.bf16.mxu0 %v4077_v0 }
 0xf89   :  { %3522 = vmatpush3.bf16.msra.mxu0 %v3706_v26 }
 0xf8a   :  { %3523 = vmatprep.subr.bf16.mxu0 %v4077_v0 }
 0xf90   :  { %v3837_v17 = vpop.eup %3836 }
 0xf91   :  { %v1660_v20 = vmul.f32 %v3837_v17, %v4337_v40  ;;  %v3707_v40 = vld [vmem:[#allocation7 + $0xb8] sm:$0xff]  }
 0xf92   :  { %3524 = vmatpush3.bf16.msra.mxu0 %v3707_v40 }
 0xf93   :  { %v4361_v22 = vadd.f32 %v1660_v20, %v1657_v19  ;;  %3529 = vmatprep.subr.bf16.mxu0 %v4077_v0 }
 0xf95   :  { %v1698_v23 = vmul.f32 %v1695_v21, %v4361_v22 }
 0xf97   :  { %v1699_v24 = vpack.c.bf16 %v1698_v23, %v1698_v23 }
 0xf99   :  { %3514 = vmatmul.mubr.msk.bf16.vlgmr.msra.gmra.mrb[28].mxu1 %vm124_vm1, %v1699_v24 }
 0xf9a   :  { %1945 = vmatprep.mubr.bf16.mxu1 %v4079_v18  ;;  %1914 = vmatpush1.bf16.msra.mxu1 %v3708_v63 }
 0xf9b   :  { %1915 = vmatprep.subr.bf16.mxu1 %v3713_v1  ;;  %v1995_v1 = vld [vmem:[#allocation13 + $0x90] sm:$0xff] }
 0xf9e   :  { %1916 = vmatpush1.bf16.msra.mxu1 %v3711_v2 }
 0xf9f   :  { %1917 = vmatprep.subr.bf16.mxu1 %v3716_v5 }
 0xfa2   :  { %1918 = vmatpush1.bf16.msra.mxu1 %v3714_v6 }
 0xfa3   :  { %1919 = vmatprep.subr.bf16.mxu1 %v3719_v7  ;;  %v3721_v7 = vld [vmem:[#allocation7 + $0xc0] sm:$0xff]  }
 0xfa6   :  { %1920 = vmatpush1.bf16.msra.mxu1 %v3717_v8  ;;  %v3723_v8 = vld [vmem:[#allocation7 + $0xd0] sm:$0xff]  }
 0xfa7   :  { %3535 = vmatprep.subr.bf16.mxu1 %v4077_v0 }
0x106c   :  { %v1743_v28 = vpop.f32.mrb[28].mxu1 }
0x106d   :  { %v1744_v29 = vadd.f32 %v1743_v28, %v1688_v27  ;;  %v3515_v30 = vpop.f32.mrb[29].mxu1 }
0x106e   :  { %v1746_v32 = vpop.f32.mrb[30].mxu1 }
0x106f   :  { %v1749_v34 = vmax.f32 %v1744_v29, 0.0  ;;  %v3516_v35 = vpop.f32.mrb[31].mxu1 }
0x1071   :  { %v1750_v36 = vsel %vm249_vm2, %v1749_v34, 0.0  ;;  %v1757_v37 = vmul.f32 %v1749_v34, %v1749_v34 }
0x1072   :  { %v1751_v38 = vrot.slane %v1750_v36, 4 }
0x1073   :  { %v1758_v39 = vsel %vm249_vm2, %v1757_v37, 0.0 }
0x1074   :  { %v1752_v41 = vadd.f32 %v1751_v38, %v1750_v36  ;;  %v1759_v42 = vrot.slane %v1758_v39, 4 }
0x1076   :  { %v1753_v43 = vrot.slane %v1752_v41, 2  ;;  %v1760_v50 = vadd.f32 %v1759_v42, %v1758_v39  ;;  %v1692_v42 = vld [vmem:[#allocation11 + $0x110] sm:$0xff] }
0x1078   :  { %v1754_v44 = vadd.f32 %v1753_v43, %v1752_v41  ;;  %v1761_v56 = vrot.slane %v1760_v50, 2 }
0x107a   :  { %v1755_v45 = vrot.slane %v1754_v44, 1  ;;  %v1762_v46 = vadd.f32 %v1761_v56, %v1760_v50  ;;  %v1693_v50 = vld [vmem:[#allocation11 + $0x118] sm:$0xff] }
0x107c   :  { %v1756_v47 = vadd.f32 %v1755_v45, %v1754_v44  ;;  %v1763_v48 = vrot.slane %v1762_v46, 1 }
0x107e   :  { %v1764_v49 = vadd.f32 %v1763_v48, %v1762_v46  ;;  %v1765_v51 = vmul.f32 0.125, %v1756_v47  ;;  %v3720_v46 = vld [vmem:[#allocation5 + $0x30] sm:$0xff]   ;;  %v1685_v47 = vld [vmem:[#allocation10 + $0x50] sm:$0xff] }
0x1080   :  { %v1766_v52 = vmul.f32 0.125, %v1764_v49  ;;  %v1767_v53 = vmul.f32 %v1765_v51, %v1765_v51  ;;  %v1769_v31 = vsub.f32 %v1749_v34, %v1765_v51 }
0x1082   :  { %v1768_v54 = vsub.f32 %v1766_v52, %v1767_v53 }
0x1084   :  { %v1770_v55 = vadd.f32 1e-05, %v1768_v54  ;;  %v1697_v54 = vld [vmem:[#allocation13 + $0x88] sm:$0xff] }
0x1086   :  { %3838 = vrsqrt.f32 %v1770_v55 }
0x1090   :  { %v3839_v57 = vpop.eup %3838 }
0x1091   :  { %v1772_v59 = vmul.f32 %v3839_v57, %v1769_v31  ;;  %v1696_v57 = vld [vmem:[#allocation13 + $0x80] sm:$0xff] }
0x1093   :  { %v1773_v60 = vmul.f32 %v1772_v59, %v1689_v58 }
0x1095   :  { %v1774_v12 = vadd.f32 %v1773_v60, %v1690_v4  ;;  %v1686_v60 = vld [vmem:[#allocation10 + $0x58] sm:$0xff] }
0x1097   :  { %v1775_v61 = vpack.c.bf16 %v1774_v12, %v1774_v12 }
0x1099   :  { %3526 = vmatmul.mubr.msk.bf16.vlgmr.msra.gmra.mrb[32].mxu0 %vm249_vm2, %v1775_v61 }
0x109a   :  { %3531 = vmatprep.mubr.msk.bf16.mxu0 %vm4078_vm0, %v4077_v0  ;;  %3530 = vmatpush3.bf16.msra.mxu0 %v3720_v46  ;;  %v3727_v46 = vld [vmem:[#allocation8 + $0x184] ss:$8 sps:$4 sm:$0xff]  }
0x109b   :  { %2213 = vmatprep.subr.bf16.mxu0 %v3727_v46 }
0x116c   :  { %v1837_v10 = vpop.f32.mrb[32].mxu0 }
0x116d   :  { %v1838_v13 = vadd.f32 %v1837_v10, %v1691_v9  ;;  %v3527_v14 = vpop.f32.mrb[33].mxu0  ;;  %v1988_v9 = vld [vmem:[#allocation11 + $0x120] sm:$0xff] }
0x116e   :  { %v1840_v3 = vpop.f32.mrb[34].mxu0 }
0x116f   :  { %v1843_v16 = vmax.f32 %v1838_v13, 0.0  ;;  %v3528_v11 = vpop.f32.mrb[35].mxu0 }
0x1171   :  { %v1844_v17 = vsel %vm249_vm2, %v1843_v16, 0.0  ;;  %v1851_v19 = vmul.f32 %v1843_v16, %v1843_v16 }
0x1172   :  { %v1845_v20 = vrot.slane %v1844_v17, 4 }
0x1173   :  { %v1852_v21 = vsel %vm249_vm2, %v1851_v19, 0.0 }
0x1174   :  { %v1846_v23 = vadd.f32 %v1845_v20, %v1844_v17  ;;  %v1853_v24 = vrot.slane %v1852_v21, 4 }
0x1176   :  { %v1847_v25 = vrot.slane %v1846_v23, 2  ;;  %v1854_v33 = vadd.f32 %v1853_v24, %v1852_v21 }
0x1178   :  { %v1848_v26 = vadd.f32 %v1847_v25, %v1846_v23  ;;  %v1855_v40 = vrot.slane %v1854_v33, 2 }
0x117a   :  { %v1849_v27 = vrot.slane %v1848_v26, 1  ;;  %v1856_v28 = vadd.f32 %v1855_v40, %v1854_v33 }
0x117c   :  { %v1850_v29 = vadd.f32 %v1849_v27, %v1848_v26  ;;  %v1857_v30 = vrot.slane %v1856_v28, 1 }
0x117e   :  { %v1858_v32 = vadd.f32 %v1857_v30, %v1856_v28  ;;  %v1859_v34 = vmul.f32 0.125, %v1850_v29 }
0x1180   :  { %v1860_v35 = vmul.f32 0.125, %v1858_v32  ;;  %v1861_v36 = vmul.f32 %v1859_v34, %v1859_v34  ;;  %v1863_v39 = vsub.f32 %v1843_v16, %v1859_v34 }
0x1182   :  { %v1862_v37 = vsub.f32 %v1860_v35, %v1861_v36 }
0x1184   :  { %v1864_v38 = vadd.f32 1e-05, %v1862_v37 }
0x1186   :  { %3840 = vrsqrt.f32 %v1864_v38 }
0x1190   :  { %v3841_v41 = vpop.eup %3840 }
0x1191   :  { %v1866_v43 = vmul.f32 %v3841_v41, %v1863_v39 }
0x1193   :  { %v1867_v44 = vmul.f32 %v1866_v43, %v1692_v42  ;;  %v1989_v42 = vld [vmem:[#allocation11 + $0x128] sm:$0xff] }
0x1195   :  { %v1868_v56 = vadd.f32 %v1867_v44, %v1693_v50  ;;  %v1990_v50 = vld [vmem:[#allocation11 + $0x130] sm:$0xff] }
0x1197   :  { %v1869_v45 = vpack.c.bf16 %v1868_v56, %v1868_v56 }
0x1199   :  { %3286 = vmatmul.mubr.msk.bf16.vlgmr.msra.gmra.mrb[32].mxu1 %vm249_vm2, %v1869_v45 }
0x119a   :  { %3543 = vmatprep.mubr.msk.bf16.mxu1 %vm4078_vm0, %v4077_v0  ;;  %3536 = vmatpush3.bf16.msra.mxu1 %v3721_v7 }
0x119b   :  { %3537 = vmatprep.subr.bf16.mxu1 %v4077_v0 }
0x126c   :  { %v1947_v48 = vpop.f32.mrb[32].mxu1 }
0x126d   :  { %v1948_v49 = vadd.f32 %v1947_v48, %v1685_v47  ;;  %v1949_v51 = vpop.f32.mrb[33].mxu1  ;;  %v3725_v47 = vld [vmem:[#allocation8 + $0x180] ss:$8 sps:$4 sm:$0xff]   ;;  %v3730_v48 = vld [vmem:[#allocation8 + $0x194] ss:$8 sps:$4 sm:$0xff]  }
0x126e   :  { %v1951_v52 = vpop.f32.mrb[34].mxu1  ;;  %v1950_v12 = vadd.f32 %v1949_v51, %v1686_v60  ;;  %v3733_v51 = vld [vmem:[#allocation8 + $0x1a4] ss:$8 sps:$4 sm:$0xff]  }
0x126f   :  { %3842 = vtanh.f32 %v1948_v49  ;;  %v1952_v53 = vpop.f32.mrb[35].mxu1  ;;  %v3728_v49 = vld [vmem:[#allocation8 + $0x190] ss:$8 sps:$4 sm:$0xff]   ;;  %v3731_v52 = vld [vmem:[#allocation8 + $0x1a0] ss:$8 sps:$4 sm:$0xff]  }
0x1270   :  { %v1957_v62 = vmul.f32 %v1950_v12, %v1696_v57  ;;  %v3736_v53 = vld [vmem:[#allocation8 + $0x1b4] ss:$8 sps:$4 sm:$0xff]  }
0x1279   :  { %v3843_v55 = vpop.eup %3842 }
0x127a   :  { %v1955_v31 = vmul.f32 %v3843_v55, %v1697_v54  ;;  %v3734_v54 = vld [vmem:[#allocation8 + $0x1b0] ss:$8 sps:$4 sm:$0xff]  }
0x127b   :  { %v1991_v55 = vld [vmem:[#allocation11 + $0x138] sm:$0xff] }
0x127c   :  { %v1956_v58 = vmul.f32 %v1955_v31, %v1696_v57 }
0x127e   :  { %v1958_v59 = vmul.f32 1.442695, %v1956_v58  ;;  %v4382_v4 = vadd.f32 %v1956_v58, %v4358_v15  ;;  %v3722_v15 = vld [vmem:[#allocation7 + $0xc8] sm:$0xff]  }
0x127f   :  { %3538 = vmatpush3.bf16.msra.mxu1 %v3722_v15 }
0x1280   :  { %3844 = vpow2.f32 %v1958_v59  ;;  %3539 = vmatprep.subr.bf16.mxu1 %v4077_v0 }
0x1283   :  { %3540 = vmatpush3.bf16.msra.mxu1 %v3723_v8 }
0x1284   :  { %3541 = vmatprep.subr.bf16.mxu1 %v4077_v0 }
0x128a   :  { %v3845_v61 = vpop.eup %3844 }
0x128b   :  { %v1960_v63 = vmul.f32 %v3845_v61, %v4361_v22  ;;  %v3724_v22 = vld [vmem:[#allocation7 + $0xd8] sm:$0xff]  }
0x128c   :  { %3542 = vmatpush3.bf16.msra.mxu1 %v3724_v22 }
0x128d   :  { %v4385_v2 = vadd.f32 %v1960_v63, %v1957_v62  ;;  %3547 = vmatprep.subr.bf16.mxu1 %v4077_v0 }
0x128f   :  { %v1998_v5 = vmul.f32 %v1995_v1, %v4385_v2 }
0x1291   :  { %v1999_v6 = vpack.c.bf16 %v1998_v5, %v1998_v5 }
0x1293   :  { %3532 = vmatmul.mubr.msk.bf16.vlgmr.msra.gmra.mrb[36].mxu0 %vm124_vm1, %v1999_v6 }
0x1294   :  { %2245 = vmatprep.mubr.bf16.mxu0 %v4079_v18  ;;  %2214 = vmatpush1.bf16.msra.mxu0 %v3725_v47 }
0x1295   :  { %2215 = vmatprep.subr.bf16.mxu0 %v3730_v48  ;;  %v2295_v48 = vld [vmem:[#allocation13 + $0xa8] sm:$0xff] }
0x1298   :  { %2216 = vmatpush1.bf16.msra.mxu0 %v3728_v49 }
0x1299   :  { %2217 = vmatprep.subr.bf16.mxu0 %v3733_v51 }
0x129c   :  { %2218 = vmatpush1.bf16.msra.mxu0 %v3731_v52 }
0x129d   :  { %2219 = vmatprep.subr.bf16.mxu0 %v3736_v53  ;;  %v3738_v53 = vld [vmem:[#allocation7 + $0xe0] sm:$0xff]  }
0x12a0   :  { %2220 = vmatpush1.bf16.msra.mxu0 %v3734_v54  ;;  %v3740_v54 = vld [vmem:[#allocation7 + $0xf0] sm:$0xff]  }
0x12a1   :  { %3553 = vmatprep.subr.bf16.mxu0 %v4077_v0 }
0x1366   :  { %v2043_v10 = vpop.f32.mrb[36].mxu0 }
0x1367   :  { %v2044_v13 = vadd.f32 %v2043_v10, %v1988_v9  ;;  %v3533_v14 = vpop.f32.mrb[37].mxu0 }
0x1368   :  { %v2046_v3 = vpop.f32.mrb[38].mxu0 }
0x1369   :  { %v2049_v16 = vmax.f32 %v2044_v13, 0.0  ;;  %v3534_v11 = vpop.f32.mrb[39].mxu0 }
0x136b   :  { %v2050_v17 = vsel %vm249_vm2, %v2049_v16, 0.0  ;;  %v2057_v19 = vmul.f32 %v2049_v16, %v2049_v16 }
0x136c   :  { %v2051_v20 = vrot.slane %v2050_v17, 4 }
0x136d   :  { %v2058_v21 = vsel %vm249_vm2, %v2057_v19, 0.0 }
0x136e   :  { %v2052_v23 = vadd.f32 %v2051_v20, %v2050_v17  ;;  %v2059_v24 = vrot.slane %v2058_v21, 4 }
0x1370   :  { %v2053_v25 = vrot.slane %v2052_v23, 2  ;;  %v2060_v33 = vadd.f32 %v2059_v24, %v2058_v21  ;;  %v1992_v24 = vld [vmem:[#allocation11 + $0x140] sm:$0xff] }
0x1372   :  { %v2054_v26 = vadd.f32 %v2053_v25, %v2052_v23  ;;  %v2061_v40 = vrot.slane %v2060_v33, 2 }
0x1374   :  { %v2055_v27 = vrot.slane %v2054_v26, 1  ;;  %v2062_v28 = vadd.f32 %v2061_v40, %v2060_v33  ;;  %v1993_v33 = vld [vmem:[#allocation11 + $0x148] sm:$0xff] }
0x1376   :  { %v2056_v29 = vadd.f32 %v2055_v27, %v2054_v26  ;;  %v2063_v30 = vrot.slane %v2062_v28, 1 }
0x1378   :  { %v2064_v32 = vadd.f32 %v2063_v30, %v2062_v28  ;;  %v2065_v34 = vmul.f32 0.125, %v2056_v29  ;;  %v3737_v28 = vld [vmem:[#allocation5 + $0x38] sm:$0xff]   ;;  %v1985_v29 = vld [vmem:[#allocation10 + $0x60] sm:$0xff] }
0x137a   :  { %v2066_v35 = vmul.f32 0.125, %v2064_v32  ;;  %v2067_v36 = vmul.f32 %v2065_v34, %v2065_v34  ;;  %v2069_v39 = vsub.f32 %v2049_v16, %v2065_v34 }
0x137c   :  { %v2068_v37 = vsub.f32 %v2066_v35, %v2067_v36 }
0x137e   :  { %v2070_v38 = vadd.f32 1e-05, %v2068_v37  ;;  %v1997_v37 = vld [vmem:[#allocation13 + $0xa0] sm:$0xff] }
0x1380   :  { %3846 = vrsqrt.f32 %v2070_v38 }
0x138a   :  { %v3847_v41 = vpop.eup %3846 }
0x138b   :  { %v2072_v43 = vmul.f32 %v3847_v41, %v2069_v39  ;;  %v1996_v41 = vld [vmem:[#allocation13 + $0x98] sm:$0xff] }
0x138d   :  { %v2073_v44 = vmul.f32 %v2072_v43, %v1989_v42 }
0x138f   :  { %v2074_v56 = vadd.f32 %v2073_v44, %v1990_v50  ;;  %v1986_v44 = vld [vmem:[#allocation10 + $0x68] sm:$0xff] }
0x1391   :  { %v2075_v45 = vpack.c.bf16 %v2074_v56, %v2074_v56 }
0x1393   :  { %3544 = vmatmul.mubr.msk.bf16.vlgmr.msra.gmra.mrb[36].mxu1 %vm249_vm2, %v2075_v45 }
0x1394   :  { %3549 = vmatprep.mubr.msk.bf16.mxu1 %vm4078_vm0, %v4077_v0  ;;  %3548 = vmatpush3.bf16.msra.mxu1 %v3737_v28  ;;  %v3744_v28 = vld [vmem:[#allocation8 + $0x1c4] ss:$8 sps:$4 sm:$0xff]  }
0x1395   :  { %2513 = vmatprep.subr.bf16.mxu1 %v3744_v28 }
0x1466   :  { %v2137_v31 = vpop.f32.mrb[36].mxu1 }
0x1467   :  { %v2138_v57 = vadd.f32 %v2137_v31, %v1991_v55  ;;  %v3545_v58 = vpop.f32.mrb[37].mxu1  ;;  %v2288_v55 = vld [vmem:[#allocation11 + $0x150] sm:$0xff] }
0x1468   :  { %v2140_v59 = vpop.f32.mrb[38].mxu1 }
0x1469   :  { %v2143_v60 = vmax.f32 %v2138_v57, 0.0  ;;  %v3546_v12 = vpop.f32.mrb[39].mxu1 }
0x146b   :  { %v2144_v61 = vsel %vm249_vm2, %v2143_v60, 0.0  ;;  %v2151_v62 = vmul.f32 %v2143_v60, %v2143_v60 }
0x146c   :  { %v2145_v63 = vrot.slane %v2144_v61, 4 }
0x146d   :  { %v2152_v1 = vsel %vm249_vm2, %v2151_v62, 0.0 }
0x146e   :  { %v2146_v5 = vadd.f32 %v2145_v63, %v2144_v61  ;;  %v2153_v6 = vrot.slane %v2152_v1, 4 }
0x1470   :  { %v2147_v7 = vrot.slane %v2146_v5, 2  ;;  %v2154_v15 = vadd.f32 %v2153_v6, %v2152_v1 }
0x1472   :  { %v2148_v8 = vadd.f32 %v2147_v7, %v2146_v5  ;;  %v2155_v22 = vrot.slane %v2154_v15, 2 }
0x1474   :  { %v2149_v9 = vrot.slane %v2148_v8, 1  ;;  %v2156_v10 = vadd.f32 %v2155_v22, %v2154_v15 }
0x1476   :  { %v2150_v13 = vadd.f32 %v2149_v9, %v2148_v8  ;;  %v2157_v14 = vrot.slane %v2156_v10, 1 }
0x1478   :  { %v2158_v3 = vadd.f32 %v2157_v14, %v2156_v10  ;;  %v2159_v16 = vmul.f32 0.125, %v2150_v13 }
0x147a   :  { %v2160_v11 = vmul.f32 0.125, %v2158_v3  ;;  %v2161_v17 = vmul.f32 %v2159_v16, %v2159_v16  ;;  %v2163_v21 = vsub.f32 %v2143_v60, %v2159_v16 }
0x147c   :  { %v2162_v19 = vsub.f32 %v2160_v11, %v2161_v17 }
0x147e   :  { %v2164_v20 = vadd.f32 1e-05, %v2162_v19 }
0x1480   :  { %3848 = vrsqrt.f32 %v2164_v20 }
0x148a   :  { %v3849_v23 = vpop.eup %3848 }
0x148b   :  { %v2166_v25 = vmul.f32 %v3849_v23, %v2163_v21 }
0x148d   :  { %v2167_v26 = vmul.f32 %v2166_v25, %v1992_v24  ;;  %v2289_v24 = vld [vmem:[#allocation11 + $0x158] sm:$0xff] }
0x148f   :  { %v2168_v40 = vadd.f32 %v2167_v26, %v1993_v33  ;;  %v2290_v33 = vld [vmem:[#allocation11 + $0x160] sm:$0xff] }
0x1491   :  { %v2169_v27 = vpack.c.bf16 %v2168_v40, %v2168_v40 }
0x1493   :  { %3302 = vmatmul.mubr.msk.bf16.vlgmr.msra.gmra.mrb[40].mxu0 %vm249_vm2, %v2169_v27 }
0x1494   :  { %3561 = vmatprep.mubr.msk.bf16.mxu0 %vm4078_vm0, %v4077_v0  ;;  %3554 = vmatpush3.bf16.msra.mxu0 %v3738_v53 }
0x1495   :  { %3555 = vmatprep.subr.bf16.mxu0 %v4077_v0 }
0x1566   :  { %v2247_v30 = vpop.f32.mrb[40].mxu0 }
0x1567   :  { %v2248_v32 = vadd.f32 %v2247_v30, %v1985_v29  ;;  %v2249_v34 = vpop.f32.mrb[41].mxu0  ;;  %v3742_v29 = vld [vmem:[#allocation8 + $0x1c0] ss:$8 sps:$4 sm:$0xff]   ;;  %v3747_v30 = vld [vmem:[#allocation8 + $0x1d4] ss:$8 sps:$4 sm:$0xff]  }
0x1568   :  { %v2251_v35 = vpop.f32.mrb[42].mxu0  ;;  %v2250_v56 = vadd.f32 %v2249_v34, %v1986_v44  ;;  %v3750_v34 = vld [vmem:[#allocation8 + $0x1e4] ss:$8 sps:$4 sm:$0xff]  }
0x1569   :  { %3850 = vtanh.f32 %v2248_v32  ;;  %v2252_v36 = vpop.f32.mrb[43].mxu0  ;;  %v3745_v32 = vld [vmem:[#allocation8 + $0x1d0] ss:$8 sps:$4 sm:$0xff]   ;;  %v3748_v35 = vld [vmem:[#allocation8 + $0x1e0] ss:$8 sps:$4 sm:$0xff]  }
0x156a   :  { %v2257_v46 = vmul.f32 %v2250_v56, %v1996_v41  ;;  %v3753_v36 = vld [vmem:[#allocation8 + $0x1f4] ss:$8 sps:$4 sm:$0xff]  }
0x1573   :  { %v3851_v38 = vpop.eup %3850 }
0x1574   :  { %v2255_v39 = vmul.f32 %v3851_v38, %v1997_v37  ;;  %v3751_v37 = vld [vmem:[#allocation8 + $0x1f0] ss:$8 sps:$4 sm:$0xff]   ;;  %v2291_v38 = vld [vmem:[#allocation11 + $0x168] sm:$0xff] }
0x1576   :  { %v2256_v42 = vmul.f32 %v2255_v39, %v1996_v41 }
0x1578   :  { %v2258_v43 = vmul.f32 1.442695, %v2256_v42  ;;  %v4406_v50 = vadd.f32 %v2256_v42, %v4382_v4  ;;  %v3739_v4 = vld [vmem:[#allocation7 + $0xe8] sm:$0xff]  }
0x1579   :  { %3556 = vmatpush3.bf16.msra.mxu0 %v3739_v4 }
0x157a   :  { %3852 = vpow2.f32 %v2258_v43  ;;  %3557 = vmatprep.subr.bf16.mxu0 %v4077_v0 }
0x157d   :  { %3558 = vmatpush3.bf16.msra.mxu0 %v3740_v54 }
0x157e   :  { %3559 = vmatprep.subr.bf16.mxu0 %v4077_v0 }
0x1584   :  { %v3853_v45 = vpop.eup %3852 }
0x1585   :  { %v2260_v47 = vmul.f32 %v3853_v45, %v4385_v2  ;;  %v3741_v2 = vld [vmem:[#allocation7 + $0xf8] sm:$0xff]  }
0x1586   :  { %3560 = vmatpush3.bf16.msra.mxu0 %v3741_v2 }
0x1587   :  { %v4409_v49 = vadd.f32 %v2260_v47, %v2257_v46  ;;  %3565 = vmatprep.subr.bf16.mxu0 %v4077_v0 }
0x1589   :  { %v2298_v51 = vmul.f32 %v2295_v48, %v4409_v49 }
0x158b   :  { %v2299_v52 = vpack.c.bf16 %v2298_v51, %v2298_v51 }
0x158d   :  { %3550 = vmatmul.mubr.msk.bf16.vlgmr.msra.gmra.mrb[40].mxu1 %vm124_vm1, %v2299_v52 }
0x158e   :  { %2545 = vmatprep.mubr.bf16.mxu1 %v4079_v18  ;;  %2514 = vmatpush1.bf16.msra.mxu1 %v3742_v29 }
0x158f   :  { %2515 = vmatprep.subr.bf16.mxu1 %v3747_v30  ;;  %v2595_v30 = vld [vmem:[#allocation13 + $0xc0] sm:$0xff] }
0x1592   :  { %2516 = vmatpush1.bf16.msra.mxu1 %v3745_v32 }
0x1593   :  { %2517 = vmatprep.subr.bf16.mxu1 %v3750_v34 }
0x1596   :  { %2518 = vmatpush1.bf16.msra.mxu1 %v3748_v35 }
0x1597   :  { %2519 = vmatprep.subr.bf16.mxu1 %v3753_v36  ;;  %v3755_v36 = vld [vmem:[#allocation7 + $0x100] sm:$0xff]  }
0x159a   :  { %2520 = vmatpush1.bf16.msra.mxu1 %v3751_v37  ;;  %v3757_v37 = vld [vmem:[#allocation7 + $0x110] sm:$0xff]  }
0x159b   :  { %3571 = vmatprep.subr.bf16.mxu1 %v4077_v0 }
0x1660   :  { %v2343_v31 = vpop.f32.mrb[40].mxu1 }
0x1661   :  { %v2344_v57 = vadd.f32 %v2343_v31, %v2288_v55  ;;  %v3551_v58 = vpop.f32.mrb[41].mxu1 }
0x1662   :  { %v2346_v59 = vpop.f32.mrb[42].mxu1 }
0x1663   :  { %v2349_v60 = vmax.f32 %v2344_v57, 0.0  ;;  %v3552_v12 = vpop.f32.mrb[43].mxu1 }
0x1665   :  { %v2350_v61 = vsel %vm249_vm2, %v2349_v60, 0.0  ;;  %v2357_v62 = vmul.f32 %v2349_v60, %v2349_v60 }
0x1666   :  { %v2351_v63 = vrot.slane %v2350_v61, 4 }
0x1667   :  { %v2358_v1 = vsel %vm249_vm2, %v2357_v62, 0.0 }
0x1668   :  { %v2352_v5 = vadd.f32 %v2351_v63, %v2350_v61  ;;  %v2359_v6 = vrot.slane %v2358_v1, 4 }
0x166a   :  { %v2353_v7 = vrot.slane %v2352_v5, 2  ;;  %v2360_v15 = vadd.f32 %v2359_v6, %v2358_v1  ;;  %v2292_v6 = vld [vmem:[#allocation11 + $0x170] sm:$0xff] }
0x166c   :  { %v2354_v8 = vadd.f32 %v2353_v7, %v2352_v5  ;;  %v2361_v22 = vrot.slane %v2360_v15, 2 }
0x166e   :  { %v2355_v9 = vrot.slane %v2354_v8, 1  ;;  %v2362_v10 = vadd.f32 %v2361_v22, %v2360_v15  ;;  %v2293_v15 = vld [vmem:[#allocation11 + $0x178] sm:$0xff] }
0x1670   :  { %v2356_v13 = vadd.f32 %v2355_v9, %v2354_v8  ;;  %v2363_v14 = vrot.slane %v2362_v10, 1 }
0x1672   :  { %v2364_v3 = vadd.f32 %v2363_v14, %v2362_v10  ;;  %v2365_v16 = vmul.f32 0.125, %v2356_v13  ;;  %v3754_v10 = vld [vmem:[#allocation5 + $0x40] sm:$0xff]  }
0x1673   :  { %v2285_v13 = vld [vmem:[#allocation10 + $0x70] sm:$0xff] }
0x1674   :  { %v2366_v11 = vmul.f32 0.125, %v2364_v3  ;;  %v2367_v17 = vmul.f32 %v2365_v16, %v2365_v16  ;;  %v2369_v21 = vsub.f32 %v2349_v60, %v2365_v16 }
0x1676   :  { %v2368_v19 = vsub.f32 %v2366_v11, %v2367_v17 }
0x1678   :  { %v2370_v20 = vadd.f32 1e-05, %v2368_v19  ;;  %v2297_v19 = vld [vmem:[#allocation13 + $0xb8] sm:$0xff] }
0x167a   :  { %3854 = vrsqrt.f32 %v2370_v20 }
0x1684   :  { %v3855_v23 = vpop.eup %3854 }
0x1685   :  { %v2372_v25 = vmul.f32 %v3855_v23, %v2369_v21  ;;  %v2296_v23 = vld [vmem:[#allocation13 + $0xb0] sm:$0xff] }
0x1687   :  { %v2373_v26 = vmul.f32 %v2372_v25, %v2289_v24 }
0x1689   :  { %v2374_v40 = vadd.f32 %v2373_v26, %v2290_v33  ;;  %v2286_v26 = vld [vmem:[#allocation10 + $0x78] sm:$0xff] }
0x168b   :  { %v2375_v27 = vpack.c.bf16 %v2374_v40, %v2374_v40 }
0x168d   :  { %3562 = vmatmul.mubr.msk.bf16.vlgmr.msra.gmra.mrb[44].mxu0 %vm249_vm2, %v2375_v27 }
0x168e   :  { %3567 = vmatprep.mubr.msk.bf16.mxu0 %vm4078_vm0, %v4077_v0  ;;  %3566 = vmatpush3.bf16.msra.mxu0 %v3754_v10  ;;  %v3761_v10 = vld [vmem:[#allocation8 + $0x204] ss:$8 sps:$4 sm:$0xff]  }
0x168f   :  { %2813 = vmatprep.subr.bf16.mxu0 %v3761_v10 }
0x1760   :  { %v2437_v39 = vpop.f32.mrb[44].mxu0 }
0x1761   :  { %v2438_v41 = vadd.f32 %v2437_v39, %v2291_v38  ;;  %v3563_v42 = vpop.f32.mrb[45].mxu0  ;;  %v2588_v38 = vld [vmem:[#allocation11 + $0x180] sm:$0xff] }
0x1762   :  { %v2440_v43 = vpop.f32.mrb[46].mxu0 }
0x1763   :  { %v2443_v44 = vmax.f32 %v2438_v41, 0.0  ;;  %v3564_v56 = vpop.f32.mrb[47].mxu0 }
0x1765   :  { %v2444_v45 = vsel %vm249_vm2, %v2443_v44, 0.0  ;;  %v2451_v46 = vmul.f32 %v2443_v44, %v2443_v44 }
0x1766   :  { %v2445_v47 = vrot.slane %v2444_v45, 4 }
0x1767   :  { %v2452_v48 = vsel %vm249_vm2, %v2451_v46, 0.0 }
0x1768   :  { %v2446_v51 = vadd.f32 %v2445_v47, %v2444_v45  ;;  %v2453_v52 = vrot.slane %v2452_v48, 4 }
0x176a   :  { %v2447_v53 = vrot.slane %v2446_v51, 2  ;;  %v2454_v4 = vadd.f32 %v2453_v52, %v2452_v48 }
0x176c   :  { %v2448_v54 = vadd.f32 %v2447_v53, %v2446_v51  ;;  %v2455_v2 = vrot.slane %v2454_v4, 2 }
0x176e   :  { %v2449_v55 = vrot.slane %v2448_v54, 1  ;;  %v2456_v31 = vadd.f32 %v2455_v2, %v2454_v4 }
0x1770   :  { %v2450_v57 = vadd.f32 %v2449_v55, %v2448_v54  ;;  %v2457_v58 = vrot.slane %v2456_v31, 1 }
0x1772   :  { %v2458_v59 = vadd.f32 %v2457_v58, %v2456_v31  ;;  %v2459_v60 = vmul.f32 0.125, %v2450_v57 }
0x1774   :  { %v2460_v12 = vmul.f32 0.125, %v2458_v59  ;;  %v2461_v61 = vmul.f32 %v2459_v60, %v2459_v60  ;;  %v2463_v1 = vsub.f32 %v2443_v44, %v2459_v60 }
0x1776   :  { %v2462_v62 = vsub.f32 %v2460_v12, %v2461_v61 }
0x1778   :  { %v2464_v63 = vadd.f32 1e-05, %v2462_v62 }
0x177a   :  { %3856 = vrsqrt.f32 %v2464_v63 }
0x1784   :  { %v3857_v5 = vpop.eup %3856 }
0x1785   :  { %v2466_v7 = vmul.f32 %v3857_v5, %v2463_v1 }
0x1787   :  { %v2467_v8 = vmul.f32 %v2466_v7, %v2292_v6  ;;  %v2589_v6 = vld [vmem:[#allocation11 + $0x188] sm:$0xff] }
0x1789   :  { %v2468_v22 = vadd.f32 %v2467_v8, %v2293_v15  ;;  %v2590_v15 = vld [vmem:[#allocation11 + $0x190] sm:$0xff] }
0x178b   :  { %v2469_v9 = vpack.c.bf16 %v2468_v22, %v2468_v22 }
0x178d   :  { %3318 = vmatmul.mubr.msk.bf16.vlgmr.msra.gmra.mrb[44].mxu1 %vm249_vm2, %v2469_v9 }
0x178e   :  { %3579 = vmatprep.mubr.msk.bf16.mxu1 %vm4078_vm0, %v4077_v0  ;;  %3572 = vmatpush3.bf16.msra.mxu1 %v3755_v36 }
0x178f   :  { %3573 = vmatprep.subr.bf16.mxu1 %v4077_v0 }
0x1860   :  { %v2547_v14 = vpop.f32.mrb[44].mxu1 }
0x1861   :  { %v2548_v3 = vadd.f32 %v2547_v14, %v2285_v13  ;;  %v2549_v16 = vpop.f32.mrb[45].mxu1  ;;  %v3759_v13 = vld [vmem:[#allocation8 + $0x200] ss:$8 sps:$4 sm:$0xff]   ;;  %v3764_v14 = vld [vmem:[#allocation8 + $0x214] ss:$8 sps:$4 sm:$0xff]  }
0x1862   :  { %v2551_v11 = vpop.f32.mrb[46].mxu1  ;;  %v2550_v40 = vadd.f32 %v2549_v16, %v2286_v26  ;;  %v3767_v16 = vld [vmem:[#allocation8 + $0x224] ss:$8 sps:$4 sm:$0xff]  }
0x1863   :  { %3858 = vtanh.f32 %v2548_v3  ;;  %v2552_v17 = vpop.f32.mrb[47].mxu1  ;;  %v3762_v3 = vld [vmem:[#allocation8 + $0x210] ss:$8 sps:$4 sm:$0xff]   ;;  %v3765_v11 = vld [vmem:[#allocation8 + $0x220] ss:$8 sps:$4 sm:$0xff]  }
0x1864   :  { %v2557_v28 = vmul.f32 %v2550_v40, %v2296_v23  ;;  %v3770_v17 = vld [vmem:[#allocation8 + $0x234] ss:$8 sps:$4 sm:$0xff]  }
0x186d   :  { %v3859_v20 = vpop.eup %3858 }
0x186e   :  { %v2555_v21 = vmul.f32 %v3859_v20, %v2297_v19  ;;  %v3768_v19 = vld [vmem:[#allocation8 + $0x230] ss:$8 sps:$4 sm:$0xff]  }
0x186f   :  { %v2591_v20 = vld [vmem:[#allocation11 + $0x198] sm:$0xff] }
0x1870   :  { %v2556_v24 = vmul.f32 %v2555_v21, %v2296_v23 }
0x1872   :  { %v2558_v25 = vmul.f32 1.442695, %v2556_v24  ;;  %v4430_v33 = vadd.f32 %v2556_v24, %v4406_v50  ;;  %v3756_v50 = vld [vmem:[#allocation7 + $0x108] sm:$0xff]  }
0x1873   :  { %3574 = vmatpush3.bf16.msra.mxu1 %v3756_v50 }
0x1874   :  { %3860 = vpow2.f32 %v2558_v25  ;;  %3575 = vmatprep.subr.bf16.mxu1 %v4077_v0 }
0x1877   :  { %3576 = vmatpush3.bf16.msra.mxu1 %v3757_v37 }
0x1878   :  { %3577 = vmatprep.subr.bf16.mxu1 %v4077_v0 }
0x187e   :  { %v3861_v27 = vpop.eup %3860 }
0x187f   :  { %v2560_v29 = vmul.f32 %v3861_v27, %v4409_v49  ;;  %v3758_v49 = vld [vmem:[#allocation7 + $0x118] sm:$0xff]  }
0x1880   :  { %3578 = vmatpush3.bf16.msra.mxu1 %v3758_v49 }
0x1881   :  { %v4433_v32 = vadd.f32 %v2560_v29, %v2557_v28  ;;  %3583 = vmatprep.subr.bf16.mxu1 %v4077_v0 }
0x1883   :  { %v2598_v34 = vmul.f32 %v2595_v30, %v4433_v32 }
0x1885   :  { %v2599_v35 = vpack.c.bf16 %v2598_v34, %v2598_v34 }
0x1887   :  { %3568 = vmatmul.mubr.msk.bf16.vlgmr.msra.gmra.mrb[48].mxu0 %vm124_vm1, %v2599_v35 }
0x1888   :  { %2845 = vmatprep.mubr.bf16.mxu0 %v4079_v18  ;;  %2814 = vmatpush1.bf16.msra.mxu0 %v3759_v13 }
0x1889   :  { %2815 = vmatprep.subr.bf16.mxu0 %v3764_v14  ;;  %v2895_v14 = vld [vmem:[#allocation13 + $0xd8] sm:$0xff] }
0x188c   :  { %2816 = vmatpush1.bf16.msra.mxu0 %v3762_v3 }
0x188d   :  { %2817 = vmatprep.subr.bf16.mxu0 %v3767_v16 }
0x1890   :  { %2818 = vmatpush1.bf16.msra.mxu0 %v3765_v11 }
0x1891   :  { %2819 = vmatprep.subr.bf16.mxu0 %v3770_v17  ;;  %v3772_v17 = vld [vmem:[#allocation7 + $0x120] sm:$0xff]  }
0x1894   :  { %2820 = vmatpush1.bf16.msra.mxu0 %v3768_v19  ;;  %v3774_v19 = vld [vmem:[#allocation7 + $0x130] sm:$0xff]  }
0x1895   :  { %3589 = vmatprep.subr.bf16.mxu0 %v4077_v0 }
0x195a   :  { %v2643_v39 = vpop.f32.mrb[48].mxu0 }
0x195b   :  { %v2644_v41 = vadd.f32 %v2643_v39, %v2588_v38  ;;  %v3569_v42 = vpop.f32.mrb[49].mxu0 }
0x195c   :  { %v2646_v43 = vpop.f32.mrb[50].mxu0 }
0x195d   :  { %v2649_v44 = vmax.f32 %v2644_v41, 0.0  ;;  %v3570_v56 = vpop.f32.mrb[51].mxu0 }
0x195f   :  { %v2650_v45 = vsel %vm249_vm2, %v2649_v44, 0.0  ;;  %v2657_v46 = vmul.f32 %v2649_v44, %v2649_v44 }
0x1960   :  { %v2651_v47 = vrot.slane %v2650_v45, 4 }
0x1961   :  { %v2658_v48 = vsel %vm249_vm2, %v2657_v46, 0.0 }
0x1962   :  { %v2652_v51 = vadd.f32 %v2651_v47, %v2650_v45  ;;  %v2659_v52 = vrot.slane %v2658_v48, 4 }
0x1964   :  { %v2653_v53 = vrot.slane %v2652_v51, 2  ;;  %v2660_v4 = vadd.f32 %v2659_v52, %v2658_v48  ;;  %v2592_v52 = vld [vmem:[#allocation11 + $0x1a0] sm:$0xff] }
0x1966   :  { %v2654_v54 = vadd.f32 %v2653_v53, %v2652_v51  ;;  %v2661_v2 = vrot.slane %v2660_v4, 2 }
0x1968   :  { %v2655_v55 = vrot.slane %v2654_v54, 1  ;;  %v2662_v31 = vadd.f32 %v2661_v2, %v2660_v4  ;;  %v2593_v4 = vld [vmem:[#allocation11 + $0x1a8] sm:$0xff] }
0x196a   :  { %v2656_v57 = vadd.f32 %v2655_v55, %v2654_v54  ;;  %v2663_v58 = vrot.slane %v2662_v31, 1 }
0x196c   :  { %v2664_v59 = vadd.f32 %v2663_v58, %v2662_v31  ;;  %v2665_v60 = vmul.f32 0.125, %v2656_v57  ;;  %v3771_v31 = vld [vmem:[#allocation5 + $0x48] sm:$0xff]   ;;  %v2585_v57 = vld [vmem:[#allocation10 + $0x80] sm:$0xff] }
0x196e   :  { %v2666_v12 = vmul.f32 0.125, %v2664_v59  ;;  %v2667_v61 = vmul.f32 %v2665_v60, %v2665_v60  ;;  %v2669_v1 = vsub.f32 %v2649_v44, %v2665_v60 }
0x1970   :  { %v2668_v62 = vsub.f32 %v2666_v12, %v2667_v61 }
0x1972   :  { %v2670_v63 = vadd.f32 1e-05, %v2668_v62  ;;  %v2597_v62 = vld [vmem:[#allocation13 + $0xd0] sm:$0xff] }
0x1974   :  { %3862 = vrsqrt.f32 %v2670_v63 }
0x197e   :  { %v3863_v5 = vpop.eup %3862 }
0x197f   :  { %v2672_v7 = vmul.f32 %v3863_v5, %v2669_v1  ;;  %v2596_v5 = vld [vmem:[#allocation13 + $0xc8] sm:$0xff] }
0x1981   :  { %v2673_v8 = vmul.f32 %v2672_v7, %v2589_v6 }
0x1983   :  { %v2674_v22 = vadd.f32 %v2673_v8, %v2590_v15  ;;  %v2586_v8 = vld [vmem:[#allocation10 + $0x88] sm:$0xff] }
0x1985   :  { %v2675_v9 = vpack.c.bf16 %v2674_v22, %v2674_v22 }
0x1987   :  { %3580 = vmatmul.mubr.msk.bf16.vlgmr.msra.gmra.mrb[48].mxu1 %vm249_vm2, %v2675_v9 }
0x1988   :  { %3585 = vmatprep.mubr.msk.bf16.mxu1 %vm4078_vm0, %v4077_v0  ;;  %3584 = vmatpush3.bf16.msra.mxu1 %v3771_v31  ;;  %v3781_v31 = vld [vmem:[#allocation8 + $0x254] ss:$8 sps:$4 sm:$0xff]  }
0x1a5a   :  { %v2737_v21 = vpop.f32.mrb[48].mxu1 }
0x1a5b   :  { %v2738_v23 = vadd.f32 %v2737_v21, %v2591_v20  ;;  %v3581_v24 = vpop.f32.mrb[49].mxu1  ;;  %v2888_v20 = vld [vmem:[#allocation11 + $0x1b0] sm:$0xff] }
0x1a5c   :  { %v2740_v25 = vpop.f32.mrb[50].mxu1 }
0x1a5d   :  { %v2743_v26 = vmax.f32 %v2738_v23, 0.0  ;;  %v3582_v40 = vpop.f32.mrb[51].mxu1 }
0x1a5f   :  { %v2744_v27 = vsel %vm249_vm2, %v2743_v26, 0.0  ;;  %v2751_v28 = vmul.f32 %v2743_v26, %v2743_v26 }
0x1a60   :  { %v2745_v29 = vrot.slane %v2744_v27, 4 }
0x1a61   :  { %v2752_v30 = vsel %vm249_vm2, %v2751_v28, 0.0 }
0x1a62   :  { %v2746_v34 = vadd.f32 %v2745_v29, %v2744_v27  ;;  %v2753_v35 = vrot.slane %v2752_v30, 4 }
0x1a64   :  { %v2747_v36 = vrot.slane %v2746_v34, 2  ;;  %v2754_v50 = vadd.f32 %v2753_v35, %v2752_v30 }
0x1a66   :  { %v2748_v37 = vadd.f32 %v2747_v36, %v2746_v34  ;;  %v2755_v49 = vrot.slane %v2754_v50, 2 }
0x1a68   :  { %v2749_v38 = vrot.slane %v2748_v37, 1  ;;  %v2756_v39 = vadd.f32 %v2755_v49, %v2754_v50 }
0x1a6a   :  { %v2750_v41 = vadd.f32 %v2749_v38, %v2748_v37  ;;  %v2757_v42 = vrot.slane %v2756_v39, 1 }
0x1a6c   :  { %v2758_v43 = vadd.f32 %v2757_v42, %v2756_v39  ;;  %v2759_v44 = vmul.f32 0.125, %v2750_v41 }
0x1a6e   :  { %v2760_v56 = vmul.f32 0.125, %v2758_v43  ;;  %v2761_v45 = vmul.f32 %v2759_v44, %v2759_v44  ;;  %v2763_v48 = vsub.f32 %v2743_v26, %v2759_v44 }
0x1a70   :  { %v2762_v46 = vsub.f32 %v2760_v56, %v2761_v45 }
0x1a72   :  { %v2764_v47 = vadd.f32 1e-05, %v2762_v46 }
0x1a74   :  { %3864 = vrsqrt.f32 %v2764_v47 }
0x1a7e   :  { %v3865_v51 = vpop.eup %3864 }
0x1a7f   :  { %v2766_v53 = vmul.f32 %v3865_v51, %v2763_v48  ;;  %v2889_v48 = vld [vmem:[#allocation11 + $0x1b8] sm:$0xff] }
0x1a81   :  { %v2767_v54 = vmul.f32 %v2766_v53, %v2592_v52  ;;  %v2890_v52 = vld [vmem:[#allocation11 + $0x1c0] sm:$0xff] }
0x1a83   :  { %v2768_v2 = vadd.f32 %v2767_v54, %v2593_v4 }
0x1a85   :  { %v2769_v55 = vpack.c.bf16 %v2768_v2, %v2768_v2  ;;  %v3778_v2 = vld [vmem:[#allocation8 + $0x244] ss:$8 sps:$4 sm:$0xff]  }
0x1a86   :  { %3113 = vmatprep.subr.bf16.mxu1 %v3778_v2 }
0x1a87   :  { %3334 = vmatmul.mubr.msk.bf16.vlgmr.msra.gmra.mrb[52].mxu0 %vm249_vm2, %v2769_v55  ;;  %v3776_v55 = vld [vmem:[#allocation8 + $0x240] ss:$8 sps:$4 sm:$0xff]  }
0x1a88   :  { %3597 = vmatprep.mubr.msk.bf16.mxu0 %vm4078_vm0, %v4077_v0  ;;  %3590 = vmatpush3.bf16.msra.mxu0 %v3772_v17 }
0x1a89   :  { %3591 = vmatprep.subr.bf16.mxu0 %v4077_v0 }
0x1b5a   :  { %v2847_v58 = vpop.f32.mrb[52].mxu0 }
0x1b5b   :  { %v2848_v59 = vadd.f32 %v2847_v58, %v2585_v57  ;;  %v2849_v60 = vpop.f32.mrb[53].mxu0  ;;  %v3779_v57 = vld [vmem:[#allocation8 + $0x250] ss:$8 sps:$4 sm:$0xff]   ;;  %v3784_v58 = vld [vmem:[#allocation8 + $0x264] ss:$8 sps:$4 sm:$0xff]  }
0x1b5c   :  { %v2851_v12 = vpop.f32.mrb[54].mxu0  ;;  %v2850_v22 = vadd.f32 %v2849_v60, %v2586_v8  ;;  %v3787_v60 = vld [vmem:[#allocation8 + $0x274] ss:$8 sps:$4 sm:$0xff]  }
0x1b5d   :  { %3866 = vtanh.f32 %v2848_v59  ;;  %v2852_v61 = vpop.f32.mrb[55].mxu0  ;;  %v3782_v59 = vld [vmem:[#allocation8 + $0x260] ss:$8 sps:$4 sm:$0xff]   ;;  %v3785_v12 = vld [vmem:[#allocation8 + $0x270] ss:$8 sps:$4 sm:$0xff]  }
0x1b5e   :  { %v2857_v10 = vmul.f32 %v2850_v22, %v2596_v5  ;;  %v2891_v61 = vld [vmem:[#allocation11 + $0x1c8] sm:$0xff] }
0x1b67   :  { %v3867_v63 = vpop.eup %3866 }
0x1b68   :  { %v2855_v1 = vmul.f32 %v3867_v63, %v2597_v62 }
0x1b6a   :  { %v2856_v6 = vmul.f32 %v2855_v1, %v2596_v5 }
0x1b6c   :  { %v2858_v7 = vmul.f32 1.442695, %v2856_v6  ;;  %v4454_v15 = vadd.f32 %v2856_v6, %v4430_v33  ;;  %v3773_v33 = vld [vmem:[#allocation7 + $0x128] sm:$0xff]  }
0x1b6d   :  { %3592 = vmatpush3.bf16.msra.mxu0 %v3773_v33 }
0x1b6e   :  { %3868 = vpow2.f32 %v2858_v7  ;;  %3593 = vmatprep.subr.bf16.mxu0 %v4077_v0 }
0x1b71   :  { %3594 = vmatpush3.bf16.msra.mxu0 %v3774_v19 }
0x1b72   :  { %3595 = vmatprep.subr.bf16.mxu0 %v4077_v0 }
0x1b78   :  { %v3869_v9 = vpop.eup %3868 }
0x1b79   :  { %v2860_v13 = vmul.f32 %v3869_v9, %v4433_v32  ;;  %v3775_v32 = vld [vmem:[#allocation7 + $0x138] sm:$0xff]  }
0x1b7a   :  { %3596 = vmatpush3.bf16.msra.mxu0 %v3775_v32 }
0x1b7b   :  { %v4457_v3 = vadd.f32 %v2860_v13, %v2857_v10 }
0x1b7d   :  { %v2898_v16 = vmul.f32 %v2895_v14, %v4457_v3 }
0x1b7f   :  { %v2899_v11 = vpack.c.bf16 %v2898_v16, %v2898_v16 }
0x1b81   :  { %3586 = vmatmul.mubr.msk.bf16.vlgmr.msra.gmra.mrb[52].mxu1 %vm124_vm1, %v2899_v11 }
0x1b82   :  { %3145 = vmatprep.mubr.bf16.mxu1 %v4079_v18  ;;  %3114 = vmatpush1.bf16.msra.mxu1 %v3776_v55 }
0x1b83   :  { %3115 = vmatprep.subr.bf16.mxu1 %v3781_v31 }
0x1b86   :  { %3116 = vmatpush1.bf16.msra.mxu1 %v3779_v57 }
0x1b87   :  { %3117 = vmatprep.subr.bf16.mxu1 %v3784_v58 }
0x1b8a   :  { %3118 = vmatpush1.bf16.msra.mxu1 %v3782_v59 }
0x1b8b   :  { %3119 = vmatprep.subr.bf16.mxu1 %v3787_v60 }
0x1b8e   :  { %3120 = vmatpush1.bf16.msra.mxu1 %v3785_v12 }
0x1c54   :  { %v2943_v21 = vpop.f32.mrb[52].mxu1 }
0x1c55   :  { %v2944_v23 = vadd.f32 %v2943_v21, %v2888_v20  ;;  %v3587_v24 = vpop.f32.mrb[53].mxu1 }
0x1c56   :  { %v2946_v25 = vpop.f32.mrb[54].mxu1 }
0x1c57   :  { %v2949_v18 = vmax.f32 %v2944_v23, 0.0  ;;  %v3588_v26 = vpop.f32.mrb[55].mxu1 }
0x1c59   :  { %v2950_v40 = vsel %vm249_vm2, %v2949_v18, 0.0  ;;  %v2957_v27 = vmul.f32 %v2949_v18, %v2949_v18 }
0x1c5a   :  { %v2951_v28 = vrot.slane %v2950_v40, 4 }
0x1c5b   :  { %v2958_v29 = vsel %vm249_vm2, %v2957_v27, 0.0 }
0x1c5c   :  { %v2952_v30 = vadd.f32 %v2951_v28, %v2950_v40  ;;  %v2959_v34 = vrot.slane %v2958_v29, 4 }
0x1c5e   :  { %v2953_v35 = vrot.slane %v2952_v30, 2  ;;  %v2960_v36 = vadd.f32 %v2959_v34, %v2958_v29  ;;  %v2892_v29 = vld [vmem:[#allocation11 + $0x1d0] sm:$0xff]  ;;  %v2893_v34 = vld [vmem:[#allocation11 + $0x1d8] sm:$0xff] }
0x1c60   :  { %v2954_v0 = vadd.f32 %v2953_v35, %v2952_v30  ;;  %v2961_v50 = vrot.slane %v2960_v36, 2 }
0x1c62   :  { %v2955_v37 = vrot.slane %v2954_v0, 1  ;;  %v2962_v49 = vadd.f32 %v2961_v50, %v2960_v36  ;;  %v2885_v50 = vld [vmem:[#allocation10 + $0x90] sm:$0xff] }
0x1c64   :  { %v2956_v38 = vadd.f32 %v2955_v37, %v2954_v0  ;;  %v2963_v39 = vrot.slane %v2962_v49, 1 }
0x1c66   :  { %v2964_v41 = vadd.f32 %v2963_v39, %v2962_v49  ;;  %v2965_v42 = vmul.f32 0.125, %v2956_v38 }
0x1c68   :  { %v2966_v43 = vmul.f32 0.125, %v2964_v41  ;;  %v2967_v44 = vmul.f32 %v2965_v42, %v2965_v42  ;;  %v2969_v46 = vsub.f32 %v2949_v18, %v2965_v42  ;;  %v2897_v42 = vld [vmem:[#allocation13 + $0xe8] sm:$0xff] }
0x1c6a   :  { %v2968_v56 = vsub.f32 %v2966_v43, %v2967_v44 }
0x1c6c   :  { %v2970_v45 = vadd.f32 1e-05, %v2968_v56  ;;  %v2896_v56 = vld [vmem:[#allocation13 + $0xe0] sm:$0xff] }
0x1c6e   :  { %3870 = vrsqrt.f32 %v2970_v45 }
0x1c78   :  { %v3871_v47 = vpop.eup %3870 }
0x1c79   :  { %v2972_v51 = vmul.f32 %v3871_v47, %v2969_v46 }
0x1c7b   :  { %v2973_v53 = vmul.f32 %v2972_v51, %v2889_v48  ;;  %v2886_v51 = vld [vmem:[#allocation10 + $0x98] sm:$0xff] }
0x1c7d   :  { %v2974_v4 = vadd.f32 %v2973_v53, %v2890_v52 }
0x1c7f   :  { %v2975_v54 = vpack.c.bf16 %v2974_v4, %v2974_v4 }
0x1c81   :  { %3598 = vmatmul.mubr.msk.bf16.vlgmr.msra.gmra.mrb[56].mxu0 %vm249_vm2, %v2975_v54 }
0x1d54   :  { %v3037_v62 = vpop.f32.mrb[56].mxu0 }
0x1d55   :  { %v3038_v63 = vadd.f32 %v3037_v62, %v2891_v61  ;;  %v3599_v1 = vpop.f32.mrb[57].mxu0 }
0x1d56   :  { %v3040_v5 = vpop.f32.mrb[58].mxu0 }
0x1d57   :  { %v3043_v6 = vmax.f32 %v3038_v63, 0.0  ;;  %v3600_v7 = vpop.f32.mrb[59].mxu0 }
0x1d59   :  { %v3044_v8 = vsel %vm249_vm2, %v3043_v6, 0.0  ;;  %v3051_v22 = vmul.f32 %v3043_v6, %v3043_v6 }
0x1d5a   :  { %v3045_v9 = vrot.slane %v3044_v8, 4 }
0x1d5b   :  { %v3052_v10 = vsel %vm249_vm2, %v3051_v22, 0.0 }
0x1d5c   :  { %v3046_v13 = vadd.f32 %v3045_v9, %v3044_v8  ;;  %v3053_v14 = vrot.slane %v3052_v10, 4 }
0x1d5e   :  { %v3047_v16 = vrot.slane %v3046_v13, 2  ;;  %v3054_v11 = vadd.f32 %v3053_v14, %v3052_v10 }
0x1d60   :  { %v3048_v17 = vadd.f32 %v3047_v16, %v3046_v13  ;;  %v3055_v33 = vrot.slane %v3054_v11, 2 }
0x1d62   :  { %v3049_v19 = vrot.slane %v3048_v17, 1  ;;  %v3056_v32 = vadd.f32 %v3055_v33, %v3054_v11 }
0x1d64   :  { %v3050_v20 = vadd.f32 %v3049_v19, %v3048_v17  ;;  %v3057_v21 = vrot.slane %v3056_v32, 1 }
0x1d66   :  { %v3058_v23 = vadd.f32 %v3057_v21, %v3056_v32  ;;  %v3059_v24 = vmul.f32 0.125, %v3050_v20 }
0x1d68   :  { %v3060_v25 = vmul.f32 0.125, %v3058_v23  ;;  %v3061_v18 = vmul.f32 %v3059_v24, %v3059_v24  ;;  %v3063_v27 = vsub.f32 %v3043_v6, %v3059_v24 }
0x1d6a   :  { %v3062_v26 = vsub.f32 %v3060_v25, %v3061_v18 }
0x1d6c   :  { %v3064_v40 = vadd.f32 1e-05, %v3062_v26 }
0x1d6e   :  { %3872 = vrsqrt.f32 %v3064_v40 }
0x1d78   :  { %v3873_v28 = vpop.eup %3872 }
0x1d79   :  { %v3066_v30 = vmul.f32 %v3873_v28, %v3063_v27 }
0x1d7b   :  { %v3067_v35 = vmul.f32 %v3066_v30, %v2892_v29 }
0x1d7d   :  { %v3068_v36 = vadd.f32 %v3067_v35, %v2893_v34 }
0x1d7f   :  { %v3069_v0 = vpack.c.bf16 %v3068_v36, %v3068_v36 }
0x1d81   :  { %3350 = vmatmul.mubr.msk.bf16.vlgmr.msra.gmra.mrb[56].mxu1 %vm249_vm2, %v3069_v0 }
0x1e54   :  { %v3147_v37 = vpop.f32.mrb[56].mxu1 }
0x1e55   :  { %v3148_v49 = vadd.f32 %v3147_v37, %v2885_v50  ;;  %v3149_v38 = vpop.f32.mrb[57].mxu1 }
0x1e56   :  { %v3151_v39 = vpop.f32.mrb[58].mxu1  ;;  %v3150_v52 = vadd.f32 %v3149_v38, %v2886_v51 }
0x1e57   :  { %3874 = vtanh.f32 %v3148_v49  ;;  %v3152_v41 = vpop.f32.mrb[59].mxu1 }
0x1e58   :  { %v3157_v4 = vmul.f32 %v3150_v52, %v2896_v56 }
0x1e61   :  { %v3875_v43 = vpop.eup %3874 }
0x1e62   :  { %v3155_v44 = vmul.f32 %v3875_v43, %v2897_v42 }
0x1e64   :  { %v3156_v45 = vmul.f32 %v3155_v44, %v2896_v56 }
0x1e66   :  { %v3158_v46 = vmul.f32 1.442695, %v3156_v45  ;;  %v3162_v47 = vadd.f32 %v3156_v45, %v4454_v15 }
0x1e68   :  { %3876 = vpow2.f32 %v3158_v46  ;;  %v3164_v48 = vsel %vm124_vm1, %v3162_v47, 0.0 }
0x1e69   :  { %3165 = vadd.xlane.f32.xlu0 %v3164_v48 }
0x1e72   :  { %v3877_v53 = vpop.eup %3876 }
0x1e73   :  { %v3160_v54 = vmul.f32 %v3877_v53, %v4457_v3 }
0x1e75   :  { %v3161_v2 = vadd.f32 %v3160_v54, %v3157_v4 }
0x1e77   :  { %3163 = vst.msk [vmem:[#allocation14] sm:$0xff] %vm124_vm1, %v3161_v2 }
0x1e78   :  { %4043 = shalt.err (!%p4040_p4)
}
0x1e79   :  { %s4044_s27 = scalar_lea.hbm %s4497_s7, 128 }
0x1e7a   :  { %p4045_p5 = scmp.ne.s32.totalorder %s4497_s7, %s4044_s27  ;;  %p4048_p6 = scmp.lt.u32.totalorder %s4044_s27, %s4497_s7 }
0x1e7c   :  { %p4050_p7 = pnand %p4048_p6, %p4045_p5 }
0x1e7e   :  { %4053 = shalt.err (!%p4050_p7)
}
0x1e7f   :  { %3178 = dma.vmem_to_hbm [thread:$0]  %s3176_s1, 128, %s4497_s7, [#allocation4]   ;;  %vm3167_vm4 = vcmask 7168  }
0x1ef6   :  { %v3166_v15 = vpop.xlane.xlu0 %3165 }
0x1ef7   :  { %3168 = vst.msk [vmem:[%s4498_s8] sm:$0xff] %vm3167_vm4, %v3166_v15 }
0x1ef8   :  { %4062 = dma.done.wait [#allocation4], 128  }
0x1ef9   :  { %4063 = vsyncadd [#allocation4], 4294967168 }
0x1efa   :  { %3186 = vsyncpa [#allocation3], 1 }
0x1efb   :  { %3187 = vsyncpa [#allocation6], 1 }
0x1efc   :  { %3188 = vsyncpa [#allocation9], 1 }
0x1efd   :  { %3189 = vsyncpa [#allocation12], 1 }
0x1efe   :  { %3190 = vsyncpa [#allocation4], 1 }

</bundles_post_ra>
